<compile_context>
chip_gen: v7x
topology: tpu7x:2x2x1
jax: 0.10.0
libtpu: 0.0.40
codegen_flags: <defaults>
</compile_context>

<pallas_src>
import functools

import jax
import jax.numpy as jnp
import numpy as np
from jax.experimental import pallas as pl
from jax.experimental.pallas import tpu as pltpu

EPS = 1e-5


def _conv_taps(x_ref, w_ref, *, H, W, Cin, Cout, mxu_dtype):
    """3x3 'SAME' conv of one image as 9 shifted-slice matmuls.

    x_ref : (1, (H+3)*(W+2), Cin)  flattened, spatially padded NHWC image tile
    w_ref : (9*Cin, Cout)          HWIO weights flattened in (dy, dx, cin) tap order
    Returns an (H*(W+2), Cout) f32 accumulator in padded-row coordinates; rows whose
    column position is >= W are junk (wrap-around windows) and are masked / sliced
    away by the callers.
    """
    Wp = W + 2
    HW2 = H * Wp
    acc = jnp.zeros((HW2, Cout), jnp.float32)
    for t in range(9):
        dy, dx = divmod(t, 3)
        off = dy * Wp + dx                                   # static offset
        xs = x_ref[0, pl.ds(off, HW2), :].astype(mxu_dtype)  # (HW2, Cin)
        wt = w_ref[pl.ds(t * Cin, Cin), :].astype(mxu_dtype)  # (Cin, Cout)
        acc = acc + jnp.dot(xs, wt, preferred_element_type=jnp.float32)
    return acc


def _valid_mask(H, W, Cout):
    # True for real output pixels, False for the 2 junk columns per padded row.
    Wp = W + 2
    HW2 = H * Wp
    row = jax.lax.broadcasted_iota(jnp.int32, (HW2, Cout), 0)
    return (row % Wp) < W


def conv_stats_kernel(x_ref, w_ref, b_ref, stats_ref, *, H, W, Cin, Cout, mxu_dtype):
    """Pass 1: accumulate per-channel sum / sum-of-squares of conv1(x)+b over the batch."""
    n = pl.program_id(0)

    @pl.when(n == 0)
    def _init():
        stats_ref[...] = jnp.zeros_like(stats_ref)

    acc = _conv_taps(x_ref, w_ref, H=H, W=W, Cin=Cin, Cout=Cout, mxu_dtype=mxu_dtype)
    acc = acc + b_ref[...]                                   # (1, Cout) broadcast
    accm = jnp.where(_valid_mask(H, W, Cout), acc, 0.0)      # drop junk rows from stats
    stats_ref[0:1, :] += jnp.sum(accm, axis=0, keepdims=True)
    stats_ref[1:2, :] += jnp.sum(accm * acc, axis=0, keepdims=True)


def apply_kernel(x_ref, w_ref, p_ref, out_ref, *, H, W, Cin, Cout, mxu_dtype):
    """Pass 2: conv1 + folded BN + relu + residual (center tap) + relu."""
    Wp = W + 2
    HW2 = H * Wp
    acc = _conv_taps(x_ref, w_ref, H=H, W=W, Cin=Cin, Cout=Cout, mxu_dtype=mxu_dtype)
    bias = p_ref[0:1, :]
    scale = p_ref[1:2, :]
    shift = p_ref[2:3, :]
    bn = (acc + bias) * scale + shift
    hidden = jnp.maximum(bn, 0.0)
    res = x_ref[0, pl.ds(Wp + 1, HW2), :]                    # center tap == original x
    out_ref[0, :, :] = jnp.maximum(res + hidden, 0.0).astype(out_ref.dtype)


def residual_block_forward(x_nchw, w1, b1, gamma1, beta1, *, mxu_dtype=jnp.float32):
    """x_nchw: [N, Cin, H, W] f32 (PyTorch layout). w1: HWIO [3,3,Cin,Cout]. -> [N,Cout,H,W]."""
    N, Cin, H, W = x_nchw.shape
    Cout = w1.shape[-1]
    assert Cin == Cout, "default ResidualBlock config (proj is None) needs in_dim == out_dim"

    # layout glue: NCHW -> NHWC, pad H by (1,2) and W by (1,1); the extra bottom row keeps
    # every shifted slice in-bounds.  Flatten (H+3, W+2) row-major -> free reshape.
    x = jnp.transpose(x_nchw, (0, 2, 3, 1))
    Wp = W + 2
    HW2 = H * Wp
    P2 = (H + 3) * Wp
    xflat = jnp.pad(x, ((0, 0), (1, 2), (1, 1), (0, 0))).reshape(N, P2, Cin)
    wmat = w1.reshape(9 * Cin, Cout)                         # (dy, dx, cin) tap order

    statics = dict(H=H, W=W, Cin=Cin, Cout=Cout, mxu_dtype=mxu_dtype)
    x_spec = pl.BlockSpec((1, P2, Cin), lambda n: (n, 0, 0))
    w_spec = pl.BlockSpec((9 * Cin, Cout), lambda n: (0, 0))  # resident across the grid

    # ---- pass 1: global BatchNorm statistics ----
    stats = pl.pallas_call(
        functools.partial(conv_stats_kernel, **statics),
        out_shape=jax.ShapeDtypeStruct((2, Cout), jnp.float32),
        grid_spec=pltpu.PrefetchScalarGridSpec(
            num_scalar_prefetch=0,
            grid=(N,),
            in_specs=[x_spec, w_spec, pl.BlockSpec((1, Cout), lambda n: (0, 0))],
            out_specs=pl.BlockSpec((2, Cout), lambda n: (0, 0)),
        ),
        compiler_params=pltpu.CompilerParams(dimension_semantics=("arbitrary",)),
    )(xflat, wmat, b1.reshape(1, Cout))

    # fold BN into per-channel scale/shift (tiny O(C) work between passes)
    cnt = jnp.float32(N * H * W)
    mean = stats[0] / cnt
    var = jnp.maximum(stats[1] / cnt - mean * mean, 0.0)     # biased variance (training mode)
    scale = gamma1 * jax.lax.rsqrt(var + EPS)
    shift = beta1 - mean * scale
    params = jnp.stack([b1, scale, shift], axis=0)           # single stacked (3, Cout) operand

    # ---- pass 2: conv + BN + relu + residual + relu ----
    out_flat = pl.pallas_call(
        functools.partial(apply_kernel, **statics),
        out_shape=jax.ShapeDtypeStruct((N, HW2, Cout), jnp.float32),
        grid_spec=pltpu.PrefetchScalarGridSpec(
            num_scalar_prefetch=0,
            grid=(N,),
            in_specs=[x_spec, w_spec, pl.BlockSpec((3, Cout), lambda n: (0, 0))],
            out_specs=pl.BlockSpec((1, HW2, Cout), lambda n: (n, 0, 0)),
        ),
        compiler_params=pltpu.CompilerParams(dimension_semantics=("parallel",)),
    )(xflat, wmat, params)

    # drop the 2 junk columns per padded row, back to NCHW (layout glue)
    out = out_flat.reshape(N, H, Wp, Cout)[:, :, :W, :]
    return jnp.transpose(out, (0, 3, 1, 2))


def reference_forward(x_nchw, w1, b1, gamma1, beta1):
    """Pure-JAX reference (NHWC conv), mirrors PyTorch training-mode forward."""
    x = jnp.transpose(x_nchw, (0, 2, 3, 1))
    y = jax.lax.conv_general_dilated(
        x, w1, window_strides=(1, 1), padding="SAME",
        dimension_numbers=("NHWC", "HWIO", "NHWC")) + b1
    mean = jnp.mean(y, axis=(0, 1, 2), keepdims=True)
    var = jnp.mean((y - mean) ** 2, axis=(0, 1, 2), keepdims=True)
    bn = gamma1 * (y - mean) * jax.lax.rsqrt(var + EPS) + beta1
    out = jnp.maximum(x + jnp.maximum(bn, 0.0), 0.0)
    return jnp.transpose(out, (0, 3, 1, 2))


if __name__ == "__main__":
    # small shapes: batch=2, in_dim=out_dim=4, spatial=16x16
    N, C, H, W = 2, 4, 16, 16
    key = jax.random.PRNGKey(0)
    kx, kw, kb = jax.random.split(key, 3)

    x = jax.random.normal(kx, (N, C, H, W), jnp.float32)

    # deterministic parameter init (PyTorch-like): conv kaiming-uniform, BN gamma=1 beta=0
    fan_in = C * 3 * 3
    bound = 1.0 / np.sqrt(fan_in)
    w1 = jax.random.uniform(kw, (3, 3, C, C), jnp.float32, -bound, bound)   # HWIO
    b1 = jax.random.uniform(kb, (C,), jnp.float32, -bound, bound)
    gamma1 = jnp.ones((C,), jnp.float32)
    beta1 = jnp.zeros((C,), jnp.float32)

    out = jax.block_until_ready(residual_block_forward(x, w1, b1, gamma1, beta1))
    ref = jax.block_until_ready(reference_forward(x, w1, b1, gamma1, beta1))

    assert out.shape == (N, C, H, W)
    np.testing.assert_allclose(np.asarray(out), np.asarray(ref), rtol=1e-3, atol=1e-3)
    print("KERNEL_OK")
</pallas_src>

<mosaic_0001>
module attributes {stable_mosaic.version = 11 : i64} {
  func.func @conv_stats_kernel(%arg0: i32, %arg1: memref<1x342x4xf32, #tpu.memory_space<vmem>>, %arg2: memref<36x4xf32, #tpu.memory_space<vmem>>, %arg3: memref<1x4xf32, #tpu.memory_space<vmem>>, %arg4: memref<2x4xf32, #tpu.memory_space<vmem>>) attributes {dimension_semantics = [#tpu.dimension_semantics<arbitrary>], iteration_bounds = array<i64: 2>, scalar_prefetch = 0 : i64, scratch_operands = 0 : i64, tpu.core_type = #tpu.core_type<tc>, window_params = [{transform_indices = @transform_0, window_bounds = array<i64: 1, 342, 4>}, {pipeline_mode = #tpu.pipeline_mode<synchronous>, transform_indices = @transform_1, window_bounds = array<i64: 36, 4>}, {pipeline_mode = #tpu.pipeline_mode<synchronous>, transform_indices = @transform_2, window_bounds = array<i64: 1, 4>}, {pipeline_mode = #tpu.pipeline_mode<synchronous>, transform_indices = @transform_3, window_bounds = array<i64: 2, 4>}]} {
    %c0_i32 = arith.constant 0 : i32
    %0 = arith.cmpi eq, %arg0, %c0_i32 : i32
    %1 = arith.extui %0 : i1 to i32
    %c0_i32_0 = arith.constant 0 : i32
    %2 = arith.cmpi ne, %1, %c0_i32_0 : i32
    scf.if %2 {
      %cst_56 = arith.constant 0.000000e+00 : f32
      %84 = vector.broadcast %cst_56 : f32 to vector<2x4xf32>
      %c0_57 = arith.constant 0 : index
      %c0_58 = arith.constant 0 : index
      %85 = vector.load %arg4[%c0_57, %c0_58] : memref<2x4xf32, #tpu.memory_space<vmem>>, vector<2x4xf32>
      tpu.vector_store %arg4[%c0_57, %c0_58], %84 {strides = array<i32>} : memref<2x4xf32, #tpu.memory_space<vmem>>, vector<2x4xf32>,
    } else {
    }
    %cst = arith.constant 0.000000e+00 : f32
    %3 = vector.broadcast %cst : f32 to vector<288x4xf32>
    %c0 = arith.constant 0 : index
    %c0_1 = arith.constant 0 : index
    %c0_2 = arith.constant 0 : index
    %4 = vector.load %arg1[%c0, %c0_1, %c0_2] : memref<1x342x4xf32, #tpu.memory_space<vmem>>, vector<1x288x4xf32>
    %5 = vector.shape_cast %4 : vector<1x288x4xf32> to vector<288x4xf32>
    %c0_3 = arith.constant 0 : index
    %c0_4 = arith.constant 0 : index
    %6 = vector.load %arg2[%c0_3, %c0_4] : memref<36x4xf32, #tpu.memory_space<vmem>>, vector<4x4xf32>
    %cst_5 = arith.constant dense<0.000000e+00> : vector<288x4xf32>
    %7 = tpu.matmul %5, %6, %cst_5 {dimension_numbers = #tpu.dot_dimension_numbers<[1], [0], [0], [1], [0, 0, 1, 1], [], []>} : vector<288x4xf32>, vector<4x4xf32>, vector<288x4xf32> -> vector<288x4xf32>
    %8 = arith.addf %3, %7 : vector<288x4xf32>
    %c0_6 = arith.constant 0 : index
    %c1 = arith.constant 1 : index
    %c0_7 = arith.constant 0 : index
    %9 = vector.load %arg1[%c0_6, %c1, %c0_7] : memref<1x342x4xf32, #tpu.memory_space<vmem>>, vector<1x288x4xf32>
    %10 = vector.shape_cast %9 : vector<1x288x4xf32> to vector<288x4xf32>
    %c4 = arith.constant 4 : index
    %c0_8 = arith.constant 0 : index
    %11 = vector.load %arg2[%c4, %c0_8] : memref<36x4xf32, #tpu.memory_space<vmem>>, vector<4x4xf32>
    %cst_9 = arith.constant dense<0.000000e+00> : vector<288x4xf32>
    %12 = tpu.matmul %10, %11, %cst_9 {dimension_numbers = #tpu.dot_dimension_numbers<[1], [0], [0], [1], [0, 0, 1, 1], [], []>} : vector<288x4xf32>, vector<4x4xf32>, vector<288x4xf32> -> vector<288x4xf32>
    %13 = arith.addf %8, %12 : vector<288x4xf32>
    %c0_10 = arith.constant 0 : index
    %c2 = arith.constant 2 : index
    %c0_11 = arith.constant 0 : index
    %14 = vector.load %arg1[%c0_10, %c2, %c0_11] : memref<1x342x4xf32, #tpu.memory_space<vmem>>, vector<1x288x4xf32>
    %15 = vector.shape_cast %14 : vector<1x288x4xf32> to vector<288x4xf32>
    %c8 = arith.constant 8 : index
    %c0_12 = arith.constant 0 : index
    %16 = vector.load %arg2[%c8, %c0_12] : memref<36x4xf32, #tpu.memory_space<vmem>>, vector<4x4xf32>
    %cst_13 = arith.constant dense<0.000000e+00> : vector<288x4xf32>
    %17 = tpu.matmul %15, %16, %cst_13 {dimension_numbers = #tpu.dot_dimension_numbers<[1], [0], [0], [1], [0, 0, 1, 1], [], []>} : vector<288x4xf32>, vector<4x4xf32>, vector<288x4xf32> -> vector<288x4xf32>
    %18 = arith.addf %13, %17 : vector<288x4xf32>
    %c0_14 = arith.constant 0 : index
    %c18 = arith.constant 18 : index
    %c0_15 = arith.constant 0 : index
    %19 = vector.load %arg1[%c0_14, %c18, %c0_15] : memref<1x342x4xf32, #tpu.memory_space<vmem>>, vector<1x288x4xf32>
    %20 = vector.shape_cast %19 : vector<1x288x4xf32> to vector<288x4xf32>
    %c12 = arith.constant 12 : index
    %c0_16 = arith.constant 0 : index
    %21 = vector.load %arg2[%c12, %c0_16] : memref<36x4xf32, #tpu.memory_space<vmem>>, vector<4x4xf32>
    %cst_17 = arith.constant dense<0.000000e+00> : vector<288x4xf32>
    %22 = tpu.matmul %20, %21, %cst_17 {dimension_numbers = #tpu.dot_dimension_numbers<[1], [0], [0], [1], [0, 0, 1, 1], [], []>} : vector<288x4xf32>, vector<4x4xf32>, vector<288x4xf32> -> vector<288x4xf32>
    %23 = arith.addf %18, %22 : vector<288x4xf32>
    %c0_18 = arith.constant 0 : index
    %c19 = arith.constant 19 : index
    %c0_19 = arith.constant 0 : index
    %24 = vector.load %arg1[%c0_18, %c19, %c0_19] : memref<1x342x4xf32, #tpu.memory_space<vmem>>, vector<1x288x4xf32>
    %25 = vector.shape_cast %24 : vector<1x288x4xf32> to vector<288x4xf32>
    %c16 = arith.constant 16 : index
    %c0_20 = arith.constant 0 : index
    %26 = vector.load %arg2[%c16, %c0_20] : memref<36x4xf32, #tpu.memory_space<vmem>>, vector<4x4xf32>
    %cst_21 = arith.constant dense<0.000000e+00> : vector<288x4xf32>
    %27 = tpu.matmul %25, %26, %cst_21 {dimension_numbers = #tpu.dot_dimension_numbers<[1], [0], [0], [1], [0, 0, 1, 1], [], []>} : vector<288x4xf32>, vector<4x4xf32>, vector<288x4xf32> -> vector<288x4xf32>
    %28 = arith.addf %23, %27 : vector<288x4xf32>
    %c0_22 = arith.constant 0 : index
    %c20 = arith.constant 20 : index
    %c0_23 = arith.constant 0 : index
    %29 = vector.load %arg1[%c0_22, %c20, %c0_23] : memref<1x342x4xf32, #tpu.memory_space<vmem>>, vector<1x288x4xf32>
    %30 = vector.shape_cast %29 : vector<1x288x4xf32> to vector<288x4xf32>
    %c20_24 = arith.constant 20 : index
    %c0_25 = arith.constant 0 : index
    %31 = vector.load %arg2[%c20_24, %c0_25] : memref<36x4xf32, #tpu.memory_space<vmem>>, vector<4x4xf32>
    %cst_26 = arith.constant dense<0.000000e+00> : vector<288x4xf32>
    %32 = tpu.matmul %30, %31, %cst_26 {dimension_numbers = #tpu.dot_dimension_numbers<[1], [0], [0], [1], [0, 0, 1, 1], [], []>} : vector<288x4xf32>, vector<4x4xf32>, vector<288x4xf32> -> vector<288x4xf32>
    %33 = arith.addf %28, %32 : vector<288x4xf32>
    %c0_27 = arith.constant 0 : index
    %c36 = arith.constant 36 : index
    %c0_28 = arith.constant 0 : index
    %34 = vector.load %arg1[%c0_27, %c36, %c0_28] : memref<1x342x4xf32, #tpu.memory_space<vmem>>, vector<1x288x4xf32>
    %35 = vector.shape_cast %34 : vector<1x288x4xf32> to vector<288x4xf32>
    %c24 = arith.constant 24 : index
    %c0_29 = arith.constant 0 : index
    %36 = vector.load %arg2[%c24, %c0_29] : memref<36x4xf32, #tpu.memory_space<vmem>>, vector<4x4xf32>
    %cst_30 = arith.constant dense<0.000000e+00> : vector<288x4xf32>
    %37 = tpu.matmul %35, %36, %cst_30 {dimension_numbers = #tpu.dot_dimension_numbers<[1], [0], [0], [1], [0, 0, 1, 1], [], []>} : vector<288x4xf32>, vector<4x4xf32>, vector<288x4xf32> -> vector<288x4xf32>
    %38 = arith.addf %33, %37 : vector<288x4xf32>
    %c0_31 = arith.constant 0 : index
    %c37 = arith.constant 37 : index
    %c0_32 = arith.constant 0 : index
    %39 = vector.load %arg1[%c0_31, %c37, %c0_32] : memref<1x342x4xf32, #tpu.memory_space<vmem>>, vector<1x288x4xf32>
    %40 = vector.shape_cast %39 : vector<1x288x4xf32> to vector<288x4xf32>
    %c28 = arith.constant 28 : index
    %c0_33 = arith.constant 0 : index
    %41 = vector.load %arg2[%c28, %c0_33] : memref<36x4xf32, #tpu.memory_space<vmem>>, vector<4x4xf32>
    %cst_34 = arith.constant dense<0.000000e+00> : vector<288x4xf32>
    %42 = tpu.matmul %40, %41, %cst_34 {dimension_numbers = #tpu.dot_dimension_numbers<[1], [0], [0], [1], [0, 0, 1, 1], [], []>} : vector<288x4xf32>, vector<4x4xf32>, vector<288x4xf32> -> vector<288x4xf32>
    %43 = arith.addf %38, %42 : vector<288x4xf32>
    %c0_35 = arith.constant 0 : index
    %c38 = arith.constant 38 : index
    %c0_36 = arith.constant 0 : index
    %44 = vector.load %arg1[%c0_35, %c38, %c0_36] : memref<1x342x4xf32, #tpu.memory_space<vmem>>, vector<1x288x4xf32>
    %45 = vector.shape_cast %44 : vector<1x288x4xf32> to vector<288x4xf32>
    %c32 = arith.constant 32 : index
    %c0_37 = arith.constant 0 : index
    %46 = vector.load %arg2[%c32, %c0_37] : memref<36x4xf32, #tpu.memory_space<vmem>>, vector<4x4xf32>
    %cst_38 = arith.constant dense<0.000000e+00> : vector<288x4xf32>
    %47 = tpu.matmul %45, %46, %cst_38 {dimension_numbers = #tpu.dot_dimension_numbers<[1], [0], [0], [1], [0, 0, 1, 1], [], []>} : vector<288x4xf32>, vector<4x4xf32>, vector<288x4xf32> -> vector<288x4xf32>
    %48 = arith.addf %43, %47 : vector<288x4xf32>
    %c0_39 = arith.constant 0 : index
    %c0_40 = arith.constant 0 : index
    %49 = vector.load %arg3[%c0_39, %c0_40] : memref<1x4xf32, #tpu.memory_space<vmem>>, vector<1x4xf32>
    %50 = vector.broadcast %49 : vector<1x4xf32> to vector<288x4xf32>
    %51 = arith.addf %48, %50 : vector<288x4xf32>
    %52 = tpu.iota {dimensions = array<i32: 0>} : vector<288x4xi32>
    %c18_i32 = arith.constant 18 : i32
    %c0_i32_41 = arith.constant 0 : i32
    %53 = arith.cmpi eq, %c18_i32, %c0_i32_41 : i32
    %c1_i32 = arith.constant 1 : i32
    %54 = arith.select %53, %c1_i32, %c18_i32 : i32
    %55 = vector.broadcast %54 : i32 to vector<288x4xi32>
    %56 = arith.remsi %52, %55 : vector<288x4xi32>
    %c0_i32_42 = arith.constant 0 : i32
    %57 = vector.broadcast %c0_i32_42 : i32 to vector<288x4xi32>
    %58 = arith.cmpi ne, %56, %57 : vector<288x4xi32>
    %c0_i32_43 = arith.constant 0 : i32
    %59 = vector.broadcast %c0_i32_43 : i32 to vector<288x4xi32>
    %60 = arith.cmpi slt, %56, %59 : vector<288x4xi32>
    %c0_i32_44 = arith.constant 0 : i32
    %61 = arith.cmpi slt, %54, %c0_i32_44 : i32
    %62 = vector.broadcast %61 : i1 to vector<288x4xi1>
    %63 = vector.broadcast %62 : vector<288x4xi1> to vector<288x4xi1>
    %64 = arith.xori %60, %63 : vector<288x4xi1>
    %65 = arith.andi %64, %58 : vector<288x4xi1>
    %66 = vector.broadcast %54 : i32 to vector<288x4xi32>
    %67 = arith.addi %56, %66 : vector<288x4xi32>
    %68 = arith.select %65, %67, %56 : vector<288x4xi1>, vector<288x4xi32>
    %c16_i32 = arith.constant 16 : i32
    %69 = vector.broadcast %c16_i32 : i32 to vector<288x4xi32>
    %70 = arith.cmpi slt, %68, %69 : vector<288x4xi32>
    %cst_45 = arith.constant 0.000000e+00 : f32
    %71 = vector.broadcast %cst_45 : f32 to vector<288x4xf32>
    %72 = arith.select %70, %51, %71 : vector<288x4xi1>, vector<288x4xf32>
    %c0_46 = arith.constant 0 : index
    %c0_47 = arith.constant 0 : index
    %73 = vector.load %arg4[%c0_46, %c0_47] : memref<2x4xf32, #tpu.memory_space<vmem>>, vector<1x4xf32>
    %cst_48 = arith.constant dense<0.000000e+00> : vector<4xf32>
    %74 = vector.multi_reduction <add>, %72, %cst_48 [0] : vector<288x4xf32> to vector<4xf32>
    %75 = vector.shape_cast %74 : vector<4xf32> to vector<1x4xf32>
    %76 = arith.addf %73, %75 : vector<1x4xf32>
    %c0_49 = arith.constant 0 : index
    %c0_50 = arith.constant 0 : index
    %77 = vector.load %arg4[%c0_49, %c0_50] : memref<2x4xf32, #tpu.memory_space<vmem>>, vector<1x4xf32>
    tpu.vector_store %arg4[%c0_49, %c0_50], %76 {strides = array<i32>} : memref<2x4xf32, #tpu.memory_space<vmem>>, vector<1x4xf32>,
    %c1_51 = arith.constant 1 : index
    %c0_52 = arith.constant 0 : index
    %78 = vector.load %arg4[%c1_51, %c0_52] : memref<2x4xf32, #tpu.memory_space<vmem>>, vector<1x4xf32>
    %79 = arith.mulf %72, %51 : vector<288x4xf32>
    %cst_53 = arith.constant dense<0.000000e+00> : vector<4xf32>
    %80 = vector.multi_reduction <add>, %79, %cst_53 [0] : vector<288x4xf32> to vector<4xf32>
    %81 = vector.shape_cast %80 : vector<4xf32> to vector<1x4xf32>
    %82 = arith.addf %78, %81 : vector<1x4xf32>
    %c1_54 = arith.constant 1 : index
    %c0_55 = arith.constant 0 : index
    %83 = vector.load %arg4[%c1_54, %c0_55] : memref<2x4xf32, #tpu.memory_space<vmem>>, vector<1x4xf32>
    tpu.vector_store %arg4[%c1_54, %c0_55], %82 {strides = array<i32>} : memref<2x4xf32, #tpu.memory_space<vmem>>, vector<1x4xf32>,
    return
  }
  func.func @transform_0(%arg0: i32) -> (i32, i32, i32) {
    %c0_i32 = arith.constant 0 : i32
    %c0_i32_0 = arith.constant 0 : i32
    %c0_i32_1 = arith.constant 0 : i32
    return %arg0, %c0_i32, %c0_i32_0 : i32, i32, i32
  }
  func.func @transform_1(%arg0: i32) -> (i32, i32) {
    %c0_i32 = arith.constant 0 : i32
    %c0_i32_0 = arith.constant 0 : i32
    %c0_i32_1 = arith.constant 0 : i32
    return %c0_i32, %c0_i32_0 : i32, i32
  }
  func.func @transform_2(%arg0: i32) -> (i32, i32) {
    %c0_i32 = arith.constant 0 : i32
    %c0_i32_0 = arith.constant 0 : i32
    %c0_i32_1 = arith.constant 0 : i32
    return %c0_i32, %c0_i32_0 : i32, i32
  }
  func.func @transform_3(%arg0: i32) -> (i32, i32) {
    %c0_i32 = arith.constant 0 : i32
    %c0_i32_0 = arith.constant 0 : i32
    %c0_i32_1 = arith.constant 0 : i32
    return %c0_i32, %c0_i32_0 : i32, i32
  }
}

</mosaic_0001>

<bundles_post_ra>
// kernel: tpu_custom_call.1
= control target key start
LH: loop header
LB: loop body
LE: loop exit
PB: predicated region body
PF: predicated region fallthrough
CT: control target
= control target key end

     0   :  { %8 = vsyncpa [#allocation3], 0  ;;  %s6545_s12 = smov 0   ;;  %s9003_s0 = inlined_call_operand.vmem [shape: f32[2,342,4], index: 0, kind: input, shape index: {}]   ;;  %s9004_s1 = inlined_call_operand.vmem [shape: f32[36,4], index: 1, kind: input, shape index: {}]   ;;  %s9005_s2 = inlined_call_operand.vmem [shape: f32[1,4], index: 2, kind: input, shape index: {}]   ;;  %s9006_s3 = inlined_call_operand.hbm [shape: f32[2,4], index: 3, kind: output, shape index: {}]  }
   0x1 LB: > { %s6551_s13 = sadd.s32 4294967295, %s6521_s12   ;;  %p4928_p0 = scmp.ge.s32.totalorder %s6521_s12, 1  ;;  %s6521_s12 = sphi %s6545_s12, %s14_s12  }
   0x2   : > { %p133_p1 = scmp.lt.s32.totalorder %s6521_s12, 3 }
   0x4   : > { %p134_p2 = pnand %p4928_p0, %p133_p1 }
   0x6   : > { %137 = sbr.rel (%p134_p2) target bundleno = 627 (0x273), region = 32 }
   0xd   : > { %p152_p3 = scmp.lt.s32.totalorder %s6551_s13, 1  ;;  %p4930_p4 = scmp.ne.s32.totalorder %s6551_s13, 0 }
   0xe   : > { %vm161_vm0 = vcmask (!%p4930_p4), 25600   ;;  %v6523_v0 = vmov (!%p4930_p4), 0.0  }
   0xf   : > { %s153_s14 = scalar_select %p152_p3, %s6551_s13, 1 }
  0x10   : > { %160 = sbr.rel (%p4930_p4) target bundleno = 23 (0x17), region = 36  ;;  %162 = vst.msk [vmem:[#allocation2] sm:$0x3] (!%p4930_p4), %vm161_vm0, %v6523_v0 }
  0x11   : > { %s6396_s15 = smul.u32 344, %s153_s14 }
  0x13   : > { %s6560_s18 = scalar_lea.vmem %s9003_s0, %s6396_s15 }
  0x17 PF: > { %v236_v1 = vld [vmem:[%s9004_s1 + $0x4] sm:$0xf]  ;;  %vm346_vm1 = vcmask 1043456   ;;  %v6569_v2 = vld [vmem:[%s9004_s1 + $0x10] sm:$0xf]  ;;  %vm9007_vm2 = vcmask 31744  }
  0x18   : > { %v200_v3 = vld [vmem:[%s6560_s18 + $0x1] sm:$0xff]  ;;  %5602 = vmatprep.subr.msk.mxu1 %vm346_vm1, %v236_v1  ;;  %5826 = vmatprep.subr.msk.mxu0 %vm346_vm1, %v6569_v2  ;;  %v1809_v4 = vld [vmem:[%s6560_s18 + $0x13] sm:$0xff]  ;;  %v201_v5 = vld [vmem:[%s6560_s18 + $0x9] sm:$0xff]  ;;  %s6524_s14 = smov [#allocation2]   ;;  %p6473_p5 = scmp.eq.s32.totalorder %s6551_s13, 1 }
  0x19   : > { %v199_v6 = vld [vmem:[%s9004_s1] sm:$0xf]  ;;  %5603 = vmatpush3.msk.msra.mxu1 %vm346_vm1, %v236_v1  ;;  %5604 = vmatprep.mubr.msk.f32.mxu1 %vm9007_vm2, %v200_v3  ;;  %v2274_v8 = vld [vmem:[%s9004_s1 + $0x14] sm:$0xf]  ;;  %v1812_v12 = vld [vmem:[%s6560_s18 + $0x2b] sm:$0xff]  ;;  %s4886_s15 = sshll.u32 %s6524_s14, 4  ;;  %s4887_s15 = int_to_ptr.vmem [resolvable:$true] %s4886_s15 }
  0x1a   : > { %v1810_v7 = vld [vmem:[%s6560_s18 + $0x1b] sm:$0xff]  ;;  %5827 = vmatpush3.msk.msra.mxu0 %vm346_vm1, %v6569_v2  ;;  %5828 = vmatprep.mubr.msk.f32.mxu0 %vm9007_vm2, %v1809_v4  ;;  %v202_v9 = vld [vmem:[%s6560_s18 + $0x11] sm:$0xff]  ;;  %v1811_v10 = vld [vmem:[%s6560_s18 + $0x23] sm:$0xff]  ;;  %s6485_s16 = scalar_lea.vmem %s4887_s15, 32  ;;  %p6492_p9 = scmp.lt.s32.totalorder %s4887_s15, %s4887_s15 }
  0x1b   : > { %5605 = vmatmul.mubr.msk.f32.vlgmr.msra.gmra.mrb[0].mxu1 %vm9007_vm2, %v201_v5  ;;  %5658 = vmatprep.subr.msk.mxu1 %vm346_vm1, %v199_v6  ;;  %v203_v11 = vld [vmem:[%s6560_s18 + $0x19] sm:$0xff]  ;;  %v204_v13 = vld [vmem:[%s6560_s18 + $0x21] sm:$0xff]  ;;  %v205_v15 = vld [vmem:[%s6560_s18 + $0x29] sm:$0xff]  ;;  %p6486_p6 = scmp.ne.s32.totalorder %s4887_s15, %s6485_s16  ;;  %p6493_p10 = scmp.lt.s32.totalorder %s6485_s16, %s6485_s16 }
  0x1c   : > { %5829 = vmatmul.mubr.msk.f32.vlgmr.msra.gmra.mrb[0].mxu0 %vm9007_vm2, %v1810_v7  ;;  %5882 = vmatprep.subr.msk.mxu0 %vm346_vm1, %v2274_v8  ;;  %v1813_v14 = vld [vmem:[%s6560_s18 + $0x33] sm:$0xff]  ;;  %v1814_v16 = vld [vmem:[%s6560_s18 + $0x3b] sm:$0xff]  ;;  %v1815_v18 = vld [vmem:[%s6560_s18 + $0x43] sm:$0xff] }
  0x1d   : > { %5659 = vmatpush3.msk.msra.mxu1 %vm346_vm1, %v199_v6  ;;  %5883 = vmatpush3.msk.msra.mxu0 %vm346_vm1, %v2274_v8  ;;  %v206_v17 = vld [vmem:[%s6560_s18 + $0x31] sm:$0xff]  ;;  %v207_v19 = vld [vmem:[%s6560_s18 + $0x39] sm:$0xff]  ;;  %v208_v21 = vld [vmem:[%s6560_s18 + $0x41] sm:$0xff]  ;;  %p6487_p7 = pnand %p6486_p6, %p6473_p5  ;;  %p6494_p11 = por %p6493_p10, %p6492_p9 }
  0x1e   : > { %5607 = vmatprep.mubr.msk.f32.mxu1 %vm9007_vm2, %v202_v9  ;;  %5831 = vmatprep.mubr.msk.f32.mxu0 %vm9007_vm2, %v1811_v10  ;;  %v1816_v20 = vld [vmem:[%s6560_s18 + $0x4b] sm:$0xff]  ;;  %v2703_v22 = vld [vmem:[%s9004_s1 + $0x18] sm:$0xf]  ;;  %v1819_v27 = vld [vmem:[%s6560_s18 + $0x63] sm:$0xff] }
  0x1f   : > { %5608 = vmatmul.mubr.msk.f32.gmra.mrb[2].mxu1 %vm9007_vm2, %v203_v11  ;;  %v1817_v23 = vld [vmem:[%s6560_s18 + $0x53] sm:$0xff]  ;;  %5938 = vmatprep.subr.msk.mxu0 %vm346_vm1, %v2703_v22  ;;  %v209_v24 = vld [vmem:[%s6560_s18 + $0x49] sm:$0xff]  ;;  %v1818_v25 = vld [vmem:[%s6560_s18 + $0x5b] sm:$0xff]  ;;  %p6488_p8 = pneg %p6487_p7 }
  0x20   : > { %5832 = vmatmul.mubr.msk.f32.gmra.mrb[2].mxu0 %vm9007_vm2, %v1812_v12  ;;  %5610 = vmatprep.mubr.msk.f32.mxu1 %vm9007_vm2, %v204_v13  ;;  %v210_v26 = vld [vmem:[%s6560_s18 + $0x51] sm:$0xff]  ;;  %v211_v28 = vld [vmem:[%s6560_s18 + $0x59] sm:$0xff]  ;;  %v212_v30 = vld [vmem:[%s6560_s18 + $0x61] sm:$0xff] }
  0x21   : > { %5834 = vmatprep.mubr.msk.f32.mxu0 %vm9007_vm2, %v1813_v14  ;;  %v1820_v29 = vld [vmem:[%s6560_s18 + $0x6b] sm:$0xff]  ;;  %v1821_v31 = vld [vmem:[%s6560_s18 + $0x73] sm:$0xff]  ;;  %v1822_v33 = vld [vmem:[%s6560_s18 + $0x7b] sm:$0xff]  ;;  %p6495_p12 = pnand %p6494_p11, %p6488_p8 }
  0x22   : > { %v213_v32 = vld [vmem:[%s6560_s18 + $0x69] sm:$0xff]  ;;  %v214_v34 = vld [vmem:[%s6560_s18 + $0x71] sm:$0xff]  ;;  %v215_v37 = vld [vmem:[%s6560_s18 + $0x79] sm:$0xff] }
  0x23   : > { %5611 = vmatmul.mubr.msk.f32.gmra.mrb[4].mxu1 %vm9007_vm2, %v205_v15  ;;  %v6649_v35 = vld [vmem:[%s9004_s1 + $0x8] sm:$0xf]  ;;  %v1825_v40 = vld [vmem:[%s6560_s18 + $0x93] sm:$0xff]  ;;  %v1826_v42 = vld [vmem:[%s6560_s18 + $0x9b] sm:$0xff] }
  0x24   : > { %5835 = vmatmul.mubr.msk.f32.gmra.mrb[4].mxu0 %vm9007_vm2, %v1814_v16  ;;  %5613 = vmatprep.mubr.msk.f32.mxu1 %vm9007_vm2, %v206_v17  ;;  %v1823_v36 = vld [vmem:[%s6560_s18 + $0x83] sm:$0xff]  ;;  %v1824_v38 = vld [vmem:[%s6560_s18 + $0x8b] sm:$0xff]  ;;  %v2238_v44 = vld [vmem:[%s6560_s18 + $0x14] sm:$0xff] }
  0x25   : > { %5837 = vmatprep.mubr.msk.f32.mxu0 %vm9007_vm2, %v1815_v18  ;;  %5714 = vmatprep.subr.msk.mxu1 %vm346_vm1, %v6649_v35  ;;  %v216_v39 = vld [vmem:[%s6560_s18 + $0x81] sm:$0xff]  ;;  %v217_v41 = vld [vmem:[%s6560_s18 + $0x89] sm:$0xff]  ;;  %v218_v43 = vld [vmem:[%s6560_s18 + $0x91] sm:$0xff] }
  0x26   : > { %v219_v45 = vld [vmem:[%s6560_s18 + $0x99] sm:$0xff]  ;;  %v220_v47 = vld [vmem:[%s6560_s18 + $0xa1] sm:$0xff]  ;;  %v221_v50 = vld [vmem:[%s6560_s18 + $0xa9] sm:$0xff] }
  0x27   : > { %5614 = vmatmul.mubr.msk.f32.gmra.mrb[6].mxu1 %vm9007_vm2, %v207_v19  ;;  %v2239_v46 = vld [vmem:[%s6560_s18 + $0x1c] sm:$0xff]  ;;  %v6678_v48 = vld [vmem:[%s6560_s18 + $0x24] sm:$0xff]  ;;  %v6693_v51 = vld [vmem:[%s6560_s18 + $0x2c] sm:$0xff] }
  0x28   : > { %5838 = vmatmul.mubr.msk.f32.gmra.mrb[6].mxu0 %vm9007_vm2, %v1816_v20  ;;  %5616 = vmatprep.mubr.msk.f32.mxu1 %vm9007_vm2, %v208_v21  ;;  %v6684_v49 = vld [vmem:[%s9004_s1 + $0x1c] sm:$0xf]  ;;  %v222_v52 = vld [vmem:[%s6560_s18 + $0xb1] sm:$0xff]  ;;  %v224_v56 = vld [vmem:[%s6560_s18 + $0xc1] sm:$0xff] }
  0x29   : > { %5840 = vmatprep.mubr.msk.f32.mxu0 %vm9007_vm2, %v1817_v23  ;;  %v6697_v53 = vld [vmem:[%s6560_s18 + $0x34] sm:$0xff]  ;;  %v6709_v55 = vld [vmem:[%s6560_s18 + $0x3c] sm:$0xff]  ;;  %v6713_v57 = vld [vmem:[%s6560_s18 + $0x44] sm:$0xff] }
  0x2a   : > { %v223_v54 = vld [vmem:[%s6560_s18 + $0xb9] sm:$0xff]  ;;  %v225_v58 = vld [vmem:[%s6560_s18 + $0xc9] sm:$0xff]  ;;  %v226_v60 = vld [vmem:[%s6560_s18 + $0xd1] sm:$0xff] }
  0x2b   : > { %5617 = vmatmul.mubr.msk.f32.gmra.mrb[8].mxu1 %vm9007_vm2, %v209_v24  ;;  %v6723_v59 = vld [vmem:[%s6560_s18 + $0x4c] sm:$0xff]  ;;  %v6727_v61 = vld [vmem:[%s6560_s18 + $0x54] sm:$0xff]  ;;  %v6737_v63 = vld [vmem:[%s6560_s18 + $0x5c] sm:$0xff] }
  0x2c   : > { %5841 = vmatmul.mubr.msk.f32.gmra.mrb[8].mxu0 %vm9007_vm2, %v1818_v25  ;;  %5619 = vmatprep.mubr.msk.f32.mxu1 %vm9007_vm2, %v210_v26  ;;  %v227_v62 = vld [vmem:[%s6560_s18 + $0xd9] sm:$0xff]  ;;  %v228_v0 = vld [vmem:[%s6560_s18 + $0xe1] sm:$0xff]  ;;  %v229_v3 = vld [vmem:[%s6560_s18 + $0xe9] sm:$0xff] }
  0x2d   : > { %5843 = vmatprep.mubr.msk.f32.mxu0 %vm9007_vm2, %v1819_v27  ;;  %v6741_v1 = vld [vmem:[%s6560_s18 + $0x64] sm:$0xff]  ;;  %v6751_v4 = vld [vmem:[%s6560_s18 + $0x6c] sm:$0xff]  ;;  %v6755_v6 = vld [vmem:[%s6560_s18 + $0x74] sm:$0xff] }
  0x2e   : > { %v230_v5 = vld [vmem:[%s6560_s18 + $0xf1] sm:$0xff]  ;;  %v231_v7 = vld [vmem:[%s6560_s18 + $0xf9] sm:$0xff]  ;;  %v232_v9 = vld [vmem:[%s6560_s18 + $0x101] sm:$0xff] }
  0x2f   : > { %5620 = vmatmul.mubr.msk.f32.gmra.mrb[10].mxu1 %vm9007_vm2, %v211_v28  ;;  %v6765_v8 = vld [vmem:[%s6560_s18 + $0x7c] sm:$0xff]  ;;  %v6769_v10 = vld [vmem:[%s6560_s18 + $0x84] sm:$0xff]  ;;  %v6779_v12 = vld [vmem:[%s6560_s18 + $0x8c] sm:$0xff] }
  0x30   : > { %5844 = vmatmul.mubr.msk.f32.gmra.mrb[10].mxu0 %vm9007_vm2, %v1820_v29  ;;  %5622 = vmatprep.mubr.msk.f32.mxu1 %vm9007_vm2, %v212_v30  ;;  %v233_v11 = vld [vmem:[%s6560_s18 + $0x109] sm:$0xff]  ;;  %v234_v13 = vld [vmem:[%s6560_s18 + $0x111] sm:$0xff]  ;;  %v235_v15 = vld [vmem:[%s6560_s18 + $0x119] sm:$0xff] }
  0x31   : > { %5846 = vmatprep.mubr.msk.f32.mxu0 %vm9007_vm2, %v1821_v31  ;;  %v6783_v14 = vld [vmem:[%s6560_s18 + $0x94] sm:$0xff]  ;;  %v6793_v16 = vld [vmem:[%s6560_s18 + $0x9c] sm:$0xff]  ;;  %v6797_v18 = vld [vmem:[%s6560_s18 + $0xa4] sm:$0xff] }
  0x32   : > { %v163_v17 = vld [vmem:[%s6560_s18] sm:$0xff]  ;;  %v164_v19 = vld [vmem:[%s6560_s18 + $0x8] sm:$0xff]  ;;  %v165_v21 = vld [vmem:[%s6560_s18 + $0x10] sm:$0xff] }
  0x33   : > { %5623 = vmatmul.mubr.msk.f32.gmra.mrb[12].mxu1 %vm9007_vm2, %v213_v32  ;;  %v6807_v20 = vld [vmem:[%s6560_s18 + $0xac] sm:$0xff]  ;;  %v166_v24 = vld [vmem:[%s6560_s18 + $0x18] sm:$0xff]  ;;  %v167_v26 = vld [vmem:[%s6560_s18 + $0x20] sm:$0xff] }
  0x34   : > { %5847 = vmatmul.mubr.msk.f32.gmra.mrb[12].mxu0 %vm9007_vm2, %v1822_v33  ;;  %5625 = vmatprep.mubr.msk.f32.mxu1 %vm9007_vm2, %v214_v34  ;;  %v6817_v23 = vld [vmem:[%s9004_s1 + $0xc] sm:$0xf]  ;;  %v6828_v25 = vld [vmem:[%s6560_s18 + $0xbc] sm:$0xff]  ;;  %v6832_v27 = vld [vmem:[%s6560_s18 + $0xc4] sm:$0xff] }
  0x35   : > { %5849 = vmatprep.mubr.msk.f32.mxu0 %vm9007_vm2, %v1823_v36  ;;  %v168_v28 = vld [vmem:[%s6560_s18 + $0x28] sm:$0xff]  ;;  %v169_v30 = vld [vmem:[%s6560_s18 + $0x30] sm:$0xff]  ;;  %v170_v32 = vld [vmem:[%s6560_s18 + $0x38] sm:$0xff] }
  0x36   : > { %v6844_v29 = vld [vmem:[%s6560_s18 + $0xcc] sm:$0xff]  ;;  %v6848_v31 = vld [vmem:[%s6560_s18 + $0xd4] sm:$0xff]  ;;  %v6858_v33 = vld [vmem:[%s6560_s18 + $0xdc] sm:$0xff] }
  0x37   : > { %5626 = vmatmul.mubr.msk.f32.gmra.mrb[14].mxu1 %vm9007_vm2, %v215_v37  ;;  %v171_v34 = vld [vmem:[%s6560_s18 + $0x40] sm:$0xff]  ;;  %v172_v36 = vld [vmem:[%s6560_s18 + $0x48] sm:$0xff] }
  0x38   : > { %5850 = vmatmul.mubr.msk.f32.gmra.mrb[14].mxu0 %vm9007_vm2, %v1824_v38  ;;  %5628 = vmatprep.mubr.msk.f32.mxu1 %vm9007_vm2, %v216_v39  ;;  %v6872_v37 = vld [vmem:[%s6560_s18 + $0xec] sm:$0xff]  ;;  %v6876_v39 = vld [vmem:[%s6560_s18 + $0xf4] sm:$0xff] }
  0x39   : > { %5852 = vmatprep.mubr.msk.f32.mxu0 %vm9007_vm2, %v1825_v40  ;;  %v173_v38 = vld [vmem:[%s6560_s18 + $0x50] sm:$0xff]  ;;  %v174_v40 = vld [vmem:[%s6560_s18 + $0x58] sm:$0xff] }
  0x3b   : > { %5629 = vmatmul.mubr.msk.f32.gmra.mrb[16].mxu1 %vm9007_vm2, %v217_v41  ;;  %v6886_v41 = vld [vmem:[%s6560_s18 + $0xfc] sm:$0xff] }
  0x3c   : > { %5853 = vmatmul.mubr.msk.f32.gmra.mrb[16].mxu0 %vm9007_vm2, %v1826_v42  ;;  %5631 = vmatprep.mubr.msk.f32.mxu1 %vm9007_vm2, %v218_v43  ;;  %v175_v42 = vld [vmem:[%s6560_s18 + $0x60] sm:$0xff] }
  0x3d   : > { %5884 = vmatprep.mubr.msk.f32.mxu0 %vm9007_vm2, %v2238_v44  ;;  %v6890_v43 = vld [vmem:[%s6560_s18 + $0x104] sm:$0xff] }
  0x3e   : > { %v176_v44 = vld [vmem:[%s6560_s18 + $0x68] sm:$0xff] }
  0x3f   : > { %5632 = vmatmul.mubr.msk.f32.gmra.mrb[18].mxu1 %vm9007_vm2, %v219_v45  ;;  %v6900_v45 = vld [vmem:[%s6560_s18 + $0x10c] sm:$0xff] }
  0x40   : > { %5885 = vmatmul.mubr.msk.f32.vlgmr.msra.gmra.mrb[0].mxu0 %vm9007_vm2, %v2239_v46  ;;  %5634 = vmatprep.mubr.msk.f32.mxu1 %vm9007_vm2, %v220_v47  ;;  %v177_v46 = vld [vmem:[%s6560_s18 + $0x70] sm:$0xff] }
  0x41   : > { %5939 = vmatpush3.msk.msra.mxu0 %vm346_vm1, %v2703_v22  ;;  %5887 = vmatprep.mubr.msk.f32.mxu0 %vm9007_vm2, %v6678_v48  ;;  %v6811_v22 = vld [vmem:[%s6560_s18 + $0xb4] sm:$0xff] }
  0x42   : > { %5994 = vmatprep.subr.msk.mxu0 %vm346_vm1, %v6684_v49  ;;  %v6904_v47 = vld [vmem:[%s6560_s18 + $0x114] sm:$0xff] }
  0x43   : > { %5635 = vmatmul.mubr.msk.f32.gmra.mrb[20].mxu1 %vm9007_vm2, %v221_v50  ;;  %v178_v50 = vld [vmem:[%s6560_s18 + $0x78] sm:$0xff] }
  0x44   : > { %5888 = vmatmul.mubr.msk.f32.gmra.mrb[2].mxu0 %vm9007_vm2, %v6693_v51  ;;  %5637 = vmatprep.mubr.msk.f32.mxu1 %vm9007_vm2, %v222_v52  ;;  %v6914_v52 = vld [vmem:[%s6560_s18 + $0x11c] sm:$0xff] }
  0x45   : > { %5890 = vmatprep.mubr.msk.f32.mxu0 %vm9007_vm2, %v6697_v53 }
  0x47   : > { %5638 = vmatmul.mubr.msk.f32.gmra.mrb[22].mxu1 %vm9007_vm2, %v223_v54  ;;  %v179_v54 = vld [vmem:[%s6560_s18 + $0x80] sm:$0xff] }
  0x48   : > { %5891 = vmatmul.mubr.msk.f32.gmra.mrb[4].mxu0 %vm9007_vm2, %v6709_v55  ;;  %5640 = vmatprep.mubr.msk.f32.mxu1 %vm9007_vm2, %v224_v56  ;;  %v6918_v56 = vld [vmem:[%s6560_s18 + $0x124] sm:$0xff] }
  0x49   : > { %5893 = vmatprep.mubr.msk.f32.mxu0 %vm9007_vm2, %v6713_v57 }
  0x4b   : > { %5641 = vmatmul.mubr.msk.f32.gmra.mrb[24].mxu1 %vm9007_vm2, %v225_v58  ;;  %v180_v58 = vld [vmem:[%s6560_s18 + $0x88] sm:$0xff] }
  0x4c   : > { %5894 = vmatmul.mubr.msk.f32.gmra.mrb[6].mxu0 %vm9007_vm2, %v6723_v59  ;;  %5643 = vmatprep.mubr.msk.f32.mxu1 %vm9007_vm2, %v226_v60  ;;  %v6928_v60 = vld [vmem:[%s6560_s18 + $0x12c] sm:$0xff] }
  0x4d   : > { %5896 = vmatprep.mubr.msk.f32.mxu0 %vm9007_vm2, %v6727_v61 }
  0x4f   : > { %5644 = vmatmul.mubr.msk.f32.gmra.mrb[26].mxu1 %vm9007_vm2, %v227_v62  ;;  %v181_v62 = vld [vmem:[%s6560_s18 + $0x90] sm:$0xff] }
  0x50   : > { %5897 = vmatmul.mubr.msk.f32.gmra.mrb[8].mxu0 %vm9007_vm2, %v6737_v63  ;;  %5646 = vmatprep.mubr.msk.f32.mxu1 %vm9007_vm2, %v228_v0  ;;  %v182_v0 = vld [vmem:[%s6560_s18 + $0x98] sm:$0xff] }
  0x51   : > { %5899 = vmatprep.mubr.msk.f32.mxu0 %vm9007_vm2, %v6741_v1 }
  0x53   : > { %5647 = vmatmul.mubr.msk.f32.gmra.mrb[28].mxu1 %vm9007_vm2, %v229_v3  ;;  %v183_v3 = vld [vmem:[%s6560_s18 + $0xa0] sm:$0xff] }
  0x54   : > { %5900 = vmatmul.mubr.msk.f32.gmra.mrb[10].mxu0 %vm9007_vm2, %v6751_v4  ;;  %5649 = vmatprep.mubr.msk.f32.mxu1 %vm9007_vm2, %v230_v5  ;;  %v6943_v5 = vld [vmem:[%s9004_s1 + $0x20] sm:$0xf] }
  0x55   : > { %5902 = vmatprep.mubr.msk.f32.mxu0 %vm9007_vm2, %v6755_v6 }
  0x57   : > { %5650 = vmatmul.mubr.msk.f32.gmra.mrb[30].mxu1 %vm9007_vm2, %v231_v7  ;;  %v184_v7 = vld [vmem:[%s6560_s18 + $0xa8] sm:$0xff] }
  0x58   : > { %5903 = vmatmul.mubr.msk.f32.gmra.mrb[12].mxu0 %vm9007_vm2, %v6765_v8  ;;  %5652 = vmatprep.mubr.msk.f32.mxu1 %vm9007_vm2, %v232_v9  ;;  %v198_v9 = vld [vmem:[%s6560_s18 + $0x118] sm:$0xff] }
  0x59   : > { %5905 = vmatprep.mubr.msk.f32.mxu0 %vm9007_vm2, %v6769_v10 }
  0x5b   : > { %5653 = vmatmul.mubr.msk.f32.gmra.mrb[32].mxu1 %vm9007_vm2, %v233_v11  ;;  %v952_v11 = vld [vmem:[%s6560_s18 + $0xa] sm:$0xff] }
  0x5c   : > { %5906 = vmatmul.mubr.msk.f32.gmra.mrb[14].mxu0 %vm9007_vm2, %v6779_v12  ;;  %5655 = vmatprep.mubr.msk.f32.mxu1 %vm9007_vm2, %v234_v13  ;;  %v7028_v13 = vld [vmem:[%s6560_s18 + $0x1a] sm:$0xff] }
  0x5d   : > { %5908 = vmatprep.mubr.msk.f32.mxu0 %vm9007_vm2, %v6783_v14 }
  0x5f   : > { %5656 = vmatmul.mubr.msk.f32.gmra.mrb[34].mxu1 %vm9007_vm2, %v235_v15  ;;  %v7046_v15 = vld [vmem:[%s6560_s18 + $0x2a] sm:$0xff] }
  0x60   : > { %5909 = vmatmul.mubr.msk.f32.gmra.mrb[16].mxu0 %vm9007_vm2, %v6793_v16  ;;  %5660 = vmatprep.mubr.msk.f32.mxu1 %vm9007_vm2, %v163_v17  ;;  %v7060_v17 = vld [vmem:[%s6560_s18 + $0x3a] sm:$0xff] }
  0x61   : > { %5911 = vmatprep.mubr.msk.f32.mxu0 %vm9007_vm2, %v6797_v18 }
  0x63   : > { %5661 = vmatmul.mubr.msk.f32.vlgmr.msra.gmra.mrb[0].mxu1 %vm9007_vm2, %v164_v19  ;;  %v7074_v19 = vld [vmem:[%s6560_s18 + $0x4a] sm:$0xff] }
  0x64   : > { %5912 = vmatmul.mubr.msk.f32.gmra.mrb[18].mxu0 %vm9007_vm2, %v6807_v20  ;;  %5715 = vmatpush3.msk.msra.mxu1 %vm346_vm1, %v6649_v35  ;;  %v6862_v35 = vld [vmem:[%s6560_s18 + $0xe4] sm:$0xff] }
  0x65   : > { %5663 = vmatprep.mubr.msk.f32.mxu1 %vm9007_vm2, %v165_v21  ;;  %5914 = vmatprep.mubr.msk.f32.mxu0 %vm9007_vm2, %v6811_v22  ;;  %v7088_v21 = vld [vmem:[%s6560_s18 + $0x5a] sm:$0xff] }
  0x66   : > { %5770 = vmatprep.subr.msk.mxu1 %vm346_vm1, %v6817_v23 }
  0x67   : > { %5664 = vmatmul.mubr.msk.f32.gmra.mrb[2].mxu1 %vm9007_vm2, %v166_v24  ;;  %v7107_v24 = vld [vmem:[%s6560_s18 + $0x72] sm:$0xff] }
  0x68   : > { %5915 = vmatmul.mubr.msk.f32.gmra.mrb[20].mxu0 %vm9007_vm2, %v6828_v25  ;;  %5666 = vmatprep.mubr.msk.f32.mxu1 %vm9007_vm2, %v167_v26  ;;  %v7121_v26 = vld [vmem:[%s6560_s18 + $0x82] sm:$0xff] }
  0x69   : > { %5917 = vmatprep.mubr.msk.f32.mxu0 %vm9007_vm2, %v6832_v27 }
  0x6b   : > { %5667 = vmatmul.mubr.msk.f32.gmra.mrb[4].mxu1 %vm9007_vm2, %v168_v28  ;;  %v7131_v28 = vld [vmem:[%s6560_s18 + $0x8a] sm:$0xff] }
  0x6c   : > { %5918 = vmatmul.mubr.msk.f32.gmra.mrb[22].mxu0 %vm9007_vm2, %v6844_v29  ;;  %5669 = vmatprep.mubr.msk.f32.mxu1 %vm9007_vm2, %v169_v30  ;;  %v7136_v30 = vld [vmem:[%s6560_s18 + $0x92] sm:$0xff] }
  0x6d   : > { %5920 = vmatprep.mubr.msk.f32.mxu0 %vm9007_vm2, %v6848_v31 }
  0x6f   : > { %5670 = vmatmul.mubr.msk.f32.gmra.mrb[6].mxu1 %vm9007_vm2, %v170_v32  ;;  %v7145_v32 = vld [vmem:[%s6560_s18 + $0x9a] sm:$0xff] }
  0x70   : > { %5921 = vmatmul.mubr.msk.f32.gmra.mrb[24].mxu0 %vm9007_vm2, %v6858_v33  ;;  %5672 = vmatprep.mubr.msk.f32.mxu1 %vm9007_vm2, %v171_v34  ;;  %v7150_v34 = vld [vmem:[%s6560_s18 + $0xa2] sm:$0xff] }
  0x71   : > { %5923 = vmatprep.mubr.msk.f32.mxu0 %vm9007_vm2, %v6862_v35 }
  0x73   : > { %5673 = vmatmul.mubr.msk.f32.gmra.mrb[8].mxu1 %vm9007_vm2, %v172_v36  ;;  %v7159_v36 = vld [vmem:[%s6560_s18 + $0xaa] sm:$0xff] }
  0x74   : > { %5924 = vmatmul.mubr.msk.f32.gmra.mrb[26].mxu0 %vm9007_vm2, %v6872_v37  ;;  %5675 = vmatprep.mubr.msk.f32.mxu1 %vm9007_vm2, %v173_v38  ;;  %v7166_v38 = vld [vmem:[%s6560_s18 + $0xb2] sm:$0xff] }
  0x75   : > { %5926 = vmatprep.mubr.msk.f32.mxu0 %vm9007_vm2, %v6876_v39 }
  0x77   : > { %5676 = vmatmul.mubr.msk.f32.gmra.mrb[10].mxu1 %vm9007_vm2, %v174_v40  ;;  %v7175_v40 = vld [vmem:[%s6560_s18 + $0xba] sm:$0xff] }
  0x78   : > { %5927 = vmatmul.mubr.msk.f32.gmra.mrb[28].mxu0 %vm9007_vm2, %v6886_v41  ;;  %5678 = vmatprep.mubr.msk.f32.mxu1 %vm9007_vm2, %v175_v42  ;;  %v7180_v42 = vld [vmem:[%s6560_s18 + $0xc2] sm:$0xff] }
  0x79   : > { %5929 = vmatprep.mubr.msk.f32.mxu0 %vm9007_vm2, %v6890_v43 }
  0x7b   : > { %5679 = vmatmul.mubr.msk.f32.gmra.mrb[12].mxu1 %vm9007_vm2, %v176_v44  ;;  %v7189_v44 = vld [vmem:[%s6560_s18 + $0xca] sm:$0xff] }
  0x7c   : > { %5930 = vmatmul.mubr.msk.f32.gmra.mrb[30].mxu0 %vm9007_vm2, %v6900_v45  ;;  %5681 = vmatprep.mubr.msk.f32.mxu1 %vm9007_vm2, %v177_v46  ;;  %v7194_v46 = vld [vmem:[%s6560_s18 + $0xd2] sm:$0xff] }
  0x7d   : > { %5932 = vmatprep.mubr.msk.f32.mxu0 %vm9007_vm2, %v6904_v47 }
  0x7f   : > { %5682 = vmatmul.mubr.msk.f32.gmra.mrb[14].mxu1 %vm9007_vm2, %v178_v50  ;;  %v7203_v50 = vld [vmem:[%s6560_s18 + $0xda] sm:$0xff] }
  0x80   : > { %5933 = vmatmul.mubr.msk.f32.gmra.mrb[32].mxu0 %vm9007_vm2, %v6914_v52  ;;  %5684 = vmatprep.mubr.msk.f32.mxu1 %vm9007_vm2, %v179_v54  ;;  %v7208_v54 = vld [vmem:[%s6560_s18 + $0xe2] sm:$0xff] }
  0x81   : > { %5935 = vmatprep.mubr.msk.f32.mxu0 %vm9007_vm2, %v6918_v56 }
  0x83   : > { %5685 = vmatmul.mubr.msk.f32.gmra.mrb[16].mxu1 %vm9007_vm2, %v180_v58  ;;  %v7217_v58 = vld [vmem:[%s6560_s18 + $0xea] sm:$0xff] }
  0x84   : > { %5936 = vmatmul.mubr.msk.f32.gmra.mrb[34].mxu0 %vm9007_vm2, %v6928_v60  ;;  %5687 = vmatprep.mubr.msk.f32.mxu1 %vm9007_vm2, %v181_v62  ;;  %v7222_v62 = vld [vmem:[%s6560_s18 + $0xf2] sm:$0xff] }
  0x85   : > { %5940 = vmatprep.mubr.msk.f32.mxu0 %vm9007_vm2, %v6678_v48  ;;  %v185_v48 = vld [vmem:[%s6560_s18 + $0xb0] sm:$0xff] }
  0x87   : > { %5688 = vmatmul.mubr.msk.f32.gmra.mrb[18].mxu1 %vm9007_vm2, %v182_v0  ;;  %v3108_v0 = vld [vmem:[%s6560_s18 + $0x85] sm:$0xff] }
  0x88   : > { %5941 = vmatmul.mubr.msk.f32.vlgmr.msra.gmra.mrb[0].mxu0 %vm9007_vm2, %v6693_v51  ;;  %5690 = vmatprep.mubr.msk.f32.mxu1 %vm9007_vm2, %v183_v3  ;;  %v186_v51 = vld [vmem:[%s6560_s18 + $0xb8] sm:$0xff] }
  0x89   : > { %5995 = vmatpush3.msk.msra.mxu0 %vm346_vm1, %v6684_v49  ;;  %5943 = vmatprep.mubr.msk.f32.mxu0 %vm9007_vm2, %v6697_v53  ;;  %v187_v49 = vld [vmem:[%s6560_s18 + $0xc0] sm:$0xff]  ;;  %v188_v53 = vld [vmem:[%s6560_s18 + $0xc8] sm:$0xff] }
  0x8a   : > { %6050 = vmatprep.subr.msk.mxu0 %vm346_vm1, %v6943_v5  ;;  %v7231_v3 = vld [vmem:[%s6560_s18 + $0xfa] sm:$0xff] }
  0x8b   : > { %5691 = vmatmul.mubr.msk.f32.gmra.mrb[20].mxu1 %vm9007_vm2, %v184_v7  ;;  %v7236_v7 = vld [vmem:[%s6560_s18 + $0x102] sm:$0xff] }
  0x8c   : > { %5944 = vmatmul.mubr.msk.f32.gmra.mrb[2].mxu0 %vm9007_vm2, %v6709_v55  ;;  %5693 = vmatprep.mubr.msk.f32.mxu1 %vm9007_vm2, %v185_v48  ;;  %v189_v55 = vld [vmem:[%s6560_s18 + $0xd0] sm:$0xff] }
  0x8d   : > { %5946 = vmatprep.mubr.msk.f32.mxu0 %vm9007_vm2, %v6713_v57  ;;  %v190_v57 = vld [vmem:[%s6560_s18 + $0xd8] sm:$0xff] }
  0x8e   : > { %v3110_v48 = vld [vmem:[%s6560_s18 + $0x95] sm:$0xff] }
  0x8f   : > { %5694 = vmatmul.mubr.msk.f32.gmra.mrb[22].mxu1 %vm9007_vm2, %v186_v51  ;;  %v7245_v51 = vld [vmem:[%s6560_s18 + $0x10a] sm:$0xff] }
  0x90   : > { %5947 = vmatmul.mubr.msk.f32.gmra.mrb[4].mxu0 %vm9007_vm2, %v6723_v59  ;;  %5696 = vmatprep.mubr.msk.f32.mxu1 %vm9007_vm2, %v187_v49  ;;  %v191_v59 = vld [vmem:[%s6560_s18 + $0xe0] sm:$0xff] }
  0x91   : > { %5949 = vmatprep.mubr.msk.f32.mxu0 %vm9007_vm2, %v6727_v61  ;;  %v192_v61 = vld [vmem:[%s6560_s18 + $0xe8] sm:$0xff]  ;;  %v3111_v49 = vld [vmem:[%s6560_s18 + $0x9d] sm:$0xff] }
  0x93   : > { %5697 = vmatmul.mubr.msk.f32.gmra.mrb[24].mxu1 %vm9007_vm2, %v188_v53  ;;  %v7250_v53 = vld [vmem:[%s6560_s18 + $0x112] sm:$0xff] }
  0x94   : > { %5950 = vmatmul.mubr.msk.f32.gmra.mrb[6].mxu0 %vm9007_vm2, %v6737_v63  ;;  %5699 = vmatprep.mubr.msk.f32.mxu1 %vm9007_vm2, %v189_v55  ;;  %v193_v63 = vld [vmem:[%s6560_s18 + $0xf0] sm:$0xff]  ;;  %v3112_v55 = vld [vmem:[%s6560_s18 + $0xa5] sm:$0xff] }
  0x95   : > { %5952 = vmatprep.mubr.msk.f32.mxu0 %vm9007_vm2, %v6741_v1  ;;  %v194_v1 = vld [vmem:[%s6560_s18 + $0xf8] sm:$0xff] }
  0x97   : > { %5700 = vmatmul.mubr.msk.f32.gmra.mrb[26].mxu1 %vm9007_vm2, %v190_v57  ;;  %v7259_v57 = vld [vmem:[%s6560_s18 + $0x11a] sm:$0xff] }
  0x98   : > { %5953 = vmatmul.mubr.msk.f32.gmra.mrb[8].mxu0 %vm9007_vm2, %v6751_v4  ;;  %5702 = vmatprep.mubr.msk.f32.mxu1 %vm9007_vm2, %v191_v59  ;;  %v195_v4 = vld [vmem:[%s6560_s18 + $0x100] sm:$0xff]  ;;  %v3113_v59 = vld [vmem:[%s6560_s18 + $0xad] sm:$0xff] }
  0x99   : > { %5955 = vmatprep.mubr.msk.f32.mxu0 %vm9007_vm2, %v6755_v6  ;;  %v196_v6 = vld [vmem:[%s6560_s18 + $0x108] sm:$0xff] }
  0x9b   : > { %5703 = vmatmul.mubr.msk.f32.gmra.mrb[28].mxu1 %vm9007_vm2, %v192_v61  ;;  %v3114_v61 = vld [vmem:[%s6560_s18 + $0xb5] sm:$0xff] }
  0x9c   : > { %5956 = vmatmul.mubr.msk.f32.gmra.mrb[10].mxu0 %vm9007_vm2, %v6765_v8  ;;  %5705 = vmatprep.mubr.msk.f32.mxu1 %vm9007_vm2, %v193_v63  ;;  %v197_v8 = vld [vmem:[%s6560_s18 + $0x110] sm:$0xff]  ;;  %v3115_v63 = vld [vmem:[%s6560_s18 + $0xbd] sm:$0xff] }
  0x9d   : > { %5958 = vmatprep.mubr.msk.f32.mxu0 %vm9007_vm2, %v6769_v10  ;;  %v951_v10 = vld [vmem:[%s6560_s18 + $0x2] sm:$0xff] }
  0x9f   : > { %5706 = vmatmul.mubr.msk.f32.gmra.mrb[30].mxu1 %vm9007_vm2, %v194_v1  ;;  %v3116_v1 = vld [vmem:[%s6560_s18 + $0xc5] sm:$0xff] }
  0xa0   : > { %5959 = vmatmul.mubr.msk.f32.gmra.mrb[12].mxu0 %vm9007_vm2, %v6779_v12  ;;  %5708 = vmatprep.mubr.msk.f32.mxu1 %vm9007_vm2, %v195_v4  ;;  %v7020_v12 = vld [vmem:[%s6560_s18 + $0x12] sm:$0xff] }
  0xa1   : > { %5961 = vmatprep.mubr.msk.f32.mxu0 %vm9007_vm2, %v6783_v14  ;;  %v7035_v14 = vld [vmem:[%s6560_s18 + $0x22] sm:$0xff]  ;;  %v3117_v4 = vld [vmem:[%s6560_s18 + $0xcd] sm:$0xff] }
  0xa3   : > { %5709 = vmatmul.mubr.msk.f32.gmra.mrb[32].mxu1 %vm9007_vm2, %v196_v6  ;;  %v3118_v6 = vld [vmem:[%s6560_s18 + $0xd5] sm:$0xff] }
  0xa4   : > { %5962 = vmatmul.mubr.msk.f32.gmra.mrb[14].mxu0 %vm9007_vm2, %v6793_v16  ;;  %5711 = vmatprep.mubr.msk.f32.mxu1 %vm9007_vm2, %v197_v8  ;;  %v7051_v16 = vld [vmem:[%s6560_s18 + $0x32] sm:$0xff]  ;;  %v3120_v8 = vld [vmem:[%s6560_s18 + $0xe5] sm:$0xff] }
  0xa5   : > { %5964 = vmatprep.mubr.msk.f32.mxu0 %vm9007_vm2, %v6797_v18  ;;  %v7065_v18 = vld [vmem:[%s6560_s18 + $0x42] sm:$0xff] }
  0xa7   : > { %5712 = vmatmul.mubr.msk.f32.gmra.mrb[34].mxu1 %vm9007_vm2, %v198_v9  ;;  %v3121_v9 = vld [vmem:[%s6560_s18 + $0xed] sm:$0xff] }
  0xa8   : > { %5965 = vmatmul.mubr.msk.f32.gmra.mrb[16].mxu0 %vm9007_vm2, %v6807_v20  ;;  %5716 = vmatprep.mubr.msk.f32.mxu1 %vm9007_vm2, %v951_v10  ;;  %v7079_v20 = vld [vmem:[%s6560_s18 + $0x52] sm:$0xff] }
  0xa9   : > { %5967 = vmatprep.mubr.msk.f32.mxu0 %vm9007_vm2, %v6811_v22  ;;  %v7093_v22 = vld [vmem:[%s6560_s18 + $0x62] sm:$0xff]  ;;  %v3122_v10 = vld [vmem:[%s6560_s18 + $0xf5] sm:$0xff] }
  0xab   : > { %5717 = vmatmul.mubr.msk.f32.vlgmr.msra.gmra.mrb[0].mxu1 %vm9007_vm2, %v952_v11  ;;  %v3123_v11 = vld [vmem:[%s6560_s18 + $0xfd] sm:$0xff] }
  0xac   : > { %5968 = vmatmul.mubr.msk.f32.gmra.mrb[18].mxu0 %vm9007_vm2, %v6828_v25  ;;  %5771 = vmatpush3.msk.msra.mxu1 %vm346_vm1, %v6817_v23  ;;  %v7102_v23 = vld [vmem:[%s6560_s18 + $0x6a] sm:$0xff]  ;;  %v7116_v25 = vld [vmem:[%s6560_s18 + $0x7a] sm:$0xff] }
  0xad   : > { %5719 = vmatprep.mubr.msk.f32.mxu1 %vm9007_vm2, %v7020_v12  ;;  %5970 = vmatprep.mubr.msk.f32.mxu0 %vm9007_vm2, %v6832_v27  ;;  %v2701_v27 = vld [vmem:[%s6560_s18 + $0x134] sm:$0xff] }
  0xae   : > { %6106 = vmatprep.subr.msk.mxu1 %vm346_vm1, %v6569_v2 }
  0xaf   : > { %5720 = vmatmul.mubr.msk.f32.gmra.mrb[2].mxu1 %vm9007_vm2, %v7028_v13 }
  0xb0   : > { %5971 = vmatmul.mubr.msk.f32.gmra.mrb[20].mxu0 %vm9007_vm2, %v6844_v29  ;;  %5722 = vmatprep.mubr.msk.f32.mxu1 %vm9007_vm2, %v7035_v14  ;;  %v2702_v29 = vld [vmem:[%s6560_s18 + $0x13c] sm:$0xff] }
  0xb1   : > { %5973 = vmatprep.mubr.msk.f32.mxu0 %vm9007_vm2, %v6848_v31  ;;  %v3096_v31 = vld [vmem:[%s6560_s18 + $0x25] sm:$0xff] }
  0xb3   : > { %5723 = vmatmul.mubr.msk.f32.gmra.mrb[4].mxu1 %vm9007_vm2, %v7046_v15 }
  0xb4   : > { %5974 = vmatmul.mubr.msk.f32.gmra.mrb[22].mxu0 %vm9007_vm2, %v6858_v33  ;;  %5725 = vmatprep.mubr.msk.f32.mxu1 %vm9007_vm2, %v7051_v16  ;;  %v3097_v33 = vld [vmem:[%s6560_s18 + $0x2d] sm:$0xff] }
  0xb5   : > { %5976 = vmatprep.mubr.msk.f32.mxu0 %vm9007_vm2, %v6862_v35  ;;  %v3098_v35 = vld [vmem:[%s6560_s18 + $0x35] sm:$0xff] }
  0xb7   : > { %5726 = vmatmul.mubr.msk.f32.gmra.mrb[6].mxu1 %vm9007_vm2, %v7060_v17 }
  0xb8   : > { %5977 = vmatmul.mubr.msk.f32.gmra.mrb[24].mxu0 %vm9007_vm2, %v6872_v37  ;;  %5728 = vmatprep.mubr.msk.f32.mxu1 %vm9007_vm2, %v7065_v18  ;;  %v3099_v37 = vld [vmem:[%s6560_s18 + $0x3d] sm:$0xff] }
  0xb9   : > { %5979 = vmatprep.mubr.msk.f32.mxu0 %vm9007_vm2, %v6876_v39  ;;  %v3100_v39 = vld [vmem:[%s6560_s18 + $0x45] sm:$0xff] }
  0xbb   : > { %5729 = vmatmul.mubr.msk.f32.gmra.mrb[8].mxu1 %vm9007_vm2, %v7074_v19 }
  0xbc   : > { %5980 = vmatmul.mubr.msk.f32.gmra.mrb[26].mxu0 %vm9007_vm2, %v6886_v41  ;;  %5731 = vmatprep.mubr.msk.f32.mxu1 %vm9007_vm2, %v7079_v20  ;;  %v3101_v41 = vld [vmem:[%s6560_s18 + $0x4d] sm:$0xff] }
  0xbd   : > { %5982 = vmatprep.mubr.msk.f32.mxu0 %vm9007_vm2, %v6890_v43  ;;  %v3102_v43 = vld [vmem:[%s6560_s18 + $0x55] sm:$0xff] }
  0xbf   : > { %5732 = vmatmul.mubr.msk.f32.gmra.mrb[10].mxu1 %vm9007_vm2, %v7088_v21 }
  0xc0   : > { %5983 = vmatmul.mubr.msk.f32.gmra.mrb[28].mxu0 %vm9007_vm2, %v6900_v45  ;;  %5734 = vmatprep.mubr.msk.f32.mxu1 %vm9007_vm2, %v7093_v22  ;;  %v3103_v45 = vld [vmem:[%s6560_s18 + $0x5d] sm:$0xff] }
  0xc1   : > { %5985 = vmatprep.mubr.msk.f32.mxu0 %vm9007_vm2, %v6904_v47  ;;  %v3104_v47 = vld [vmem:[%s6560_s18 + $0x65] sm:$0xff] }
  0xc3   : > { %5735 = vmatmul.mubr.msk.f32.gmra.mrb[12].mxu1 %vm9007_vm2, %v7102_v23 }
  0xc4   : > { %5986 = vmatmul.mubr.msk.f32.gmra.mrb[30].mxu0 %vm9007_vm2, %v6914_v52  ;;  %5737 = vmatprep.mubr.msk.f32.mxu1 %vm9007_vm2, %v7107_v24  ;;  %v3105_v52 = vld [vmem:[%s6560_s18 + $0x6d] sm:$0xff] }
  0xc5   : > { %5988 = vmatprep.mubr.msk.f32.mxu0 %vm9007_vm2, %v6918_v56  ;;  %v3106_v56 = vld [vmem:[%s6560_s18 + $0x75] sm:$0xff] }
  0xc7   : > { %5738 = vmatmul.mubr.msk.f32.gmra.mrb[14].mxu1 %vm9007_vm2, %v7116_v25 }
  0xc8   : > { %5989 = vmatmul.mubr.msk.f32.gmra.mrb[32].mxu0 %vm9007_vm2, %v6928_v60  ;;  %5740 = vmatprep.mubr.msk.f32.mxu1 %vm9007_vm2, %v7121_v26  ;;  %v3107_v60 = vld [vmem:[%s6560_s18 + $0x7d] sm:$0xff] }
  0xc9   : > { %5991 = vmatprep.mubr.msk.f32.mxu0 %vm9007_vm2, %v2701_v27  ;;  %v3532_v27 = vld [vmem:[%s6560_s18 + $0x5e] sm:$0xff] }
  0xcb   : > { %5741 = vmatmul.mubr.msk.f32.gmra.mrb[16].mxu1 %vm9007_vm2, %v7131_v28 }
  0xcc   : > { %5992 = vmatmul.mubr.msk.f32.gmra.mrb[34].mxu0 %vm9007_vm2, %v2702_v29  ;;  %5743 = vmatprep.mubr.msk.f32.mxu1 %vm9007_vm2, %v7136_v30  ;;  %v3534_v29 = vld [vmem:[%s6560_s18 + $0x6e] sm:$0xff] }
  0xcd   : > { %5996 = vmatprep.mubr.msk.f32.mxu0 %vm9007_vm2, %v3096_v31  ;;  %v3536_v31 = vld [vmem:[%s6560_s18 + $0x7e] sm:$0xff] }
  0xcf   : > { %5744 = vmatmul.mubr.msk.f32.gmra.mrb[18].mxu1 %vm9007_vm2, %v7145_v32 }
  0xd0   : > { %5997 = vmatmul.mubr.msk.f32.vlgmr.msra.gmra.mrb[0].mxu0 %vm9007_vm2, %v3097_v33  ;;  %5746 = vmatprep.mubr.msk.f32.mxu1 %vm9007_vm2, %v7150_v34  ;;  %v3538_v33 = vld [vmem:[%s6560_s18 + $0x8e] sm:$0xff] }
  0xd1   : > { %6051 = vmatpush3.msk.msra.mxu0 %vm346_vm1, %v6943_v5  ;;  %5999 = vmatprep.mubr.msk.f32.mxu0 %vm9007_vm2, %v3098_v35  ;;  %v3109_v5 = vld [vmem:[%s6560_s18 + $0x8d] sm:$0xff]  ;;  %v3540_v35 = vld [vmem:[%s6560_s18 + $0x9e] sm:$0xff] }
  0xd3   : > { %5747 = vmatmul.mubr.msk.f32.gmra.mrb[20].mxu1 %vm9007_vm2, %v7159_v36 }
  0xd4   : > { %6000 = vmatmul.mubr.msk.f32.gmra.mrb[2].mxu0 %vm9007_vm2, %v3099_v37  ;;  %5749 = vmatprep.mubr.msk.f32.mxu1 %vm9007_vm2, %v7166_v38  ;;  %v3541_v37 = vld [vmem:[%s6560_s18 + $0xa6] sm:$0xff] }
  0xd5   : > { %6002 = vmatprep.mubr.msk.f32.mxu0 %vm9007_vm2, %v3100_v39  ;;  %v3542_v39 = vld [vmem:[%s6560_s18 + $0xae] sm:$0xff] }
  0xd7   : > { %5750 = vmatmul.mubr.msk.f32.gmra.mrb[22].mxu1 %vm9007_vm2, %v7175_v40 }
  0xd8   : > { %6003 = vmatmul.mubr.msk.f32.gmra.mrb[4].mxu0 %vm9007_vm2, %v3101_v41  ;;  %5752 = vmatprep.mubr.msk.f32.mxu1 %vm9007_vm2, %v7180_v42  ;;  %v3543_v41 = vld [vmem:[%s6560_s18 + $0xb6] sm:$0xff] }
  0xd9   : > { %6005 = vmatprep.mubr.msk.f32.mxu0 %vm9007_vm2, %v3102_v43  ;;  %v3544_v43 = vld [vmem:[%s6560_s18 + $0xbe] sm:$0xff] }
  0xdb   : > { %5753 = vmatmul.mubr.msk.f32.gmra.mrb[24].mxu1 %vm9007_vm2, %v7189_v44 }
  0xdc   : > { %6006 = vmatmul.mubr.msk.f32.gmra.mrb[6].mxu0 %vm9007_vm2, %v3103_v45  ;;  %5755 = vmatprep.mubr.msk.f32.mxu1 %vm9007_vm2, %v7194_v46  ;;  %v3545_v45 = vld [vmem:[%s6560_s18 + $0xc6] sm:$0xff] }
  0xdd   : > { %6008 = vmatprep.mubr.msk.f32.mxu0 %vm9007_vm2, %v3104_v47  ;;  %v3546_v47 = vld [vmem:[%s6560_s18 + $0xce] sm:$0xff] }
  0xdf   : > { %5756 = vmatmul.mubr.msk.f32.gmra.mrb[26].mxu1 %vm9007_vm2, %v7203_v50 }
  0xe0   : > { %6009 = vmatmul.mubr.msk.f32.gmra.mrb[8].mxu0 %vm9007_vm2, %v3105_v52  ;;  %5758 = vmatprep.mubr.msk.f32.mxu1 %vm9007_vm2, %v7208_v54  ;;  %v3547_v52 = vld [vmem:[%s6560_s18 + $0xd6] sm:$0xff] }
  0xe1   : > { %6011 = vmatprep.mubr.msk.f32.mxu0 %vm9007_vm2, %v3106_v56  ;;  %v3548_v56 = vld [vmem:[%s6560_s18 + $0xde] sm:$0xff] }
  0xe3   : > { %5759 = vmatmul.mubr.msk.f32.gmra.mrb[28].mxu1 %vm9007_vm2, %v7217_v58 }
  0xe4   : > { %6012 = vmatmul.mubr.msk.f32.gmra.mrb[10].mxu0 %vm9007_vm2, %v3107_v60  ;;  %5761 = vmatprep.mubr.msk.f32.mxu1 %vm9007_vm2, %v7222_v62  ;;  %v3549_v60 = vld [vmem:[%s6560_s18 + $0xe6] sm:$0xff] }
  0xe5   : > { %6014 = vmatprep.mubr.msk.f32.mxu0 %vm9007_vm2, %v3108_v0  ;;  %v3550_v0 = vld [vmem:[%s6560_s18 + $0xee] sm:$0xff] }
  0xe7   : > { %5762 = vmatmul.mubr.msk.f32.gmra.mrb[30].mxu1 %vm9007_vm2, %v7231_v3 }
  0xe8   : > { %6015 = vmatmul.mubr.msk.f32.gmra.mrb[12].mxu0 %vm9007_vm2, %v3109_v5  ;;  %5764 = vmatprep.mubr.msk.f32.mxu1 %vm9007_vm2, %v7236_v7  ;;  %v3551_v5 = vld [vmem:[%s6560_s18 + $0xf6] sm:$0xff] }
  0xe9   : > { %6017 = vmatprep.mubr.msk.f32.mxu0 %vm9007_vm2, %v3110_v48  ;;  %v3552_v48 = vld [vmem:[%s6560_s18 + $0xfe] sm:$0xff] }
  0xeb   : > { %5765 = vmatmul.mubr.msk.f32.gmra.mrb[32].mxu1 %vm9007_vm2, %v7245_v51 }
  0xec   : > { %6018 = vmatmul.mubr.msk.f32.gmra.mrb[14].mxu0 %vm9007_vm2, %v3111_v49  ;;  %5767 = vmatprep.mubr.msk.f32.mxu1 %vm9007_vm2, %v7250_v53  ;;  %v3553_v49 = vld [vmem:[%s6560_s18 + $0x106] sm:$0xff] }
  0xed   : > { %6020 = vmatprep.mubr.msk.f32.mxu0 %vm9007_vm2, %v3112_v55  ;;  %v3554_v55 = vld [vmem:[%s6560_s18 + $0x10e] sm:$0xff] }
  0xef   : > { %5768 = vmatmul.mubr.msk.f32.gmra.mrb[34].mxu1 %vm9007_vm2, %v7259_v57 }
  0xf0   : > { %6021 = vmatmul.mubr.msk.f32.gmra.mrb[16].mxu0 %vm9007_vm2, %v3113_v59  ;;  %5772 = vmatprep.mubr.msk.f32.mxu1 %vm9007_vm2, %v7020_v12  ;;  %v3124_v12 = vld [vmem:[%s6560_s18 + $0x105] sm:$0xff]  ;;  %v3555_v59 = vld [vmem:[%s6560_s18 + $0x116] sm:$0xff] }
  0xf1   : > { %6023 = vmatprep.mubr.msk.f32.mxu0 %vm9007_vm2, %v3114_v61  ;;  %v1840_v61 = vld [vmem:[%s6560_s18 + $0x10b] sm:$0xff] }
  0xf3   : > { %5773 = vmatmul.mubr.msk.f32.vlgmr.msra.gmra.mrb[0].mxu1 %vm9007_vm2, %v7028_v13  ;;  %v3125_v13 = vld [vmem:[%s6560_s18 + $0x10d] sm:$0xff] }
  0xf4   : > { %6024 = vmatmul.mubr.msk.f32.gmra.mrb[18].mxu0 %vm9007_vm2, %v3115_v63  ;;  %6107 = vmatpush3.msk.msra.mxu1 %vm346_vm1, %v6569_v2  ;;  %v3119_v2 = vld [vmem:[%s6560_s18 + $0xdd] sm:$0xff] }
  0xf5   : > { %5775 = vmatprep.mubr.msk.f32.mxu1 %vm9007_vm2, %v7035_v14  ;;  %6026 = vmatprep.mubr.msk.f32.mxu0 %vm9007_vm2, %v3116_v1  ;;  %v3126_v14 = vld [vmem:[%s6560_s18 + $0x115] sm:$0xff]  ;;  %v3556_v63 = vld [vmem:[%s6560_s18 + $0x11e] sm:$0xff] }
  0xf6   : > { %v1841_v1 = vld [vmem:[%s6560_s18 + $0x113] sm:$0xff] }
  0xf7   : > { %5776 = vmatmul.mubr.msk.f32.gmra.mrb[2].mxu1 %vm9007_vm2, %v7046_v15  ;;  %v3127_v15 = vld [vmem:[%s6560_s18 + $0x11d] sm:$0xff] }
  0xf8   : > { %6027 = vmatmul.mubr.msk.f32.gmra.mrb[20].mxu0 %vm9007_vm2, %v3117_v4  ;;  %5778 = vmatprep.mubr.msk.f32.mxu1 %vm9007_vm2, %v7051_v16  ;;  %v3128_v16 = vld [vmem:[%s6560_s18 + $0x125] sm:$0xff] }
  0xf9   : > { %6029 = vmatprep.mubr.msk.f32.mxu0 %vm9007_vm2, %v3118_v6  ;;  %v3557_v4 = vld [vmem:[%s6560_s18 + $0x126] sm:$0xff]  ;;  %v1842_v6 = vld [vmem:[%s6560_s18 + $0x11b] sm:$0xff] }
  0xfb   : > { %5779 = vmatmul.mubr.msk.f32.gmra.mrb[4].mxu1 %vm9007_vm2, %v7060_v17  ;;  %v3129_v17 = vld [vmem:[%s6560_s18 + $0x12d] sm:$0xff] }
  0xfc   : > { %6030 = vmatmul.mubr.msk.f32.gmra.mrb[22].mxu0 %vm9007_vm2, %v3119_v2  ;;  %5781 = vmatprep.mubr.msk.f32.mxu1 %vm9007_vm2, %v7065_v18  ;;  %v3130_v18 = vld [vmem:[%s6560_s18 + $0x135] sm:$0xff] }
  0xfd   : > { %6032 = vmatprep.mubr.msk.f32.mxu0 %vm9007_vm2, %v3120_v8  ;;  %v3558_v2 = vld [vmem:[%s6560_s18 + $0x12e] sm:$0xff]  ;;  %v1843_v8 = vld [vmem:[%s6560_s18 + $0x123] sm:$0xff] }
  0xff   : > { %5782 = vmatmul.mubr.msk.f32.gmra.mrb[6].mxu1 %vm9007_vm2, %v7074_v19  ;;  %v3131_v19 = vld [vmem:[%s6560_s18 + $0x13d] sm:$0xff] }
 0x100   : > { %6033 = vmatmul.mubr.msk.f32.gmra.mrb[24].mxu0 %vm9007_vm2, %v3121_v9  ;;  %5784 = vmatprep.mubr.msk.f32.mxu1 %vm9007_vm2, %v7079_v20  ;;  %v3525_v20 = vld [vmem:[%s6560_s18 + $0x26] sm:$0xff]  ;;  %v3559_v9 = vld [vmem:[%s6560_s18 + $0x136] sm:$0xff] }
 0x101   : > { %6035 = vmatprep.mubr.msk.f32.mxu0 %vm9007_vm2, %v3122_v10  ;;  %v1844_v10 = vld [vmem:[%s6560_s18 + $0x12b] sm:$0xff] }
 0x103   : > { %5785 = vmatmul.mubr.msk.f32.gmra.mrb[8].mxu1 %vm9007_vm2, %v7088_v21  ;;  %v3526_v21 = vld [vmem:[%s6560_s18 + $0x2e] sm:$0xff] }
 0x104   : > { %6036 = vmatmul.mubr.msk.f32.gmra.mrb[26].mxu0 %vm9007_vm2, %v3123_v11  ;;  %5787 = vmatprep.mubr.msk.f32.mxu1 %vm9007_vm2, %v7093_v22  ;;  %v3527_v22 = vld [vmem:[%s6560_s18 + $0x36] sm:$0xff]  ;;  %v3560_v11 = vld [vmem:[%s6560_s18 + $0x13e] sm:$0xff] }
 0x105   : > { %6038 = vmatprep.mubr.msk.f32.mxu0 %vm9007_vm2, %v3124_v12  ;;  %v3997_v12 = vlaneseq }
 0x107   : > { %5788 = vmatmul.mubr.msk.f32.gmra.mrb[10].mxu1 %vm9007_vm2, %v7102_v23  ;;  %v3528_v23 = vld [vmem:[%s6560_s18 + $0x3e] sm:$0xff] }
 0x108   : > { %6039 = vmatmul.mubr.msk.f32.gmra.mrb[28].mxu0 %vm9007_vm2, %v3125_v13  ;;  %5790 = vmatprep.mubr.msk.f32.mxu1 %vm9007_vm2, %v7107_v24  ;;  %v3529_v24 = vld [vmem:[%s6560_s18 + $0x46] sm:$0xff]  ;;  %v7484_v13 = vshrl.u32 %v3997_v12, 7 }
 0x109   : > { %6041 = vmatprep.mubr.msk.f32.mxu0 %vm9007_vm2, %v3126_v14 }
 0x10a   : > { %v3999_v14 = vadd.s32 8, %v7484_v13 }
 0x10b   : > { %5791 = vmatmul.mubr.msk.f32.gmra.mrb[12].mxu1 %vm9007_vm2, %v7116_v25  ;;  %v3530_v25 = vld [vmem:[%s6560_s18 + $0x4e] sm:$0xff] }
 0x10c   : > { %6042 = vmatmul.mubr.msk.f32.gmra.mrb[30].mxu0 %vm9007_vm2, %v3127_v15  ;;  %5793 = vmatprep.mubr.msk.f32.mxu1 %vm9007_vm2, %v7121_v26  ;;  %v3531_v26 = vld [vmem:[%s6560_s18 + $0x56] sm:$0xff] }
 0x10d   : > { %6044 = vmatprep.mubr.msk.f32.mxu0 %vm9007_vm2, %v3128_v16  ;;  %v7487_v15 = vmul.u32.u64.low 3817748708, %v3999_v14  ;;  %v7488_v16 = vmul.u32.u64.high 3817748708, %v3999_v14, %v7487_v15 }
 0x10f   : > { %5794 = vmatmul.mubr.msk.f32.gmra.mrb[14].mxu1 %vm9007_vm2, %v7131_v28  ;;  %v3533_v28 = vld [vmem:[%s6560_s18 + $0x66] sm:$0xff] }
 0x110   : > { %6045 = vmatmul.mubr.msk.f32.gmra.mrb[32].mxu0 %vm9007_vm2, %v3129_v17  ;;  %5796 = vmatprep.mubr.msk.f32.mxu1 %vm9007_vm2, %v7136_v30  ;;  %v3535_v30 = vld [vmem:[%s6560_s18 + $0x76] sm:$0xff] }
 0x111   : > { %6047 = vmatprep.mubr.msk.f32.mxu0 %vm9007_vm2, %v3130_v18  ;;  %v7491_v17 = vmul.u32.u64.low 3817748708, %v7484_v13  ;;  %v7492_v18 = vmul.u32.u64.high 3817748708, %v7484_v13, %v7491_v17 }
 0x112   : > { %v7615_v17 = vadd.s32 96, %v7484_v13 }
 0x113   : > { %5797 = vmatmul.mubr.msk.f32.gmra.mrb[16].mxu1 %vm9007_vm2, %v7145_v32  ;;  %v3537_v32 = vld [vmem:[%s6560_s18 + $0x86] sm:$0xff] }
 0x114   : > { %6048 = vmatmul.mubr.msk.f32.gmra.mrb[34].mxu0 %vm9007_vm2, %v3131_v19  ;;  %5799 = vmatprep.mubr.msk.f32.mxu1 %vm9007_vm2, %v7150_v34  ;;  %v3539_v34 = vld [vmem:[%s6560_s18 + $0x96] sm:$0xff]  ;;  %v4001_v19 = vadd.s32 24, %v7484_v13 }
 0x115   : > { %6052 = vmatprep.mubr.msk.f32.mxu0 %vm9007_vm2, %v3525_v20  ;;  %v4000_v20 = vadd.s32 16, %v7484_v13 }
 0x117   : > { %5800 = vmatmul.mubr.msk.f32.gmra.mrb[18].mxu1 %vm9007_vm2, %v7159_v36  ;;  %v1414_v36 = vld [vmem:[%s6560_s18 + $0x122] sm:$0xff] }
 0x118   : > { %6053 = vmatmul.mubr.msk.f32.vlgmr.msra.gmra.mrb[0].mxu0 %vm9007_vm2, %v3526_v21  ;;  %5802 = vmatprep.mubr.msk.f32.mxu1 %vm9007_vm2, %v7166_v38  ;;  %v1415_v38 = vld [vmem:[%s6560_s18 + $0x12a] sm:$0xff]  ;;  %v4003_v21 = vadd.s32 40, %v7484_v13 }
 0x119   : > { %6055 = vmatprep.mubr.msk.f32.mxu0 %vm9007_vm2, %v3527_v22  ;;  %v4002_v22 = vadd.s32 32, %v7484_v13 }
 0x11b   : > { %5803 = vmatmul.mubr.msk.f32.gmra.mrb[20].mxu1 %vm9007_vm2, %v7175_v40  ;;  %v1827_v40 = vld [vmem:[%s6560_s18 + $0xa3] sm:$0xff] }
 0x11c   : > { %6056 = vmatmul.mubr.msk.f32.gmra.mrb[2].mxu0 %vm9007_vm2, %v3528_v23  ;;  %5805 = vmatprep.mubr.msk.f32.mxu1 %vm9007_vm2, %v7180_v42  ;;  %v1828_v42 = vld [vmem:[%s6560_s18 + $0xab] sm:$0xff] }
 0x11d   : > { %6058 = vmatprep.mubr.msk.f32.mxu0 %vm9007_vm2, %v3529_v24  ;;  %v7498_v23 = vmul.u32.u64.low 3817748708, %v4001_v19  ;;  %v7499_v24 = vmul.u32.u64.high 3817748708, %v4001_v19, %v7498_v23 }
 0x11e   : > { %v7634_v23 = vadd.s32 112, %v7484_v13 }
 0x11f   : > { %5806 = vmatmul.mubr.msk.f32.gmra.mrb[22].mxu1 %vm9007_vm2, %v7189_v44  ;;  %v1829_v44 = vld [vmem:[%s6560_s18 + $0xb3] sm:$0xff] }
 0x120   : > { %6059 = vmatmul.mubr.msk.f32.gmra.mrb[4].mxu0 %vm9007_vm2, %v3530_v25  ;;  %5808 = vmatprep.mubr.msk.f32.mxu1 %vm9007_vm2, %v7194_v46  ;;  %v1830_v46 = vld [vmem:[%s6560_s18 + $0xbb] sm:$0xff]  ;;  %v4051_v25 = vshrl.u32 %v7488_v16, 4 }
 0x121   : > { %6061 = vmatprep.mubr.msk.f32.mxu0 %vm9007_vm2, %v3531_v26 }
 0x123   : > { %5809 = vmatmul.mubr.msk.f32.gmra.mrb[24].mxu1 %vm9007_vm2, %v7203_v50  ;;  %v1831_v50 = vld [vmem:[%s6560_s18 + $0xc3] sm:$0xff] }
 0x124   : > { %6062 = vmatmul.mubr.msk.f32.gmra.mrb[6].mxu0 %vm9007_vm2, %v3532_v27  ;;  %5811 = vmatprep.mubr.msk.f32.mxu1 %vm9007_vm2, %v7208_v54  ;;  %v1832_v54 = vld [vmem:[%s6560_s18 + $0xcb] sm:$0xff]  ;;  %v7502_v26 = vmul.u32.u64.low 3817748708, %v4000_v20  ;;  %v7503_v27 = vmul.u32.u64.high 3817748708, %v4000_v20, %v7502_v26 }
 0x125   : > { %6064 = vmatprep.mubr.msk.f32.mxu0 %vm9007_vm2, %v3533_v28  ;;  %v4040_v28 = vshrl.u32 %v7492_v18, 4 }
 0x127   : > { %5812 = vmatmul.mubr.msk.f32.gmra.mrb[26].mxu1 %vm9007_vm2, %v7217_v58  ;;  %v1833_v58 = vld [vmem:[%s6560_s18 + $0xd3] sm:$0xff] }
 0x128   : > { %6065 = vmatmul.mubr.msk.f32.gmra.mrb[8].mxu0 %vm9007_vm2, %v3534_v29  ;;  %5814 = vmatprep.mubr.msk.f32.mxu1 %vm9007_vm2, %v7222_v62  ;;  %v1834_v62 = vld [vmem:[%s6560_s18 + $0xdb] sm:$0xff] }
 0x129   : > { %6067 = vmatprep.mubr.msk.f32.mxu0 %vm9007_vm2, %v3535_v30  ;;  %v7506_v29 = vmul.u32.u64.low 3817748708, %v4003_v21  ;;  %v7507_v30 = vmul.u32.u64.high 3817748708, %v4003_v21, %v7506_v29 }
 0x12a   : > { %v9099_v29 = vmov 0 }
 0x12b   : > { %5815 = vmatmul.mubr.msk.f32.gmra.mrb[28].mxu1 %vm9007_vm2, %v7231_v3  ;;  %v1835_v3 = vld [vmem:[%s6560_s18 + $0xe3] sm:$0xff] }
 0x12c   : > { %6068 = vmatmul.mubr.msk.f32.gmra.mrb[10].mxu0 %vm9007_vm2, %v3536_v31  ;;  %5817 = vmatprep.mubr.msk.f32.mxu1 %vm9007_vm2, %v7236_v7  ;;  %v1836_v7 = vld [vmem:[%s6560_s18 + $0xeb] sm:$0xff] }
 0x12d   : > { %6070 = vmatprep.mubr.msk.f32.mxu0 %vm9007_vm2, %v3537_v32  ;;  %v7509_v31 = vmul.u32.u64.low 3817748708, %v4002_v22  ;;  %v7510_v32 = vmul.u32.u64.high 3817748708, %v4002_v22, %v7509_v31 }
 0x12f   : > { %5818 = vmatmul.mubr.msk.f32.gmra.mrb[30].mxu1 %vm9007_vm2, %v7245_v51  ;;  %v1837_v51 = vld [vmem:[%s6560_s18 + $0xf3] sm:$0xff] }
 0x130   : > { %6071 = vmatmul.mubr.msk.f32.gmra.mrb[12].mxu0 %vm9007_vm2, %v3538_v33  ;;  %5820 = vmatprep.mubr.msk.f32.mxu1 %vm9007_vm2, %v7250_v53  ;;  %v1838_v53 = vld [vmem:[%s6560_s18 + $0xfb] sm:$0xff]  ;;  %v4052_v33 = vmul.u32 18, %v4051_v25 }
 0x131   : > { %6073 = vmatprep.mubr.msk.f32.mxu0 %vm9007_vm2, %v3539_v34  ;;  %v4041_v34 = vmul.u32 18, %v4040_v28 }
 0x133   : > { %5821 = vmatmul.mubr.msk.f32.gmra.mrb[32].mxu1 %vm9007_vm2, %v7259_v57  ;;  %v1839_v57 = vld [vmem:[%s6560_s18 + $0x103] sm:$0xff] }
 0x134   : > { %6074 = vmatmul.mubr.msk.f32.gmra.mrb[14].mxu0 %vm9007_vm2, %v3540_v35  ;;  %5823 = vmatprep.mubr.msk.f32.mxu1 %vm9007_vm2, %v1414_v36  ;;  %v7513_v35 = vadd.s32 56, %v7484_v13  ;;  %v4073_v36 = vshrl.u32 %v7499_v24, 4 }
 0x135   : > { %6076 = vmatprep.mubr.msk.f32.mxu0 %vm9007_vm2, %v3541_v37  ;;  %v7517_v37 = vadd.s32 48, %v7484_v13 }
 0x137   : > { %5824 = vmatmul.mubr.msk.f32.gmra.mrb[34].mxu1 %vm9007_vm2, %v1415_v38  ;;  %v7519_v38 = vsub.s32 %v3999_v14, %v4052_v33 }
 0x138   : > { %6077 = vmatmul.mubr.msk.f32.gmra.mrb[16].mxu0 %vm9007_vm2, %v3542_v39  ;;  %5855 = vmatprep.mubr.msk.f32.mxu1 %vm9007_vm2, %v1827_v40  ;;  %v4062_v39 = vshrl.u32 %v7503_v27, 4  ;;  %v7523_v40 = vsub.s32 %v7484_v13, %v4041_v34  ;;  %v9102_v34 = vmov 0 }
 0x139   : > { %6079 = vmatprep.mubr.msk.f32.mxu0 %vm9007_vm2, %v3543_v41  ;;  %v4095_v41 = vshrl.u32 %v7507_v30, 4  ;;  %vm4431_vm3 = vcmp.ne.s32.totalorder %v7519_v38, 0  ;;  %vm4467_vm4 = vcmp.lt.s32.totalorder %v7519_v38, 0 }
 0x13a   : > { %vm4430_vm5 = vcmp.ne.s32.totalorder %v7523_v40, 0  ;;  %vm4466_vm6 = vcmp.lt.s32.totalorder %v7523_v40, 0  ;;  %vm7558_vm7 = vmand %vm4467_vm4, %vm4431_vm3 }
 0x13b   : > { %5856 = vmatmul.mubr.msk.f32.vlgmr.msra.gmra.mrb[18].mxu1 %vm9007_vm2, %v1828_v42  ;;  %vm7571_vm8 = vmand %vm4466_vm6, %vm4430_vm5 }
 0x13c   : > { %6080 = vmatmul.mubr.msk.f32.gmra.mrb[18].mxu0 %vm9007_vm2, %v3544_v43  ;;  %5858 = vmatprep.mubr.msk.f32.mxu1 %vm9007_vm2, %v1829_v44  ;;  %v7527_v42 = vmul.u32.u64.low 3817748708, %v7513_v35  ;;  %v7528_v43 = vmul.u32.u64.high 3817748708, %v7513_v35, %v7527_v42  ;;  %v4084_v44 = vshrl.u32 %v7510_v32, 4 }
 0x13d   : > { %6082 = vmatprep.mubr.msk.f32.mxu0 %vm9007_vm2, %v3545_v45  ;;  %v7532_v45 = vadd.s32 72, %v7484_v13  ;;  %v7665_v32 = vmul.u32.u64.low 3817748708, %v7615_v17  ;;  %v7666_v33 = vmul.u32.u64.high 3817748708, %v7615_v17, %v7665_v32 }
 0x13e   : > { %v9120_v32 = vmov 0 }
 0x13f   : > { %5859 = vmatmul.mubr.msk.f32.gmra.mrb[20].mxu1 %vm9007_vm2, %v1830_v46  ;;  %v4074_v46 = vmul.u32 18, %v4073_v36 }
 0x140   : > { %6083 = vmatmul.mubr.msk.f32.gmra.mrb[20].mxu0 %vm9007_vm2, %v3546_v47  ;;  %5861 = vmatprep.mubr.msk.f32.mxu1 %vm9007_vm2, %v1831_v50  ;;  %v7535_v47 = vmul.u32.u64.low 3817748708, %v7517_v37  ;;  %v7536_v50 = vmul.u32.u64.high 3817748708, %v7517_v37, %v7535_v47 }
 0x141   : > { %6085 = vmatprep.mubr.msk.f32.mxu0 %vm9007_vm2, %v3547_v52  ;;  %v7539_v52 = vadd.s32 64, %v7484_v13 }
 0x143   : > { %5862 = vmatmul.mubr.msk.f32.gmra.mrb[22].mxu1 %vm9007_vm2, %v1832_v54  ;;  %v4063_v54 = vmul.u32 18, %v4062_v39 }
 0x144   : > { %6086 = vmatmul.mubr.msk.f32.gmra.mrb[22].mxu0 %vm9007_vm2, %v3548_v56  ;;  %5864 = vmatprep.mubr.msk.f32.mxu1 %vm9007_vm2, %v1833_v58  ;;  %v7544_v56 = vadd.s32 88, %v7484_v13  ;;  %v4096_v58 = vmul.u32 18, %v4095_v41 }
 0x145   : > { %6088 = vmatprep.mubr.msk.f32.mxu0 %vm9007_vm2, %v3549_v60  ;;  %v7549_v60 = vadd.s32 80, %v7484_v13 }
 0x147   : > { %5865 = vmatmul.mubr.msk.f32.gmra.mrb[24].mxu1 %vm9007_vm2, %v1834_v62  ;;  %v7552_v62 = vadd.s32 18, %v7519_v38 }
 0x148   : > { %6089 = vmatmul.mubr.msk.f32.gmra.mrb[24].mxu0 %vm9007_vm2, %v3550_v0  ;;  %5867 = vmatprep.mubr.msk.f32.mxu1 %vm9007_vm2, %v1835_v3  ;;  %v4085_v0 = vmul.u32 18, %v4084_v44 }
 0x149   : > { %6091 = vmatprep.mubr.msk.f32.mxu0 %vm9007_vm2, %v3551_v5  ;;  %v7555_v3 = vmul.u32.u64.low 3817748708, %v7532_v45  ;;  %v7556_v5 = vmul.u32.u64.high 3817748708, %v7532_v45, %v7555_v3 }
 0x14b   : > { %5868 = vmatmul.mubr.msk.f32.gmra.mrb[26].mxu1 %vm9007_vm2, %v1836_v7  ;;  %v4139_v18 = vshrl.u32 %v7556_v5, 4 }
 0x14c   : > { %6092 = vmatmul.mubr.msk.f32.gmra.mrb[26].mxu0 %vm9007_vm2, %v3552_v48  ;;  %5870 = vmatprep.mubr.msk.f32.mxu1 %vm9007_vm2, %v1837_v51  ;;  %v7563_v48 = vadd.s32 18, %v7523_v40  ;;  %v7565_v51 = vsub.s32 %v4001_v19, %v4074_v46  ;;  %v7621_v19 = vadd.s32 120, %v7484_v13 }
 0x14d   : > { %6094 = vmatprep.mubr.msk.f32.mxu0 %vm9007_vm2, %v3553_v49  ;;  %v4140_v36 = vmul.u32 18, %v4139_v18  ;;  %v7685_v44 = vmul.u32.u64.low 3817748708, %v7634_v23  ;;  %v7686_v46 = vmul.u32.u64.high 3817748708, %v7634_v23, %v7685_v44  ;;  %v9111_v18 = vmov 0 }
 0x14e   : > { %vm4433_vm9 = vcmp.ne.s32.totalorder %v7565_v51, 0  ;;  %vm4469_vm10 = vcmp.lt.s32.totalorder %v7565_v51, 0  ;;  %v7605_v12 = vadd.s32 18, %v7565_v51  ;;  %v9215_v7 = vsel %vm7571_vm8, %v7563_v48, %v7523_v40 }
 0x14f   : > { %5871 = vmatmul.mubr.msk.f32.gmra.mrb[28].mxu1 %vm9007_vm2, %v1838_v53  ;;  %v7568_v49 = vmul.u32.u64.low 3817748708, %v7539_v52  ;;  %v7569_v53 = vmul.u32.u64.high 3817748708, %v7539_v52, %v7568_v49  ;;  %vm7627_vm0 = vmand %vm4469_vm10, %vm4433_vm9  ;;  %v7675_v39 = vmul.u32.u64.low 3817748708, %v7621_v19  ;;  %v7676_v41 = vmul.u32.u64.high 3817748708, %v7621_v19, %v7675_v39 }
 0x150   : > { %6095 = vmatmul.mubr.msk.f32.gmra.mrb[28].mxu0 %vm9007_vm2, %v3554_v55  ;;  %5873 = vmatprep.mubr.msk.f32.mxu1 %vm9007_vm2, %v1839_v57  ;;  %v7575_v57 = vsub.s32 %v4000_v20, %v4063_v54  ;;  %v7710_v49 = vsub.s32 %v7532_v45, %v4140_v36  ;;  %v9124_v39 = vmov 0  ;;  %v9226_v48 = vmov 0 }
 0x151   : > { %6097 = vmatprep.mubr.msk.f32.mxu0 %vm9007_vm2, %v3555_v59  ;;  %v9240_v20 = vmov 0 }
 0x152   : > { %vm4432_vm11 = vcmp.ne.s32.totalorder %v7575_v57, 0  ;;  %vm4468_vm12 = vcmp.lt.s32.totalorder %v7575_v57, 0  ;;  %v7643_v25 = vadd.s32 18, %v7575_v57  ;;  %9105 = vst [vmem:[#allocation9_spill] sm:$0xff] %v7710_v49 }
 0x153   : > { %5874 = vmatmul.mubr.msk.f32.gmra.mrb[30].mxu1 %vm9007_vm2, %v1840_v61  ;;  %v7578_v59 = vmul.u32.u64.low 3817748708, %v7544_v56  ;;  %v7579_v61 = vmul.u32.u64.high 3817748708, %v7544_v56, %v7578_v59  ;;  %vm7638_vm3 = vmand %vm4468_vm12, %vm4432_vm11  ;;  %vm4439_vm12 = vcmp.ne.s32.totalorder %v7710_v49, 0 }
 0x154   : > { %6098 = vmatmul.mubr.msk.f32.gmra.mrb[30].mxu0 %vm9007_vm2, %v3556_v63  ;;  %5876 = vmatprep.mubr.msk.f32.mxu1 %vm9007_vm2, %v1841_v1  ;;  %v7582_v63 = vadd.s32 104, %v7484_v13  ;;  %v7584_v1 = vsub.s32 %v4003_v21, %v4096_v58  ;;  %v7694_v58 = vadd.s32 128, %v7484_v13 }
 0x155   : > { %6100 = vmatprep.mubr.msk.f32.mxu0 %vm9007_vm2, %v3557_v4  ;;  %v4117_v4 = vshrl.u32 %v7528_v43, 4  ;;  %v4161_v28 = vshrl.u32 %v7579_v61, 4 }
 0x156   : > { %v7609_v14 = vmul.u32.u64.low 3817748708, %v7582_v63  ;;  %v7610_v15 = vmul.u32.u64.high 3817748708, %v7582_v63, %v7609_v14  ;;  %vm4435_vm13 = vcmp.ne.s32.totalorder %v7584_v1, 0  ;;  %vm4471_vm14 = vcmp.lt.s32.totalorder %v7584_v1, 0 }
 0x157   : > { %5877 = vmatmul.mubr.msk.f32.gmra.mrb[32].mxu1 %vm9007_vm2, %v1842_v6  ;;  %v4118_v16 = vmul.u32 18, %v4117_v4  ;;  %v7646_v26 = vadd.s32 18, %v7584_v1  ;;  %vm7656_vm4 = vmand %vm4471_vm14, %vm4435_vm13  ;;  %vm4475_vm13 = vcmp.lt.s32.totalorder %v7710_v49, 0 }
 0x158   : > { %6101 = vmatmul.mubr.msk.f32.gmra.mrb[32].mxu0 %vm9007_vm2, %v3558_v2  ;;  %5879 = vmatprep.mubr.msk.f32.mxu1 %vm9007_vm2, %v1843_v8  ;;  %v7588_v6 = vmul.u32.u64.low 3817748708, %v7549_v60  ;;  %v7589_v2 = vmul.u32.u64.high 3817748708, %v7549_v60, %v7588_v6  ;;  %v9100_v29 = vsel %vm7656_vm4, 4294967295, %v9099_v29  ;;  %v4183_v54 = vshrl.u32 %v7610_v15, 4 }
 0x159   : > { %6103 = vmatprep.mubr.msk.f32.mxu0 %vm9007_vm2, %v3559_v9  ;;  %v7595_v9 = vsub.s32 %v4002_v22, %v4085_v0  ;;  %v4128_v22 = vshrl.u32 %v7569_v53, 4  ;;  %v7661_v30 = vsub.s32 %v7513_v35, %v4118_v16  ;;  %v7679_v35 = vadd.s32 136, %v7484_v13 }
 0x15a   : > { %v4150_v31 = vshrl.u32 %v7589_v2, 4  ;;  %v4184_v2 = vmul.u32 18, %v4183_v54  ;;  %v4172_v16 = vshrl.u32 %v7666_v33, 4 }
 0x15b   : > { %5880 = vmatmul.mubr.msk.f32.gmra.mrb[34].mxu1 %vm9007_vm2, %v1844_v10  ;;  %9093 = vst [vmem:[#allocation5_spill] sm:$0xff] %v7595_v9  ;;  %vm4434_vm15 = vcmp.ne.s32.totalorder %v7595_v9, 0  ;;  %vm4470_vm1 = vcmp.lt.s32.totalorder %v7595_v9, 0  ;;  %v7649_v27 = vadd.s32 18, %v7595_v9  ;;  %9101 = vst [vmem:[#allocation7_spill] sm:$0xff] %v7661_v30  ;;  %v4129_v43 = vmul.u32 18, %v4128_v22 }
 0x15c   : > { %6104 = vmatmul.mubr.msk.f32.gmra.mrb[34].mxu0 %vm9007_vm2, %v3560_v11  ;;  %v4106_v11 = vshrl.u32 %v7536_v50, 4  ;;  %vm7670_vm5 = vmand %vm4470_vm1, %vm4434_vm15  ;;  %v4162_v50 = vmul.u32 18, %v4161_v28  ;;  %v4151_v5 = vmul.u32 18, %v4150_v31  ;;  %vm4437_vm6 = vcmp.ne.s32.totalorder %v7661_v30, 0 }
 0x15d   : > { %9098 = vst [vmem:[#allocation6_spill] sm:$0xff] %v7649_v27  ;;  %v9103_v34 = vsel %vm7670_vm5, 4294967295, %v9102_v34  ;;  %v7713_v53 = vmul.u32.u64.low 3817748708, %v7679_v35  ;;  %v7714_v59 = vmul.u32.u64.high 3817748708, %v7679_v35, %v7713_v53  ;;  %vm4473_vm9 = vcmp.lt.s32.totalorder %v7661_v30, 0  ;;  %vm7777_vm5 = vmand %vm4475_vm13, %vm4439_vm12 }
 0x15e   : > { %v4107_v21 = vmul.u32 18, %v4106_v11  ;;  %v7718_v61 = vadd.s32 18, %v7661_v30  ;;  %v7722_v4 = vsub.s32 %v7539_v52, %v4129_v43  ;;  %v7725_v6 = vsub.s32 %v7544_v56, %v4162_v50  ;;  %vm7749_vm14 = vmand %vm4473_vm9, %vm4437_vm6 }
 0x15f   : > { %v7728_v45 = vmul.u32.u64.low 3817748708, %v7694_v58  ;;  %v7729_v11 = vmul.u32.u64.high 3817748708, %v7694_v58, %v7728_v45  ;;  %v7736_v15 = vsub.s32 %v7549_v60, %v4151_v5  ;;  %v4205_v52 = vshrl.u32 %v7676_v41, 4 }
 0x160   : > { %v7682_v42 = vsub.s32 %v7517_v37, %v4107_v21  ;;  %9106 = vst [vmem:[#allocation10_spill] sm:$0xff] %v7718_v61  ;;  %9107 = vst [vmem:[#allocation11_spill] sm:$0xff] %v7722_v4  ;;  %v7743_v56 = vadd.s32 152, %v7484_v13  ;;  %v9112_v18 = vsel %vm7749_vm14, 4294967295, %v9111_v18  ;;  %v7754_v60 = vadd.s32 18, %v7710_v49 }
 0x161   : > { %9108 = vst [vmem:[#allocation12_spill] sm:$0xff] %v7725_v6  ;;  %9110 = vst [vmem:[#allocation14_spill] sm:$0xff] %v7736_v15  ;;  %vm4438_vm15 = vcmp.ne.s32.totalorder %v7722_v4, 0  ;;  %vm4474_vm1 = vcmp.lt.s32.totalorder %v7722_v4, 0  ;;  %v4194_v21 = vshrl.u32 %v7686_v46, 4  ;;  %v9115_v22 = vmov 0 }
 0x162   : > { %9104 = vst [vmem:[#allocation8_spill] sm:$0xff] %v7682_v42  ;;  %vm4436_vm10 = vcmp.ne.s32.totalorder %v7682_v42, 0  ;;  %vm4472_vm11 = vcmp.lt.s32.totalorder %v7682_v42, 0  ;;  %v7733_v14 = vadd.s32 18, %v7682_v42  ;;  %9113 = vst [vmem:[#allocation15_spill] sm:$0xff] %v9112_v18  ;;  %v7766_v28 = vadd.s32 18, %v7722_v4 }
 0x163   : > { %9114 = vst [vmem:[#allocation16_spill] sm:$0xff] %v7754_v60  ;;  %vm7761_vm2 = vmand %vm4472_vm11, %vm4436_vm10  ;;  %vm4441_vm6 = vcmp.ne.s32.totalorder %v7725_v6, 0  ;;  %vm4477_vm9 = vcmp.lt.s32.totalorder %v7725_v6, 0  ;;  %v7771_v31 = vsub.s32 %v7582_v63, %v4184_v2  ;;  %v9121_v32 = vsel %vm7777_vm5, 4294967295, %v9120_v32 }
 0x164   : > { %9109 = vst [vmem:[#allocation13_spill] sm:$0xff] %v7733_v14  ;;  %v9116_v22 = vsel %vm7761_vm2, 4294967295, %v9115_v22  ;;  %9118 = vst [vmem:[#allocation18_spill] sm:$0xff] %v7766_v28  ;;  %v7782_v33 = vadd.s32 18, %v7725_v6  ;;  %vm4440_vm10 = vcmp.ne.s32.totalorder %v7736_v15, 0  ;;  %vm4476_vm11 = vcmp.lt.s32.totalorder %v7736_v15, 0 }
 0x165   : > { %9117 = vst [vmem:[#allocation17_spill] sm:$0xff] %v9116_v22  ;;  %9119 = vst [vmem:[#allocation19_spill] sm:$0xff] %v7771_v31  ;;  %v4173_v36 = vmul.u32 18, %v4172_v16  ;;  %v4206_v63 = vmul.u32 18, %v4205_v52  ;;  %v4227_v41 = vshrl.u32 %v7714_v59, 4  ;;  %v9127_v50 = vmov 0 }
 0x166   : > { %9122 = vst [vmem:[#allocation20_spill] sm:$0xff] %v9121_v32  ;;  %9123 = vst [vmem:[#allocation21_spill] sm:$0xff] %v7782_v33  ;;  %v7792_v43 = vmul.u32.u64.low 3817748708, %v7743_v56  ;;  %v7793_v44 = vmul.u32.u64.high 3817748708, %v7743_v56, %v7792_v43  ;;  %v7804_v54 = vadd.s32 18, %v7736_v15  ;;  %v4195_v5 = vmul.u32 18, %v4194_v21 }
 0x167   : > { %vm7786_vm4 = vmand %vm4474_vm1, %vm4438_vm15  ;;  %v7807_v53 = vadd.s32 144, %v7484_v13  ;;  %v9131_v59 = vmov 0  ;;  %vm4443_vm15 = vcmp.ne.s32.totalorder %v7771_v31, 0  ;;  %vm4479_vm1 = vcmp.lt.s32.totalorder %v7771_v31, 0 }
 0x168   : > { %v9125_v39 = vsel %vm7786_vm4, 4294967295, %v9124_v39  ;;  %vm7799_vm12 = vmand %vm4477_vm9, %vm4441_vm6  ;;  %9130 = vst [vmem:[#allocation24_spill] sm:$0xff] %v7804_v54  ;;  %v4216_v2 = vshrl.u32 %v7729_v11, 4  ;;  %v7817_v45 = vadd.s32 168, %v7484_v13  ;;  %v7832_v11 = vsub.s32 %v7615_v17, %v4173_v36 }
 0x169   : > { %9126 = vst [vmem:[#allocation22_spill] sm:$0xff] %v9125_v39  ;;  %v9128_v50 = vsel %vm7799_vm12, 4294967295, %v9127_v50  ;;  %vm7809_vm13 = vmand %vm4476_vm11, %vm4440_vm10  ;;  %v7839_v16 = vadd.s32 18, %v7771_v31  ;;  %v7842_v46 = vsub.s32 %v7621_v19, %v4206_v63  ;;  %v4228_v52 = vmul.u32 18, %v4227_v41 }
 0x16a   : > { %9129 = vst [vmem:[#allocation23_spill] sm:$0xff] %v9128_v50  ;;  %v9132_v59 = vsel %vm7809_vm13, 4294967295, %v9131_v59  ;;  %9134 = vst [vmem:[#allocation26_spill] sm:$0xff] %v7832_v11  ;;  %v9136_v17 = vmov 0  ;;  %v7853_v36 = vsub.s32 %v7634_v23, %v4195_v5  ;;  %v4217_v0 = vmul.u32 18, %v4216_v2 }
 0x16b   : > { %9133 = vst [vmem:[#allocation25_spill] sm:$0xff] %v9132_v59  ;;  %9135 = vst [vmem:[#allocation27_spill] sm:$0xff] %v7839_v16  ;;  %v7856_v43 = vmul.u32.u64.low 3817748708, %v7807_v53  ;;  %v7857_v3 = vmul.u32.u64.high 3817748708, %v7807_v53, %v7856_v43  ;;  %v7860_v19 = vmul.u32.u64.low 3817748708, %v7817_v45  ;;  %v7861_v63 = vmul.u32.u64.high 3817748708, %v7817_v45, %v7860_v19 }
 0x16c   : > { %vm7848_vm6 = vmand %vm4479_vm1, %vm4443_vm15  ;;  %9139 = vst [vmem:[#allocation29_spill] sm:$0xff] %v7853_v36  ;;  %v7864_v41 = vadd.s32 160, %v7484_v13  ;;  %vm4442_vm9 = vcmp.ne.s32.totalorder %v7832_v11, 0  ;;  %v7869_v21 = vadd.s32 18, %v7832_v11  ;;  %v7872_v23 = vadd.s32 184, %v7484_v13 }
 0x16d   : > { %v9137_v17 = vsel %vm7848_vm6, 4294967295, %v9136_v17  ;;  %vm4445_vm11 = vcmp.ne.s32.totalorder %v7842_v46, 0  ;;  %v7882_v43 = vsub.s32 %v7679_v35, %v4228_v52  ;;  %v4249_v19 = vshrl.u32 %v7793_v44, 4 }
 0x16e   : > { %9138 = vst [vmem:[#allocation28_spill] sm:$0xff] %v9137_v17  ;;  %v7889_v47 = vadd.s32 18, %v7842_v46  ;;  %v7893_v10 = vadd.s32 176, %v7484_v13  ;;  %v7897_v2 = vadd.s32 18, %v7853_v36  ;;  %v7900_v35 = vsub.s32 %v7694_v58, %v4217_v0 }
 0x16f   : > { %9140 = vst [vmem:[#allocation30_spill] sm:$0xff] %v7882_v43  ;;  %v7903_v44 = vadd.s32 200, %v7484_v13  ;;  %v7906_v52 = vmul.u32.u64.low 3817748708, %v7864_v41  ;;  %v7907_v8 = vmul.u32.u64.high 3817748708, %v7864_v41, %v7906_v52  ;;  %v4250_v15 = vmul.u32 18, %v4249_v19 }
 0x170   : > { %9141 = vst [vmem:[#allocation31_spill] sm:$0xff] %v7897_v2  ;;  %9142 = vst [vmem:[#allocation32_spill] sm:$0xff] %v7900_v35  ;;  %v7910_v31 = vmul.u32.u64.low 3817748708, %v7872_v23  ;;  %v7911_v16 = vmul.u32.u64.high 3817748708, %v7872_v23, %v7910_v31  ;;  %v7918_v58 = vadd.s32 192, %v7484_v13  ;;  %v4238_v54 = vshrl.u32 %v7857_v3, 4 }
 0x171   : > { %v7924_v52 = vmul.u32.u64.low 3817748708, %v7893_v10  ;;  %v7925_v59 = vmul.u32.u64.high 3817748708, %v7893_v10, %v7924_v52  ;;  %v7928_v31 = vadd.s32 216, %v7484_v13  ;;  %v7931_v6 = vadd.s32 18, %v7882_v43 }
 0x172   : > { %v4271_v19 = vshrl.u32 %v7861_v63, 4  ;;  %v7936_v33 = vadd.s32 208, %v7484_v13  ;;  %v7940_v3 = vmul.u32.u64.low 3817748708, %v7903_v44  ;;  %v7941_v50 = vmul.u32.u64.high 3817748708, %v7903_v44, %v7940_v3 }
 0x173   : > { %9145 = vst [vmem:[#allocation35_spill] sm:$0xff] %v7931_v6  ;;  %v7944_v52 = vadd.s32 232, %v7484_v13  ;;  %vm9147_vm1 = vcmp.lt.s32.totalorder %v7832_v11, 0  ;;  %v9148_v63 = vmov 0  ;;  %v7957_v28 = vsub.s32 %v7743_v56, %v4250_v15 }
 0x174   : > { %vm7952_vm15 = vmand %vm9147_vm1, %vm4442_vm9  ;;  %v7960_v39 = vmul.u32.u64.low 3817748708, %v7918_v58  ;;  %v7961_v49 = vmul.u32.u64.high 3817748708, %v7918_v58, %v7960_v39  ;;  %v7964_v3 = vadd.s32 224, %v7484_v13  ;;  %vm9152_vm10 = vcmp.lt.s32.totalorder %v7842_v46, 0 }
 0x175   : > { %v9149_v63 = vsel %vm7952_vm15, 4294967295, %v9148_v63  ;;  %9150 = vst [vmem:[#allocation37_spill] sm:$0xff] %v7957_v28  ;;  %vm7972_vm9 = vmand %vm9152_vm10, %vm4445_vm11  ;;  %v9153_v32 = vmov 0  ;;  %v7977_v15 = vadd.s32 18, %v7900_v35  ;;  %v4239_v56 = vmul.u32 18, %v4238_v54 }
 0x176   : > { %v9154_v32 = vsel %vm7972_vm9, 4294967295, %v9153_v32  ;;  %vm9156_vm1 = vcmp.ne.s32.totalorder %v7853_v36, 0  ;;  %vm9157_vm6 = vcmp.lt.s32.totalorder %v7853_v36, 0  ;;  %v4272_v42 = vmul.u32 18, %v4271_v19 }
 0x177   : > { %9155 = vst [vmem:[#allocation39_spill] sm:$0xff] %v7977_v15  ;;  %vm7987_vm13 = vmand %vm9157_vm6, %vm9156_vm1  ;;  %v7992_v14 = vmul.u32.u64.low 3817748708, %v7936_v33  ;;  %v7993_v22 = vmul.u32.u64.high 3817748708, %v7936_v33, %v7992_v14  ;;  %v7996_v30 = vadd.s32 248, %v7484_v13  ;;  %vm9161_vm10 = vcmp.ne.s32.totalorder %v7882_v43, 0 }
 0x178   : > { %vm9162_vm11 = vcmp.lt.s32.totalorder %v7882_v43, 0  ;;  %v4260_v54 = vshrl.u32 %v7907_v8, 4  ;;  %v4293_v61 = vshrl.u32 %v7911_v16, 4  ;;  %vm9167_vm6 = vcmp.ne.s32.totalorder %v7900_v35, 0 }
 0x179   : > { %vm8002_vm12 = vmand %vm9162_vm11, %vm9161_vm10  ;;  %v8009_v19 = vmul.u32.u64.low 3817748708, %v7944_v52  ;;  %v8010_v18 = vmul.u32.u64.high 3817748708, %v7944_v52, %v8009_v19  ;;  %vm9168_vm1 = vcmp.lt.s32.totalorder %v7900_v35, 0  ;;  %vm4449_vm10 = vcmp.ne.s32.totalorder %v7957_v28, 0 }
 0x17a   : > { %vm8018_vm4 = vmand %vm9168_vm1, %vm9167_vm6  ;;  %vm4485_vm11 = vcmp.lt.s32.totalorder %v7957_v28, 0  ;;  %v8025_v8 = vmul.u32.u64.low 3817748708, %v7964_v3  ;;  %v8026_v16 = vmul.u32.u64.high 3817748708, %v7964_v3, %v8025_v8  ;;  %v8039_v9 = vsub.s32 %v7807_v53, %v4239_v56 }
 0x17b   : > { %v4282_v27 = vshrl.u32 %v7925_v59, 4  ;;  %v8050_v19 = vmul.u32.u64.low 3817748708, %v7996_v30  ;;  %v8051_v11 = vmul.u32.u64.high 3817748708, %v7996_v30, %v8050_v19  ;;  %vm8065_vm6 = vmand %vm4485_vm11, %vm4449_vm10  ;;  %v9175_v56 = vmov 0 }
 0x17c   : > { %9173 = vst [vmem:[#allocation45_spill] sm:$0xff] %v8039_v9  ;;  %v9176_v56 = vsel %vm8065_vm6, 4294967295, %v9175_v56  ;;  %v4315_v19 = vshrl.u32 %v7941_v50, 4  ;;  %v8071_v8 = vadd.s32 240, %v7484_v13  ;;  %v8076_v53 = vsub.s32 %v7817_v45, %v4272_v42 }
 0x17d   : > { %9177 = vst [vmem:[#allocation47_spill] sm:$0xff] %v9176_v56  ;;  %v4294_v59 = vmul.u32 18, %v4293_v61  ;;  %v4304_v35 = vshrl.u32 %v7961_v49, 4  ;;  %vm4448_vm1 = vcmp.ne.s32.totalorder %v8039_v9, 0  ;;  %vm4484_vm10 = vcmp.lt.s32.totalorder %v8039_v9, 0 }
 0x17e   : > { %v4283_v43 = vmul.u32 18, %v4282_v27  ;;  %v8089_v42 = vadd.s32 18, %v8039_v9  ;;  %v4326_v61 = vshrl.u32 %v7993_v22, 4  ;;  %v8093_v49 = vadd.s32 264, %v7484_v13  ;;  %vm8102_vm11 = vmand %vm4484_vm10, %vm4448_vm1 }
 0x17f   : > { %v4316_v45 = vmul.u32 18, %v4315_v19  ;;  %v9179_v56 = vmov 0  ;;  %v4305_v6 = vmul.u32 18, %v4304_v35  ;;  %v4348_v19 = vshrl.u32 %v8026_v16, 4 }
 0x180   : > { %9178 = vst [vmem:[#allocation48_spill] sm:$0xff] %v8089_v42  ;;  %v9180_v56 = vsel %vm8102_vm11, 4294967295, %v9179_v56  ;;  %v4327_v36 = vmul.u32 18, %v4326_v61  ;;  %v4381_v2 = vshrl.u32 %v8051_v11, 4  ;;  %v8130_v16 = vadd.s32 18, %v8076_v53 }
 0x181   : > { %9181 = vst [vmem:[#allocation49_spill] sm:$0xff] %v9180_v56  ;;  %v8140_v11 = vsub.s32 %v7918_v58, %v4305_v6  ;;  %vm9185_vm1 = vcmp.ne.s32.totalorder %v8076_v53, 0  ;;  %vm9186_vm11 = vcmp.lt.s32.totalorder %v8076_v53, 0  ;;  %v9207_v9 = vsel %vm7558_vm7, %v7552_v62, %v7519_v38 }
 0x182   : > { %v8163_v58 = vsub.s32 %v7936_v33, %v4327_v36  ;;  %v9208_v42 = vmov 0  ;;  %vm8254_vm7 = vcmp.lt.s32.totalorder %v9215_v7, 16 }
 0x184   : > { %9189 = vst [vmem:[#allocation53_spill] sm:$0xff] %v8163_v58 }
 0x1c6   : > { %v7874_v5 = vpop.f32.mrb[0].mxu1 }
 0x1c7   : > { %v7885_v37 = vpop.f32.mrb[1].mxu1 }
 0x1ca   : > { %v7913_v17 = vpop.f32.mrb[2].mxu1 }
 0x1cb   : > { %9143 = vst [vmem:[#allocation33_spill] sm:$0xff] %v7913_v17  ;;  %v7920_v0 = vpop.f32.mrb[3].mxu1 }
 0x1cc   : > { %9144 = vst [vmem:[#allocation34_spill] sm:$0xff] %v7920_v0  ;;  %v9169_v0 = vmov 0 }
 0x1cd   : > { %v9170_v0 = vsel %vm8018_vm4, 4294967295, %v9169_v0 }
 0x1ce   : > { %v7946_v4 = vpop.f32.mrb[4].mxu1  ;;  %9171 = vst [vmem:[#allocation43_spill] sm:$0xff] %v9170_v0  ;;  %v4261_v0 = vmul.u32 18, %v4260_v54  ;;  %v4359_v54 = vshrl.u32 %v8010_v18, 4  ;;  %v8115_v18 = vsub.s32 %v7872_v23, %v4294_v59  ;;  %v8133_v23 = vsub.s32 %v7903_v44, %v4316_v45 }
 0x1cf   : > { %9146 = vst [vmem:[#allocation36_spill] sm:$0xff] %v7946_v4  ;;  %v7966_v60 = vpop.f32.mrb[5].mxu1  ;;  %v7980_v4 = vmul.u32.u64.low 3817748708, %v7928_v31  ;;  %v7981_v39 = vmul.u32.u64.high 3817748708, %v7928_v31, %v7980_v4  ;;  %v4349_v59 = vmul.u32 18, %v4348_v19 }
 0x1d0   : > { %9151 = vst [vmem:[#allocation38_spill] sm:$0xff] %v7966_v60  ;;  %v9158_v60 = vmov 0  ;;  %v9163_v4 = vmov 0  ;;  %v8108_v22 = vsub.s32 %v7864_v41, %v4261_v0  ;;  %vm4489_vm6 = vcmp.lt.s32.totalorder %v8115_v18, 0 }
 0x1d1   : > { %v9159_v60 = vsel %vm7987_vm13, 4294967295, %v9158_v60  ;;  %v9164_v4 = vsel %vm8002_vm12, 4294967295, %v9163_v4  ;;  %v4337_v50 = vshrl.u32 %v7981_v39, 4  ;;  %vm8156_vm12 = vmand %vm9186_vm11, %vm9185_vm1  ;;  %v4382_v45 = vmul.u32 18, %v4381_v2 }
 0x1d2   : > { %9160 = vst [vmem:[#allocation40_spill] sm:$0xff] %v9159_v60  ;;  %9165 = vst [vmem:[#allocation41_spill] sm:$0xff] %v9164_v4  ;;  %v8012_v14 = vpop.f32.mrb[6].mxu1  ;;  %v8097_v27 = vmul.u32.u64.low 3817748708, %v8071_v8  ;;  %v8098_v4 = vmul.u32.u64.high 3817748708, %v8071_v8, %v8097_v27  ;;  %vm4486_vm10 = vcmp.lt.s32.totalorder %v8108_v22, 0  ;;  %v8191_v2 = vsub.s32 %v7964_v3, %v4349_v59 }
 0x1d3   : > { %9166 = vst [vmem:[#allocation42_spill] sm:$0xff] %v8012_v14  ;;  %v8028_v17 = vpop.f32.mrb[7].mxu1  ;;  %v8118_v27 = vsub.s32 %v7893_v10, %v4283_v43  ;;  %v8122_v41 = vmul.u32.u64.low 3817748708, %v8093_v49  ;;  %v8123_v0 = vmul.u32.u64.high 3817748708, %v8093_v49, %v8122_v41  ;;  %v4360_v10 = vmul.u32 18, %v4359_v54 }
 0x1d4   : > { %9172 = vst [vmem:[#allocation44_spill] sm:$0xff] %v8028_v17  ;;  %v8047_v17 = vadd.s32 18, %v7957_v28  ;;  %v8145_v61 = vadd.s32 18, %v8108_v22  ;;  %vm9190_vm4 = vcmp.ne.s32.totalorder %v8108_v22, 0  ;;  %vm4455_vm5 = vcmp.ne.s32.totalorder %v8133_v23, 0  ;;  %9198 = vst [vmem:[#allocation56_spill] sm:$0xff] %v8191_v2 }
 0x1d5   : > { %vm4452_vm13 = vcmp.ne.s32.totalorder %v8118_v27, 0  ;;  %vm8167_vm15 = vmand %vm4486_vm10, %vm9190_vm4  ;;  %v4370_v54 = vshrl.u32 %v8098_v4, 4  ;;  %vm9195_vm1 = vcmp.ne.s32.totalorder %v8115_v18, 0  ;;  %v8186_v36 = vadd.s32 18, %v8115_v18 }
 0x1d6   : > { %9174 = vst [vmem:[#allocation46_spill] sm:$0xff] %v8047_v17  ;;  %v8073_v14 = vpop.f32.mrb[8].mxu1  ;;  %v4338_v17 = vmul.u32 18, %v4337_v50  ;;  %vm8181_vm9 = vmand %vm4489_vm6, %vm9195_vm1  ;;  %vm9200_vm11 = vcmp.lt.s32.totalorder %v8118_v27, 0  ;;  %v8204_v41 = vadd.s32 18, %v8118_v27  ;;  %v8209_v3 = vadd.s32 256, %v7484_v13 }
 0x1d7   : > { %v8079_v15 = vpop.f32.mrb[9].mxu1  ;;  %vm8199_vm6 = vmand %vm9200_vm11, %vm4452_vm13  ;;  %vm9203_vm4 = vcmp.lt.s32.totalorder %v8133_v23, 0  ;;  %v8222_v59 = vsub.s32 %v7996_v30, %v4382_v45  ;;  %v4403_v35 = vshrl.u32 %v8123_v0, 4  ;;  %vm8230_vm10 = vcmp.lt.s32.totalorder %v9207_v9, 16 }
 0x1d8   : > { %v8150_v44 = vsub.s32 %v7928_v31, %v4338_v17  ;;  %v8174_v31 = vsub.s32 %v7944_v52, %v4360_v10  ;;  %vm8215_vm2 = vmand %vm9203_vm4, %vm4455_vm5  ;;  %v9209_v42 = vsel %vm8230_vm10, 4294967295, %v9208_v42  ;;  %v8235_v56 = vadd.s32 18, %v8133_v23 }
 0x1d9   : > { %9206 = vst [vmem:[#allocation58_spill] sm:$0xff] %v8222_v59  ;;  %vm9210_vm5 = vcmp.ne.s32.totalorder %v8140_v11, 0  ;;  %vm9211_vm4 = vcmp.lt.s32.totalorder %v8140_v11, 0  ;;  %v9212_v30 = vmov 0  ;;  %v4371_v38 = vmul.u32 18, %v4370_v54 }
 0x1da   : > { %v8100_v39 = vpop.f32.mrb[10].mxu1  ;;  %9193 = vst [vmem:[#allocation54_spill] sm:$0xff] %v8174_v31  ;;  %vm8241_vm11 = vmand %vm9211_vm4, %vm9210_vm5  ;;  %vm4495_vm1 = vcmp.lt.s32.totalorder %v8174_v31, 0  ;;  %v9216_v9 = vmov 0  ;;  %v8259_v0 = vadd.s32 18, %v8140_v11  ;;  %vm9218_vm5 = vcmp.ne.s32.totalorder %v8150_v44, 0 }
 0x1db   : > { %v8111_v28 = vpop.f32.mrb[11].mxu1  ;;  %v9213_v30 = vsel %vm8241_vm11, 4294967295, %v9212_v30  ;;  %v9217_v9 = vsel %vm8254_vm7, 4294967295, %v9216_v9  ;;  %vm9219_vm4 = vcmp.lt.s32.totalorder %v8150_v44, 0  ;;  %v9220_v45 = vmov 0 }
 0x1dc   : > { %9182 = vst [vmem:[#allocation50_spill] sm:$0xff] %v8111_v28  ;;  %vm8265_vm13 = vmand %vm9219_vm4, %vm9218_vm5  ;;  %v8270_v55 = vadd.s32 18, %v8150_v44  ;;  %vm4494_vm14 = vcmp.lt.s32.totalorder %v8191_v2, 0  ;;  %vm9224_vm7 = vcmp.ne.s32.totalorder %v8163_v58, 0  ;;  %vm9225_vm10 = vcmp.lt.s32.totalorder %v8163_v58, 0 }
 0x1dd   : > { %v9221_v45 = vsel %vm8265_vm13, 4294967295, %v9220_v45  ;;  %vm8280_vm11 = vmand %vm9225_vm10, %vm9224_vm7  ;;  %v8285_v54 = vadd.s32 18, %v8163_v58  ;;  %v8288_v7 = vadd.s32 18, %v8174_v31  ;;  %vm9231_vm5 = vcmp.ne.s32.totalorder %v8174_v31, 0  ;;  %v9287_v31 = vld [vmem:[#allocation8_spill] sm:$0xff] }
 0x1de   : > { %v8135_v43 = vpop.f32.mrb[12].mxu1  ;;  %9222 = vst [vmem:[#allocation60_spill] sm:$0xff] %v9221_v45  ;;  %v9227_v48 = vsel %vm8280_vm11, 4294967295, %v9226_v48  ;;  %vm8296_vm4 = vmand %vm4495_vm1, %vm9231_vm5  ;;  %vm4461_vm10 = vcmp.ne.s32.totalorder %v8222_v59, 0  ;;  %vm4497_vm7 = vcmp.lt.s32.totalorder %v8222_v59, 0  ;;  %v4404_v60 = vmul.u32 18, %v4403_v35 }
 0x1df   : > { %9183 = vst [vmem:[#allocation51_spill] sm:$0xff] %v8135_v43  ;;  %v8142_v50 = vpop.f32.mrb[13].mxu1  ;;  %9228 = vst [vmem:[#allocation62_spill] sm:$0xff] %v9227_v48  ;;  %vm9239_vm1 = vcmp.ne.s32.totalorder %v8191_v2, 0  ;;  %v9244_v35 = vsel %vm7638_vm3, %v7643_v25, %v7575_v57  ;;  %v8356_v57 = vadd.s32 18, %v8222_v59  ;;  %v9249_v28 = vmov 0 }
 0x1e0   : > { %9184 = vst [vmem:[#allocation52_spill] sm:$0xff] %v8142_v50  ;;  %9229 = vst [vmem:[#allocation63_spill] sm:$0xff] %v8285_v54  ;;  %v9236_v50 = vsel %vm7627_vm0, %v7605_v12, %v7565_v51  ;;  %v8329_v51 = vsub.s32 %v8071_v8, %v4371_v38  ;;  %v8332_v12 = vadd.s32 280, %v7484_v13  ;;  %vm8339_vm0 = vcmp.lt.s32.totalorder %v9244_v35, 16  ;;  %v8361_v38 = vld [vmem:[%s9005_s2] ss:$0 sm:$0xff] }
 0x1e1   : > { %9230 = vst [vmem:[#allocation64_spill] sm:$0xff] %v8288_v7  ;;  %vm8310_vm8 = vcmp.lt.s32.totalorder %v9236_v50, 16  ;;  %vm8324_vm5 = vmand %vm4494_vm14, %vm9239_vm1  ;;  %v8384_v35 = vadd.s32 272, %v7484_v13  ;;  %v8396_v58 = vsub.s32 %v8093_v49, %v4404_v60  ;;  %v9259_v49 = vld [vmem:[#allocation6_spill] sm:$0xff]  ;;  %vm9267_vm11 = vnez %v9217_v9 }
 0x1e2   : > { %v8177_v19 = vpop.f32.mrb[14].mxu1  ;;  %v9241_v20 = vsel %vm8324_vm5, 4294967295, %v9240_v20  ;;  %9243 = vst [vmem:[#allocation68_spill] sm:$0xff] %v8329_v51  ;;  %9247 = vst [vmem:[#allocation69_spill] sm:$0xff] %v8356_v57  ;;  %vm9264_vm5 = vnez %v9209_v42  ;;  %v9272_v42 = vld [vmem:[#allocation7_spill] sm:$0xff]  ;;  %v9306_v50 = vld [vmem:[#allocation22_spill] sm:$0xff] }
 0x1e3   : > { %9194 = vst [vmem:[#allocation55_spill] sm:$0xff] %v8177_v19  ;;  %v8193_v52 = vpop.f32.mrb[15].mxu1  ;;  %v8301_v19 = vadd.s32 18, %v8191_v2  ;;  %9242 = vst [vmem:[#allocation67_spill] sm:$0xff] %v9241_v20  ;;  %v9269_v2 = vld [vmem:[#allocation15_spill] sm:$0xff]  ;;  %v9286_v20 = vld [vmem:[#allocation13_spill] sm:$0xff] }
 0x1e4   : > { %9199 = vst [vmem:[#allocation57_spill] sm:$0xff] %v8193_v52  ;;  %vm8379_vm14 = vmand %vm4497_vm7, %vm4461_vm10  ;;  %vm9253_vm10 = vnez %v9100_v29  ;;  %v8434_v29 = vmul.u32.u64.low 3817748708, %v8384_v35  ;;  %v8435_v24 = vmul.u32.u64.high 3817748708, %v8384_v35, %v8434_v29  ;;  %vm9270_vm13 = vnez %v9269_v2 }
 0x1e5   : > { %9235 = vst [vmem:[#allocation66_spill] sm:$0xff] %v8301_v19  ;;  %v9250_v28 = vsel %vm8379_vm14, 4294967295, %v9249_v28  ;;  %9252 = vst [vmem:[#allocation71_spill] sm:$0xff] %v8396_v58  ;;  %v9254_v13 = vsel %vm9253_vm10, %v7646_v26, %v7584_v1  ;;  %v8420_v1 = vadd.s32 18, %v8329_v51  ;;  %vm9258_vm10 = vnez %v9103_v34  ;;  %v9271_v29 = vld [vmem:[#allocation10_spill] sm:$0xff] }
 0x1e6   : > { %v8247_v62 = vpop.f32.mrb[16].mxu1  ;;  %9251 = vst [vmem:[#allocation70_spill] sm:$0xff] %v9250_v28  ;;  %vm8404_vm7 = vcmp.lt.s32.totalorder %v9254_v13, 16  ;;  %v9273_v19 = vsel %vm9270_vm13, %v9271_v29, %v9272_v42  ;;  %vm9276_vm14 = vcmp.ne.s32.totalorder %v8329_v51, 0  ;;  %v9284_v42 = vld [vmem:[#allocation17_spill] sm:$0xff] }
 0x1e7   : > { %9214 = vst [vmem:[#allocation59_spill] sm:$0xff] %v8247_v62  ;;  %v8274_v40 = vpop.f32.mrb[17].mxu1  ;;  %v8291_v62 = vmul.u32.u64.low 3817748708, %v8209_v3  ;;  %v8292_v52 = vmul.u32.u64.high 3817748708, %v8209_v3, %v8291_v62  ;;  %9257 = vst [vmem:[#allocation72_spill] sm:$0xff] %v8420_v1  ;;  %vm9285_vm3 = vnez %v9284_v42 }
 0x1e8   : > { %9223 = vst [vmem:[#allocation61_spill] sm:$0xff] %v8274_v40  ;;  %v9232_v40 = vmov 0  ;;  %v9288_v7 = vsel %vm9285_vm3, %v9286_v20, %v9287_v31  ;;  %vm9293_vm3 = vcmp.ne.s32.totalorder %v8396_v58, 0  ;;  %v9295_v31 = vmov 0 }
 0x1e9   : > { %v9233_v40 = vsel %vm8296_vm4, 4294967295, %v9232_v40  ;;  %vm9266_vm4 = vcmask 31744  }
 0x1ea   : > { %9234 = vst [vmem:[#allocation65_spill] sm:$0xff] %v9233_v40  ;;  %v9386_v40 = vld [vmem:[#allocation47_spill] sm:$0xff] }
 0x1eb   : > { %v6054_v25 = vpop.f32.mrb[0].mxu0 }
 0x1ec   : > { %v6108_v43 = vadd.f32 %v6054_v25, %v7874_v5  ;;  %v3739_v45 = vpop.f32.mrb[1].mxu0  ;;  %v8410_v25 = vmul.u32.u64.low 3817748708, %v8332_v12  ;;  %v8411_v8 = vmul.u32.u64.high 3817748708, %v8332_v12, %v8410_v25 }
 0x1ed   : > { %v6109_v54 = vadd.f32 %v3739_v45, %v7885_v37  ;;  %v9260_v45 = vld [vmem:[#allocation5_spill] sm:$0xff]  ;;  %v4392_v25 = vshrl.u32 %v8292_v52, 4 }
 0x1ee   : > { %v3962_v60 = vadd.f32 %v6108_v43, %v8361_v38  ;;  %v9261_v13 = vsel %vm9258_vm10, %v9259_v49, %v9260_v45  ;;  %v9268_v45 = vld [vmem:[#allocation34_spill] sm:$0xff]  ;;  %vm9277_vm10 = vcmp.lt.s32.totalorder %v8329_v51, 0  ;;  %v4414_v43 = vshrl.u32 %v8435_v24, 4 }
 0x1ef   : > { %v3961_v26 = vadd.f32 %v6109_v54, %v8361_v38  ;;  %v6057_v37 = vpop.f32.mrb[2].mxu0  ;;  %vm8428_vm1 = vcmp.lt.s32.totalorder %v9261_v13, 16  ;;  %v9265_v54 = vld [vmem:[#allocation33_spill] sm:$0xff] }
 0x1f0   : > { %v4647_v59 = vsel %vm9264_vm5, %v3962_v60, 0.0  ;;  %v6110_v57 = vadd.f32 %v6057_v37, %v9265_v54  ;;  %v3749_v28 = vpop.f32.mrb[3].mxu0  ;;  %vm8451_vm5 = vcmp.lt.s32.totalorder %v9273_v19, 16 }
 0x1f1   : > { %v4684_v34 = vsel %vm9266_vm4, %v4647_v59, 0.0  ;;  %v4765_v49 = vmul.f32 %v4647_v59, %v3962_v60  ;;  %v4646_v52 = vsel %vm9267_vm11, %v3961_v26, 0.0  ;;  %v6111_v13 = vadd.f32 %v3749_v28, %v9268_v45  ;;  %vm8459_vm4 = vmand %vm9277_vm10, %vm9276_vm14 }
 0x1f2   : > { %v9278_v59 = vmov 0  ;;  %vm9281_vm11 = vcmask 31744   ;;  %v4764_v28 = vmul.f32 %v4646_v52, %v3961_v26  ;;  %v3964_v2 = vadd.f32 %v6110_v57, %v8361_v38 }
 0x1f3   : > { %v9279_v59 = vsel %vm8459_vm4, 4294967295, %v9278_v59  ;;  %v4683_v9 = vsel %vm9281_vm11, %v4646_v52, 0.0  ;;  %v8466_v60 = vadd.s32 18, %v8396_v58  ;;  %vm9283_vm13 = vmmov %vm9281_vm11  ;;  %v3963_v45 = vadd.f32 %v6111_v13, %v8361_v38  ;;  %v6060_v29 = vpop.f32.mrb[4].mxu0 }
 0x1f4   : > { %9280 = vst [vmem:[#allocation6_spill] sm:$0xff] %v9279_v59  ;;  %v4801_v19 = vsel %vm9283_vm13, %v4765_v49, 0.0  ;;  %v4685_v54 = vadd.f32 %v4684_v34, %v4683_v9  ;;  %vm8475_vm14 = vcmp.lt.s32.totalorder %v9288_v7, 16  ;;  %v4393_v26 = vmul.u32 18, %v4392_v25  ;;  %vm9291_vm10 = vmmov %vm9281_vm11  ;;  %v9292_v49 = vld [vmem:[#allocation36_spill] sm:$0xff]  ;;  %v3759_v9 = vpop.f32.mrb[5].mxu0 }
 0x1f5   : > { %9282 = vst [vmem:[#allocation5_spill] sm:$0xff] %v8466_v60  ;;  %v4800_v57 = vsel %vm9291_vm10, %v4764_v28, 0.0  ;;  %v4649_v52 = vsel %vm8310_vm8, %v3964_v2, 0.0  ;;  %v6112_v34 = vadd.f32 %v6060_v29, %v9292_v49  ;;  %vm9294_vm11 = vcmp.lt.s32.totalorder %v8396_v58, 0  ;;  %v9297_v25 = vld [vmem:[#allocation20_spill] sm:$0xff]  ;;  %v9300_v29 = vld [vmem:[#allocation9_spill] sm:$0xff] }
 0x1f6   : > { %vm8491_vm13 = vmand %vm9294_vm11, %vm9293_vm3  ;;  %v4802_v7 = vadd.f32 %v4801_v19, %v4800_v57  ;;  %v4767_v20 = vmul.f32 %v4649_v52, %v3964_v2  ;;  %v4648_v62 = vsel %vm8339_vm0, %v3963_v45, 0.0  ;;  %vm9298_vm8 = vnez %v9297_v25  ;;  %v9299_v28 = vld [vmem:[#allocation16_spill] sm:$0xff]  ;;  %v9305_v2 = vld [vmem:[#allocation38_spill] sm:$0xff] }
 0x1f7   : > { %v9296_v31 = vsel %vm8491_vm13, 4294967295, %v9295_v31  ;;  %v9301_v42 = vsel %vm9298_vm8, %v9299_v28, %v9300_v29  ;;  %v4425_v13 = vshrl.u32 %v8411_v8, 4  ;;  %vm9304_vm3 = vcmask 31744   ;;  %v9308_v59 = vld [vmem:[#allocation18_spill] sm:$0xff]  ;;  %v9309_v25 = vld [vmem:[#allocation11_spill] sm:$0xff]  ;;  %v6063_v8 = vpop.f32.mrb[6].mxu0 }
 0x1f8   : > { %vm8502_vm10 = vcmp.lt.s32.totalorder %v9301_v42, 16  ;;  %v4686_v51 = vsel %vm9304_vm3, %v4648_v62, 0.0  ;;  %v4766_v1 = vmul.f32 %v4648_v62, %v3963_v45  ;;  %v3966_v19 = vadd.f32 %v6112_v34, %v8361_v38  ;;  %vm9313_vm8 = vmmov %vm9304_vm3  ;;  %v9314_v62 = vld [vmem:[#allocation42_spill] sm:$0xff]  ;;  %v9317_v58 = vld [vmem:[#allocation23_spill] sm:$0xff] }
 0x1f9   : > { %v6113_v57 = vadd.f32 %v3759_v9, %v9305_v2  ;;  %vm9307_vm0 = vnez %v9306_v50  ;;  %v4688_v29 = vsel %vm9313_vm8, %v4649_v52, 0.0  ;;  %v4687_v42 = vadd.f32 %v4686_v51, %v4685_v54  ;;  %v3769_v52 = vpop.f32.mrb[7].mxu0  ;;  %v9320_v60 = vld [vmem:[#allocation12_spill] sm:$0xff] }
 0x1fa   : > { %v9310_v48 = vsel %vm9307_vm0, %v9308_v59, %v9309_v25  ;;  %v8525_v34 = vsub.s32 %v8209_v3, %v4393_v26  ;;  %v4803_v9 = vsel %vm9304_vm3, %v4766_v1, 0.0  ;;  %v6114_v2 = vadd.f32 %v6063_v8, %v9314_v62  ;;  %vm9315_vm0 = vmmov %vm9304_vm3  ;;  %v9316_v26 = vld [vmem:[#allocation44_spill] sm:$0xff] }
 0x1fb   : > { %vm8515_vm11 = vcmp.lt.s32.totalorder %v9310_v48, 16  ;;  %v4651_v48 = vsel %vm8404_vm7, %v3966_v19, 0.0  ;;  %v3965_v59 = vadd.f32 %v6113_v57, %v8361_v38  ;;  %v4804_v51 = vadd.f32 %v4803_v9, %v4802_v7  ;;  %v9319_v57 = vld [vmem:[#allocation21_spill] sm:$0xff]  ;;  %vm9324_vm3 = vmmov %vm9315_vm0 }
 0x1fc   : > { %v4769_v54 = vmul.f32 %v4651_v48, %v3966_v19  ;;  %v4689_v50 = vadd.f32 %v4688_v29, %v4687_v42  ;;  %v8532_v25 = vmul.u32 18, %v4425_v13  ;;  %v4805_v45 = vsel %vm9315_vm0, %v4767_v20, 0.0  ;;  %v6066_v29 = vpop.f32.mrb[8].mxu0  ;;  %vm9333_vm13 = vmmov %vm9324_vm3 }
 0x1fd   : > { %v4650_v3 = vsel %vm8428_vm1, %v3965_v59, 0.0  ;;  %v3968_v1 = vadd.f32 %v6114_v2, %v8361_v38  ;;  %v6115_v5 = vadd.f32 %v3769_v52, %v9316_v26  ;;  %vm9318_vm7 = vnez %v9317_v58  ;;  %v9325_v2 = vld [vmem:[#allocation25_spill] sm:$0xff]  ;;  %v9327_v52 = vld [vmem:[#allocation24_spill] sm:$0xff]  ;;  %v9328_v26 = vld [vmem:[#allocation14_spill] sm:$0xff] }
 0x1fe   : > { %v9321_v8 = vsel %vm9318_vm7, %v9319_v57, %v9320_v60  ;;  %v4690_v13 = vsel %vm9324_vm3, %v4650_v3, 0.0  ;;  %v4768_v19 = vmul.f32 %v4650_v3, %v3965_v59  ;;  %v4806_v20 = vadd.f32 %v4805_v45, %v4804_v51  ;;  %v3779_v60 = vpop.f32.mrb[9].mxu0  ;;  %vm9332_vm7 = vmmov %vm9324_vm3  ;;  %v9375_v59 = vld [vmem:[#allocation55_spill] sm:$0xff] }
 0x1ff   : > { %vm8544_vm8 = vcmp.lt.s32.totalorder %v9321_v8, 16  ;;  %v4691_v42 = vadd.f32 %v4690_v13, %v4689_v50  ;;  %v4653_v9 = vsel %vm8451_vm5, %v3968_v1, 0.0  ;;  %v3967_v58 = vadd.f32 %v6115_v5, %v8361_v38  ;;  %v9334_v13 = vld [vmem:[#allocation28_spill] sm:$0xff]  ;;  %vm9349_vm4 = vmmov %vm9324_vm3 }
 0x200   : > { %v6116_v62 = vadd.f32 %v6066_v29, %v8073_v14  ;;  %vm9326_vm1 = vnez %v9325_v2  ;;  %v4692_v45 = vsel %vm9332_vm7, %v4651_v48, 0.0  ;;  %v4809_v51 = vsel %vm9324_vm3, %v4769_v54, 0.0  ;;  %v9336_v29 = vld [vmem:[#allocation27_spill] sm:$0xff] }
 0x201   : > { %v9329_v57 = vsel %vm9326_vm1, %v9327_v52, %v9328_v26  ;;  %v4807_v37 = vsel %vm9333_vm13, %v4768_v19, 0.0  ;;  %v6117_v50 = vadd.f32 %v3779_v60, %v8079_v15  ;;  %v4652_v14 = vsel %vm8475_vm14, %v3967_v58, 0.0  ;;  %v9337_v2 = vld [vmem:[#allocation19_spill] sm:$0xff]  ;;  %v9342_v15 = vld [vmem:[#allocation26_spill] sm:$0xff]  ;;  %vm9346_vm14 = vmmov %vm9324_vm3  ;;  %v6069_v60 = vpop.f32.mrb[10].mxu0 }
 0x202   : > { %vm8559_vm0 = vcmp.lt.s32.totalorder %v9329_v57, 16  ;;  %v4808_v3 = vadd.f32 %v4807_v37, %v4806_v20  ;;  %v4693_v5 = vadd.f32 %v4692_v45, %v4691_v42  ;;  %v3970_v8 = vadd.f32 %v6116_v62, %v8361_v38  ;;  %v3789_v37 = vpop.f32.mrb[11].mxu0 }
 0x203   : > { %vm9335_vm5 = vnez %v9334_v13  ;;  %vm9341_vm13 = vnez %v9149_v63  ;;  %v4771_v19 = vmul.f32 %v4653_v9, %v3968_v1  ;;  %v4694_v20 = vsel %vm9346_vm14, %v4652_v14, 0.0  ;;  %v9355_v13 = vld [vmem:[#allocation50_spill] sm:$0xff] }
 0x204   : > { %v9338_v52 = vsel %vm9335_vm5, %v9336_v29, %v9337_v2  ;;  %v9343_v54 = vsel %vm9341_vm13, %v7869_v21, %v9342_v15  ;;  %v4770_v42 = vmul.f32 %v4652_v14, %v3967_v58  ;;  %v3969_v62 = vadd.f32 %v6117_v50, %v8361_v38  ;;  %vm9347_vm5 = vmmov %vm9324_vm3  ;;  %v6072_v2 = vpop.f32.mrb[12].mxu0 }
 0x205   : > { %vm8575_vm1 = vcmp.lt.s32.totalorder %v9338_v52, 16  ;;  %vm8584_vm7 = vcmp.lt.s32.totalorder %v9343_v54, 16  ;;  %v4695_v26 = vadd.f32 %v4694_v20, %v4693_v5  ;;  %v4810_v57 = vadd.f32 %v4809_v51, %v4808_v3  ;;  %vm9348_vm13 = vmmov %vm9324_vm3 }
 0x206   : > { %v4655_v45 = vsel %vm8502_vm10, %v3970_v8, 0.0  ;;  %v6118_v63 = vadd.f32 %v6069_v60, %v8100_v39  ;;  %v4696_v21 = vsel %vm9347_vm5, %v4653_v9, 0.0  ;;  %v4811_v1 = vsel %vm9348_vm13, %v4770_v42, 0.0  ;;  %vm9354_vm5 = vmmov %vm9349_vm4  ;;  %v3799_v42 = vpop.f32.mrb[13].mxu0  ;;  %v9359_v60 = vld [vmem:[#allocation40_spill] sm:$0xff] }
 0x207   : > { %v4654_v58 = vsel %vm8515_vm11, %v3969_v62, 0.0  ;;  %vm4498_vm14 = vcmp.lt.s32.totalorder %v8525_v34, 0  ;;  %v4812_v50 = vadd.f32 %v4811_v1, %v4810_v57  ;;  %v4697_v14 = vadd.f32 %v4696_v21, %v4695_v26  ;;  %vm9357_vm11 = vmmov %vm9349_vm4  ;;  %v9361_v26 = vld [vmem:[#allocation31_spill] sm:$0xff]  ;;  %v9362_v57 = vld [vmem:[#allocation29_spill] sm:$0xff] }
 0x208   : > { %v4698_v51 = vsel %vm9349_vm4, %v4654_v58, 0.0  ;;  %v4772_v49 = vmul.f32 %v4654_v58, %v3969_v62  ;;  %vm9350_vm10 = vnez %v9154_v32  ;;  %v4813_v9 = vsel %vm9354_vm5, %v4771_v19, 0.0  ;;  %v9356_v32 = vld [vmem:[#allocation51_spill] sm:$0xff]  ;;  %v9366_v21 = vld [vmem:[#allocation41_spill] sm:$0xff] }
 0x209   : > { %v9351_v39 = vsel %vm9350_vm10, %v7889_v47, %v7842_v46  ;;  %v4773_v28 = vmul.f32 %v4655_v45, %v3970_v8  ;;  %v3972_v5 = vadd.f32 %v6118_v63, %v8361_v38  ;;  %v6119_v29 = vadd.f32 %v3789_v37, %v9355_v13  ;;  %v9358_v8 = vld [vmem:[#allocation52_spill] sm:$0xff]  ;;  %v9368_v1 = vld [vmem:[#allocation35_spill] sm:$0xff] }
 0x20a   : > { %vm8605_vm3 = vcmp.lt.s32.totalorder %v9351_v39, 16  ;;  %v4699_v52 = vadd.f32 %v4698_v51, %v4697_v14  ;;  %v4814_v15 = vadd.f32 %v4813_v9, %v4812_v50  ;;  %v4815_v54 = vsel %vm9349_vm4, %v4772_v49, 0.0 }
 0x20b   : > { %v6120_v20 = vadd.f32 %v6072_v2, %v9356_v32  ;;  %v4700_v47 = vsel %vm9357_vm11, %v4655_v45, 0.0  ;;  %v4657_v46 = vsel %vm8544_vm8, %v3972_v5, 0.0  ;;  %v3971_v19 = vadd.f32 %v6119_v29, %v8361_v38  ;;  %v9369_v45 = vld [vmem:[#allocation30_spill] sm:$0xff]  ;;  %vm9373_vm8 = vmmov %vm9357_vm11  ;;  %v6075_v2 = vpop.f32.mrb[14].mxu0 }
 0x20c   : > { %v6121_v62 = vadd.f32 %v3799_v42, %v9358_v8  ;;  %vm9360_vm13 = vnez %v9359_v60  ;;  %vm9367_vm5 = vnez %v9366_v21  ;;  %v4816_v50 = vadd.f32 %v4815_v54, %v4814_v15  ;;  %vm9374_vm11 = vmmov %vm9373_vm8  ;;  %v3809_v42 = vpop.f32.mrb[15].mxu0  ;;  %v9376_v8 = vld [vmem:[#allocation43_spill] sm:$0xff]  ;;  %v9389_v21 = vld [vmem:[#allocation37_spill] sm:$0xff] }
 0x20d   : > { %v9363_v63 = vsel %vm9360_vm13, %v9361_v26, %v9362_v57  ;;  %v9370_v58 = vsel %vm9367_vm5, %v9368_v1, %v9369_v45  ;;  %v4701_v14 = vadd.f32 %v4700_v47, %v4699_v52  ;;  %v8638_v51 = vadd.s32 18, %v8525_v34  ;;  %vm9383_vm5 = vmmov %vm9373_vm8 }
 0x20e   : > { %vm8624_vm10 = vcmp.lt.s32.totalorder %v9363_v63, 16  ;;  %vm8633_vm4 = vcmp.lt.s32.totalorder %v9370_v58, 16  ;;  %v8642_v49 = vsub.s32 %v8332_v12, %v8532_v25  ;;  %v4817_v39 = vsel %vm9373_vm8, %v4773_v28, 0.0  ;;  %vm9384_vm8 = vmmov %vm9383_vm5  ;;  %v9388_v63 = vld [vmem:[#allocation46_spill] sm:$0xff] }
 0x20f   : > { %v4656_v9 = vsel %vm8559_vm0, %v3971_v19, 0.0  ;;  %v3974_v13 = vadd.f32 %v6120_v20, %v8361_v38  ;;  %v3973_v29 = vadd.f32 %v6121_v62, %v8361_v38  ;;  %v4775_v32 = vmul.f32 %v4657_v46, %v3972_v5  ;;  %v9378_v20 = vld [vmem:[#allocation39_spill] sm:$0xff]  ;;  %v9379_v62 = vld [vmem:[#allocation32_spill] sm:$0xff] }
 0x210   : > { %v4702_v52 = vsel %vm9374_vm11, %v4656_v9, 0.0  ;;  %v4774_v15 = vmul.f32 %v4656_v9, %v3971_v19  ;;  %v4818_v54 = vadd.f32 %v4817_v39, %v4816_v50  ;;  %v6122_v28 = vadd.f32 %v6075_v2, %v9375_v59  ;;  %v9397_v2 = vld [vmem:[#allocation57_spill] sm:$0xff] }
 0x211   : > { %v4703_v47 = vadd.f32 %v4702_v52, %v4701_v14  ;;  %v4659_v12 = vsel %vm8575_vm1, %v3974_v13, 0.0  ;;  %v4658_v25 = vsel %vm8584_vm7, %v3973_v29, 0.0  ;;  %vm9377_vm0 = vnez %v9376_v8  ;;  %vm9385_vm1 = vmmov %vm9383_vm5 }
 0x212   : > { %v9380_v60 = vsel %vm9377_vm0, %v9378_v20, %v9379_v62  ;;  %v4704_v19 = vsel %vm9383_vm5, %v4657_v46, 0.0  ;;  %v4819_v26 = vsel %vm9384_vm8, %v4774_v15, 0.0  ;;  %v4777_v48 = vmul.f32 %v4659_v12, %v3974_v13  ;;  %v6078_v46 = vpop.f32.mrb[16].mxu0  ;;  %vm9396_vm8 = vmmov %vm9385_vm1  ;;  %v9398_v15 = vld [vmem:[#allocation59_spill] sm:$0xff] }
 0x213   : > { %vm8660_vm13 = vcmp.lt.s32.totalorder %v9380_v60, 16  ;;  %v4706_v57 = vsel %vm9385_vm1, %v4658_v25, 0.0  ;;  %vm9387_vm7 = vnez %v9386_v40  ;;  %v4820_v58 = vadd.f32 %v4819_v26, %v4818_v54  ;;  %v3819_v54 = vpop.f32.mrb[17].mxu0 }
 0x214   : > { %v9390_v1 = vsel %vm9387_vm7, %v9388_v63, %v9389_v21  ;;  %v4705_v50 = vadd.f32 %v4704_v19, %v4703_v47  ;;  %v4776_v14 = vmul.f32 %v4658_v25, %v3973_v29  ;;  %v3976_v39 = vadd.f32 %v6122_v28, %v8361_v38  ;;  %v9399_v47 = vld [vmem:[#allocation49_spill] sm:$0xff]  ;;  %v9401_v29 = vld [vmem:[#allocation48_spill] sm:$0xff]  ;;  %v5857_v63 = vpop.f32.mrb[18].mxu1  ;;  %v6081_v3 = vpop.f32.mrb[18].mxu0 }
 0x215   : > { %vm8672_vm11 = vcmp.lt.s32.totalorder %v9390_v1, 16  ;;  %vm9393_vm0 = vcmp.ne.s32.totalorder %v8525_v34, 0  ;;  %v4821_v13 = vsel %vm9396_vm8, %v4775_v32, 0.0  ;;  %v6123_v52 = vadd.f32 %v3809_v42, %v9397_v2  ;;  %v9402_v25 = vld [vmem:[#allocation45_spill] sm:$0xff]  ;;  %v3829_v2 = vpop.f32.mrb[19].mxu0 }
 0x216   : > { %vm8681_vm5 = vmand %vm4498_vm14, %vm9393_vm0  ;;  %v6124_v59 = vadd.f32 %v6078_v46, %v9398_v15  ;;  %vm9400_vm1 = vnez %v9399_v47  ;;  %v4415_v20 = vmul.u32 18, %v4414_v43  ;;  %v4707_v62 = vadd.f32 %v4706_v57, %v4705_v50  ;;  %v9409_v1 = vld [vmem:[#allocation61_spill] sm:$0xff]  ;;  %v2113_v50 = vpop.f32.mrb[19].mxu1 }
 0x217   : > { %v9403_v28 = vsel %vm9400_vm1, %v9401_v29, %v9402_v25  ;;  %v4822_v60 = vadd.f32 %v4821_v13, %v4820_v58  ;;  %vm9406_vm14 = vmmov %vm9396_vm8  ;;  %v4661_v42 = vsel %vm8605_vm3, %v3976_v39, 0.0  ;;  %v3975_v26 = vadd.f32 %v6123_v52, %v8361_v38 }
 0x218   : > { %vm8693_vm7 = vcmp.lt.s32.totalorder %v9403_v28, 16  ;;  %v4823_v32 = vsel %vm9406_vm14, %v4776_v14, 0.0  ;;  %vm9407_vm0 = vmmov %vm9396_vm8  ;;  %v3978_v40 = vadd.f32 %v6124_v59, %v8361_v38  ;;  %v4606_v24 = vsel %vm8681_vm5, %v8638_v51, %v8525_v34 }
 0x219   : > { %v4708_v19 = vsel %vm9407_vm0, %v4659_v12, 0.0  ;;  %vm9408_vm8 = vmmov %vm9407_vm0  ;;  %v4824_v57 = vadd.f32 %v4823_v32, %v4822_v60  ;;  %v6125_v58 = vadd.f32 %v3819_v54, %v9409_v1  ;;  %v4779_v14 = vmul.f32 %v4661_v42, %v3976_v39  ;;  %v9442_v39 = vld [vmem:[#allocation60_spill] sm:$0xff] }
 0x21a   : > { %v4825_v43 = vsel %vm9408_vm8, %v4777_v48, 0.0  ;;  %v4709_v21 = vadd.f32 %v4708_v19, %v4707_v62  ;;  %v4660_v12 = vsel %vm8624_vm10, %v3975_v26, 0.0  ;;  %v4663_v46 = vsel %vm8633_vm4, %v3978_v40, 0.0  ;;  %vm9416_vm14 = vmmov %vm9407_vm0  ;;  %v6084_v62 = vpop.f32.mrb[20].mxu0 }
 0x21b   : > { %v6126_v13 = vadd.f32 %v6081_v3, %v5857_v63  ;;  %v9410_v48 = vsel %vm8156_vm12, %v8130_v16, %v8076_v53  ;;  %v9413_v37 = vsel %vm8167_vm15, %v8145_v61, %v8108_v22  ;;  %vm4465_vm4 = vcmp.ne.s32.totalorder %v8642_v49, 0  ;;  %v5860_v61 = vpop.f32.mrb[20].mxu1  ;;  %vm9420_vm15 = vmmov %vm9407_vm0 }
 0x21c   : > { %vm8720_vm3 = vcmp.lt.s32.totalorder %v9410_v48, 16  ;;  %vm8729_vm10 = vcmp.lt.s32.totalorder %v9413_v37, 16  ;;  %vm4501_vm1 = vcmp.lt.s32.totalorder %v8642_v49, 0  ;;  %v4710_v6 = vsel %vm9416_vm14, %v4660_v12, 0.0  ;;  %v2123_v60 = vpop.f32.mrb[21].mxu1  ;;  %vm9421_vm8 = vmmov %vm9407_vm0  ;;  %v9477_v37 = vld [vmem:[#allocation68_spill] sm:$0xff] }
 0x21d   : > { %v4778_v53 = vmul.f32 %v4660_v12, %v3975_v26  ;;  %v4826_v16 = vadd.f32 %v4825_v43, %v4824_v57  ;;  %v8737_v7 = vadd.s32 18, %v8642_v49  ;;  %v4711_v15 = vadd.f32 %v4710_v6, %v4709_v21  ;;  %v3839_v26 = vpop.f32.mrb[21].mxu0  ;;  %vm9425_vm14 = vmmov %vm9407_vm0  ;;  %v5863_v1 = vpop.f32.mrb[22].mxu1 }
 0x21e   : > { %v4781_v17 = vmul.f32 %v4663_v46, %v3978_v40  ;;  %v3977_v59 = vadd.f32 %v6125_v58, %v8361_v38  ;;  %v3980_v22 = vadd.f32 %v6126_v13, %v8361_v38  ;;  %v9417_v54 = vsel %vm8181_vm9, %v8186_v36, %v8115_v18 }
 0x21f   : > { %vm8746_vm12 = vcmp.lt.s32.totalorder %v9417_v54, 16  ;;  %v4712_v29 = vsel %vm9420_vm15, %v4661_v42, 0.0  ;;  %v4827_v25 = vsel %vm9407_vm0, %v4778_v53, 0.0  ;;  %v6127_v28 = vadd.f32 %v3829_v2, %v2113_v50  ;;  %vm9427_vm15 = vmmov %vm9407_vm0  ;;  %v6087_v50 = vpop.f32.mrb[22].mxu0 }
 0x220   : > { %v8753_v32 = vsub.s32 %v8384_v35, %v4415_v20  ;;  %v4829_v19 = vsel %vm9421_vm8, %v4779_v14, 0.0  ;;  %v4828_v33 = vadd.f32 %v4827_v25, %v4826_v16  ;;  %v4662_v18 = vsel %vm8660_vm13, %v3977_v59, 0.0  ;;  %vm9426_vm13 = vmmov %vm9407_vm0  ;;  %v2133_v14 = vpop.f32.mrb[23].mxu1 }
 0x221   : > { %v4713_v36 = vadd.f32 %v4712_v29, %v4711_v15  ;;  %v9422_v42 = vsel %vm8199_vm6, %v8204_v41, %v8118_v27  ;;  %v4714_v35 = vsel %vm9425_vm14, %v4662_v18, 0.0  ;;  %v4780_v20 = vmul.f32 %v4662_v18, %v3977_v59  ;;  %vm9428_vm6 = vmmov %vm9407_vm0 }
 0x222   : > { %vm8763_vm9 = vcmp.lt.s32.totalorder %v9422_v42, 16  ;;  %v4665_v63 = vsel %vm8672_vm11, %v3980_v22, 0.0  ;;  %v3979_v5 = vadd.f32 %v6127_v28, %v8361_v38  ;;  %v4716_v43 = vsel %vm9426_vm13, %v4663_v46, 0.0  ;;  %vm9429_vm11 = vmmov %vm9407_vm0  ;;  %v3849_v46 = vpop.f32.mrb[23].mxu0  ;;  %v9450_v42 = vld [vmem:[#allocation53_spill] sm:$0xff] }
 0x223   : > { %v4833_v57 = vsel %vm9427_vm15, %v4781_v17, 0.0  ;;  %v4715_v4 = vadd.f32 %v4714_v35, %v4713_v36  ;;  %v4830_v21 = vadd.f32 %v4829_v19, %v4828_v33  ;;  %v4831_v27 = vsel %vm9428_vm6, %v4780_v20, 0.0  ;;  %vm9438_vm14 = vmmov %vm9428_vm6  ;;  %v6090_v28 = vpop.f32.mrb[24].mxu0  ;;  %v9447_v36 = vld [vmem:[#allocation62_spill] sm:$0xff] }
 0x224   : > { %v4664_v41 = vsel %vm8693_vm7, %v3979_v5, 0.0  ;;  %v6128_v58 = vadd.f32 %v6084_v62, %v5860_v61  ;;  %v6129_v3 = vadd.f32 %v3839_v26, %v2123_v60  ;;  %v4783_v12 = vmul.f32 %v4665_v63, %v3980_v22  ;;  %vm9433_vm7 = vmmov %vm9428_vm6  ;;  %v5866_v61 = vpop.f32.mrb[24].mxu1  ;;  %v3859_v19 = vpop.f32.mrb[25].mxu0  ;;  %v9449_v26 = vld [vmem:[#allocation63_spill] sm:$0xff] }
 0x225   : > { %v4832_v45 = vadd.f32 %v4831_v27, %v4830_v21  ;;  %v4717_v13 = vadd.f32 %v4716_v43, %v4715_v4  ;;  %v4718_v2 = vsel %vm9429_vm11, %v4664_v41, 0.0  ;;  %v9430_v48 = vsel %vm8215_vm2, %v8235_v56, %v8133_v23  ;;  %v2143_v62 = vpop.f32.mrb[25].mxu1  ;;  %vm8808_vm13 = vmand %vm4501_vm1, %vm4465_vm4 }
 0x226   : > { %vm8782_vm0 = vcmp.lt.s32.totalorder %v9430_v48, 16  ;;  %v4782_v8 = vmul.f32 %v4664_v41, %v3979_v5  ;;  %v3982_v6 = vadd.f32 %v6128_v58, %v8361_v38  ;;  %v3981_v53 = vadd.f32 %v6129_v3, %v8361_v38  ;;  %vm9441_vm15 = vmmov %vm9428_vm6  ;;  %v5869_v21 = vpop.f32.mrb[26].mxu1  ;;  %v6093_v3 = vpop.f32.mrb[26].mxu0  ;;  %v9459_v48 = vld [vmem:[#allocation64_spill] sm:$0xff] }
 0x227   : > { %v6130_v16 = vadd.f32 %v6087_v50, %v5863_v1  ;;  %v4720_v15 = vsel %vm9433_vm7, %v4665_v63, 0.0  ;;  %v4719_v17 = vadd.f32 %v4718_v2, %v4717_v13  ;;  %v4834_v59 = vadd.f32 %v4833_v57, %v4832_v45  ;;  %vm9454_vm11 = vmmov %vm9428_vm6  ;;  %v2153_v50 = vpop.f32.mrb[27].mxu1  ;;  %v3869_v2 = vpop.f32.mrb[27].mxu0 }
 0x228   : > { %v6131_v22 = vadd.f32 %v3849_v46, %v2133_v14  ;;  %vm9434_vm8 = vnez %v9213_v30  ;;  %v4835_v10 = vsel %vm9438_vm14, %v4782_v8, 0.0  ;;  %v4667_v54 = vsel %vm8720_vm3, %v3982_v6, 0.0  ;;  %vm9455_vm7 = vmmov %vm9428_vm6  ;;  %v9457_v46 = vld [vmem:[#allocation65_spill] sm:$0xff]  ;;  %v9460_v8 = vld [vmem:[#allocation54_spill] sm:$0xff] }
 0x229   : > { %v9435_v56 = vsel %vm9434_vm8, %v8259_v0, %v8140_v11  ;;  %v4666_v29 = vsel %vm8729_vm10, %v3981_v53, 0.0  ;;  %v3984_v25 = vadd.f32 %v6130_v16, %v8361_v38  ;;  %v4837_v30 = vsel %vm9441_vm15, %v4783_v12, 0.0  ;;  %vm9464_vm15 = vmmov %vm9428_vm6 }
 0x22a   : > { %vm8794_vm2 = vcmp.lt.s32.totalorder %v9435_v56, 16  ;;  %v4836_v0 = vadd.f32 %v4835_v10, %v4834_v59  ;;  %v4785_v52 = vmul.f32 %v4667_v54, %v3982_v6  ;;  %v4721_v60 = vadd.f32 %v4720_v15, %v4719_v17  ;;  %v5872_v10 = vpop.f32.mrb[28].mxu1 }
 0x22b   : > { %vm9443_vm3 = vnez %v9442_v39  ;;  %vm9448_vm4 = vnez %v9447_v36  ;;  %v4722_v63 = vsel %vm9428_vm6, %v4666_v29, 0.0  ;;  %v4784_v5 = vmul.f32 %v4666_v29, %v3981_v53  ;;  %v9476_v36 = vld [vmem:[#allocation72_spill] sm:$0xff] }
 0x22c   : > { %v9444_v33 = vsel %vm9443_vm3, %v8270_v55, %v8150_v44  ;;  %v9451_v35 = vsel %vm9448_vm4, %v9449_v26, %v9450_v42  ;;  %v4669_v43 = vsel %vm8746_vm12, %v3984_v25, 0.0  ;;  %v3983_v44 = vadd.f32 %v6131_v22, %v8361_v38  ;;  %vm9456_vm12 = vmmov %vm9428_vm6 }
 0x22d   : > { %vm8818_vm10 = vcmp.lt.s32.totalorder %v9444_v33, 16  ;;  %vm8827_vm1 = vcmp.lt.s32.totalorder %v9451_v35, 16  ;;  %v4724_v55 = vsel %vm9454_vm11, %v4667_v54, 0.0  ;;  %v4723_v57 = vadd.f32 %v4722_v63, %v4721_v60  ;;  %vm9466_vm3 = vmmov %vm9428_vm6  ;;  %v9470_v60 = vld [vmem:[#allocation56_spill] sm:$0xff]  ;;  %v9474_v33 = vld [vmem:[#allocation6_spill] sm:$0xff] }
 0x22e   : > { %v4838_v4 = vadd.f32 %v4837_v30, %v4836_v0  ;;  %v4609_v1 = vsel %vm8808_vm13, %v8737_v7, %v8642_v49  ;;  %v4839_v27 = vsel %vm9455_vm7, %v4784_v5, 0.0  ;;  %v4787_v41 = vmul.f32 %v4669_v43, %v3984_v25  ;;  %v6096_v30 = vpop.f32.mrb[28].mxu0  ;;  %v2163_v0 = vpop.f32.mrb[29].mxu1  ;;  %vm9481_vm7 = vmmov %vm9466_vm3 }
 0x22f   : > { %v4668_v58 = vsel %vm8763_vm9, %v3983_v44, 0.0  ;;  %v6132_v47 = vadd.f32 %v6090_v28, %v5866_v61  ;;  %v4725_v45 = vadd.f32 %v4724_v55, %v4723_v57  ;;  %vm9458_vm8 = vnez %v9457_v46  ;;  %vm9465_vm9 = vmmov %vm9428_vm6 }
 0x230   : > { %v4840_v14 = vadd.f32 %v4839_v27, %v4838_v4  ;;  %v4726_v12 = vsel %vm9456_vm12, %v4668_v58, 0.0  ;;  %v4786_v13 = vmul.f32 %v4668_v58, %v3983_v44  ;;  %v9461_v6 = vsel %vm9458_vm8, %v9459_v48, %v9460_v8  ;;  %v9484_v27 = vld [vmem:[#allocation69_spill] sm:$0xff]  ;;  %v9485_v58 = vld [vmem:[#allocation58_spill] sm:$0xff] }
 0x231   : > { %vm8849_vm14 = vcmp.lt.s32.totalorder %v9461_v6, 16  ;;  %v4841_v40 = vsel %vm9464_vm15, %v4785_v52, 0.0  ;;  %v3986_v16 = vadd.f32 %v6132_v47, %v8361_v38  ;;  %v6133_v15 = vadd.f32 %v3859_v19, %v2143_v62  ;;  %v9467_v52 = vld [vmem:[#allocation67_spill] sm:$0xff]  ;;  %v9469_v62 = vld [vmem:[#allocation66_spill] sm:$0xff] }
 0x232   : > { %v6134_v17 = vadd.f32 %v6093_v3, %v5869_v21  ;;  %v4727_v59 = vadd.f32 %v4726_v12, %v4725_v45  ;;  %v4842_v22 = vadd.f32 %v4841_v40, %v4840_v14  ;;  %v4843_v61 = vsel %vm9465_vm9, %v4786_v13, 0.0  ;;  %v9482_v21 = vld [vmem:[#allocation70_spill] sm:$0xff]  ;;  %vm9489_vm9 = vmmov %vm9466_vm3  ;;  %v5875_v45 = vpop.f32.mrb[30].mxu1 }
 0x233   : > { %v6135_v56 = vadd.f32 %v3869_v2, %v2153_v50  ;;  %v4728_v54 = vsel %vm9466_vm3, %v4669_v43, 0.0  ;;  %v4671_v29 = vsel %vm8782_vm0, %v3986_v16, 0.0  ;;  %v3985_v25 = vadd.f32 %v6133_v15, %v8361_v38  ;;  %v3879_v43 = vpop.f32.mrb[29].mxu0  ;;  %v2173_v48 = vpop.f32.mrb[31].mxu1 }
 0x234   : > { %v3988_v28 = vadd.f32 %v6134_v17, %v8361_v38  ;;  %vm9468_vm4 = vnez %v9467_v52  ;;  %vm9475_vm11 = vnez %v9474_v33  ;;  %v4845_v35 = vsel %vm9481_vm7, %v4787_v41, 0.0  ;;  %v6099_v46 = vpop.f32.mrb[30].mxu0  ;;  %v9494_v17 = vld [vmem:[#allocation5_spill] sm:$0xff]  ;;  %v5878_v52 = vpop.f32.mrb[32].mxu1 }
 0x235   : > { %v9471_v19 = vsel %vm9468_vm4, %v9469_v62, %v9470_v60  ;;  %v9478_v26 = vsel %vm9475_vm11, %v9476_v36, %v9477_v37  ;;  %v4844_v63 = vadd.f32 %v4843_v61, %v4842_v22  ;;  %v4729_v5 = vadd.f32 %v4728_v54, %v4727_v59  ;;  %v3889_v15 = vpop.f32.mrb[31].mxu0  ;;  %v9495_v59 = vld [vmem:[#allocation71_spill] sm:$0xff] }
 0x236   : > { %vm8866_vm6 = vcmp.lt.s32.totalorder %v9471_v19, 16  ;;  %vm8875_vm0 = vcmp.lt.s32.totalorder %v9478_v26, 16  ;;  %vm4464_vm12 = vcmp.ne.s32.totalorder %v8753_v32, 0  ;;  %v4789_v44 = vmul.f32 %v4671_v29, %v3986_v16  ;;  %v6102_v51 = vpop.f32.mrb[32].mxu0 }
 0x237   : > { %v4670_v55 = vsel %vm8794_vm2, %v3985_v25, 0.0  ;;  %v3987_v57 = vadd.f32 %v6135_v56, %v8361_v38  ;;  %v6136_v4 = vadd.f32 %v6096_v30, %v5872_v10  ;;  %vm9483_vm8 = vnez %v9482_v21  ;;  %vm9490_vm2 = vmmov %vm9481_vm7  ;;  %v3899_v36 = vpop.f32.mrb[33].mxu0 }
 0x238   : > { %v9486_v47 = vsel %vm9483_vm8, %v9484_v27, %v9485_v58  ;;  %v4730_v41 = vsel %vm9489_vm9, %v4670_v55, 0.0  ;;  %v4788_v50 = vmul.f32 %v4670_v55, %v3985_v25  ;;  %v4846_v14 = vadd.f32 %v4845_v35, %v4844_v63  ;;  %vm9491_vm4 = vmmov %vm9490_vm2  ;;  %v6105_v58 = vpop.f32.mrb[34].mxu0 }
 0x239   : > { %vm8889_vm15 = vcmp.lt.s32.totalorder %v9486_v47, 16  ;;  %vm4500_vm3 = vcmp.lt.s32.totalorder %v8753_v32, 0  ;;  %v4732_v23 = vsel %vm9490_vm2, %v4671_v29, 0.0  ;;  %v4731_v12 = vadd.f32 %v4730_v41, %v4729_v5  ;;  %vm9492_vm11 = vmmov %vm9490_vm2 }
 0x23a   : > { %v4673_v13 = vsel %vm8818_vm10, %v3988_v28, 0.0  ;;  %v4672_v2 = vsel %vm8827_vm1, %v3987_v57, 0.0  ;;  %v4847_v8 = vsel %vm9491_vm4, %v4788_v50, 0.0  ;;  %v3990_v16 = vadd.f32 %v6136_v4, %v8361_v38  ;;  %vm9501_vm1 = vmmov %vm9490_vm2 }
 0x23b   : > { %v4734_v6 = vsel %vm9492_vm11, %v4672_v2, 0.0  ;;  %v4790_v40 = vmul.f32 %v4672_v2, %v3987_v57  ;;  %vm9493_vm7 = vnez %v9296_v31  ;;  %vm8917_vm10 = vcmp.lt.s32.totalorder %v4606_v24, 16  ;;  %vm9502_vm9 = vmmov %vm9501_vm1  ;;  %v2183_v24 = vpop.f32.mrb[33].mxu1 }
 0x23c   : > { %v9496_v22 = vsel %vm9493_vm7, %v9494_v17, %v9495_v59  ;;  %v4849_v61 = vsel %vm9501_vm1, %v4789_v44, 0.0  ;;  %v4848_v56 = vadd.f32 %v4847_v8, %v4846_v14  ;;  %v4733_v31 = vadd.f32 %v4732_v23, %v4731_v12  ;;  %vm9503_vm2 = vmmov %vm9501_vm1  ;;  %v5881_v55 = vpop.f32.mrb[34].mxu1 }
 0x23d   : > { %vm8908_vm8 = vcmp.lt.s32.totalorder %v9496_v22, 16  ;;  %v6137_v10 = vadd.f32 %v3879_v43, %v2163_v0  ;;  %v4791_v54 = vmul.f32 %v4673_v13, %v3988_v28  ;;  %v4851_v29 = vsel %vm9502_vm9, %v4790_v40, 0.0  ;;  %vm9504_vm5 = vmmov %vm9501_vm1  ;;  %v2193_v47 = vpop.f32.mrb[35].mxu1 }
 0x23e   : > { %v6138_v25 = vadd.f32 %v6099_v46, %v5875_v45  ;;  %v6139_v30 = vadd.f32 %v3889_v15, %v2173_v48  ;;  %v4736_v9 = vsel %vm9503_vm2, %v4673_v13, 0.0  ;;  %v4735_v62 = vadd.f32 %v4734_v6, %v4733_v31  ;;  %vm8941_vm4 = vmand %vm4500_vm3, %vm4464_vm12  ;;  %v3909_v45 = vpop.f32.mrb[35].mxu0 }
 0x23f   : > { %v4850_v60 = vadd.f32 %v4849_v61, %v4848_v56  ;;  %v4675_v34 = vsel %vm8849_vm14, %v3990_v16, 0.0  ;;  %v3989_v19 = vadd.f32 %v6137_v10, %v8361_v38  ;;  %v6140_v0 = vadd.f32 %v6102_v51, %v5878_v52  ;;  %vm9505_vm14 = vmmov %vm9501_vm1 }
 0x240   : > { %v3992_v33 = vadd.f32 %v6138_v25, %v8361_v38  ;;  %v3991_v28 = vadd.f32 %v6139_v30, %v8361_v38  ;;  %v4737_v26 = vadd.f32 %v4736_v9, %v4735_v62  ;;  %v6141_v35 = vadd.f32 %v3899_v36, %v2183_v24 }
 0x241   : > { %v4852_v37 = vadd.f32 %v4851_v29, %v4850_v60  ;;  %v4572_v63 = vadd.s32 18, %v8753_v32  ;;  %v4853_v5 = vsel %vm9504_vm5, %v4791_v54, 0.0  ;;  %v4793_v43 = vmul.f32 %v4675_v34, %v3990_v16 }
 0x242   : > { %v4674_v53 = vsel %vm8866_vm6, %v3989_v19, 0.0  ;;  %v4676_v44 = vsel %vm8875_vm0, %v3991_v28, 0.0  ;;  %v3994_v27 = vadd.f32 %v6140_v0, %v8361_v38  ;;  %vm9508_vm6 = vmmov %vm9501_vm1  ;;  %v4677_v50 = vsel %vm8889_vm15, %v3992_v33, 0.0 }
 0x243   : > { %v4738_v57 = vsel %vm9505_vm14, %v4674_v53, 0.0  ;;  %v4792_v4 = vmul.f32 %v4674_v53, %v3989_v19  ;;  %v4854_v21 = vadd.f32 %v4853_v5, %v4852_v37  ;;  %v4740_v39 = vsel %vm9508_vm6, %v4675_v34, 0.0  ;;  %vm9509_vm0 = vmmov %vm9501_vm1 }
 0x244   : > { %v4739_v42 = vadd.f32 %v4738_v57, %v4737_v26  ;;  %v4794_v14 = vmul.f32 %v4676_v44, %v3991_v28  ;;  %vm9510_vm11 = vmmov %vm9509_vm0  ;;  %v3993_v13 = vadd.f32 %v6141_v35, %v8361_v38  ;;  %v6142_v2 = vadd.f32 %v6105_v58, %v5881_v55  ;;  %v4763_v58 = vld [vmem:[#allocation2 + $0x1] sm:$0x1] }
 0x245   : > { %v4855_v23 = vsel %vm9509_vm0, %v4792_v4, 0.0  ;;  %v4742_v12 = vsel %vm9510_vm11, %v4676_v44, 0.0  ;;  %vm9511_vm7 = vmmov %vm9509_vm0  ;;  %v4608_v6 = vsel %vm8941_vm4, %v4572_v63, %v8753_v32  ;;  %v4795_v40 = vmul.f32 %v4677_v50, %v3992_v33  ;;  %v4682_v4 = vld [vmem:[#allocation2] sm:$0x1] }
 0x246   : > { %v4857_v46 = vsel %vm9511_vm7, %v4793_v43, 0.0  ;;  %v4856_v48 = vadd.f32 %v4855_v23, %v4854_v21  ;;  %v4741_v8 = vadd.f32 %v4740_v39, %v4739_v42  ;;  %vm9512_vm12 = vmmov %vm9509_vm0  ;;  %v4679_v16 = vsel %vm8908_vm8, %v3994_v27, 0.0 }
 0x247   : > { %v4859_v3 = vsel %vm9512_vm12, %v4794_v14, 0.0  ;;  %v4678_v15 = vsel %vm8917_vm10, %v3993_v13, 0.0  ;;  %v3996_v61 = vadd.f32 %v6142_v2, %v8361_v38  ;;  %vm9513_vm15 = vmmov %vm9509_vm0  ;;  %vm4645_vm1 = vcmp.lt.s32.totalorder %v4609_v1, 16 }
 0x248   : > { %v4743_v17 = vadd.f32 %v4742_v12, %v4741_v8  ;;  %v4858_v59 = vadd.f32 %v4857_v46, %v4856_v48  ;;  %v4796_v22 = vmul.f32 %v4678_v15, %v3993_v13  ;;  %v4744_v56 = vsel %vm9513_vm15, %v4677_v50, 0.0  ;;  %vm9514_vm3 = vmmov %vm9509_vm0 }
 0x249   : > { %v4746_v31 = vsel %vm9514_vm3, %v4678_v15, 0.0  ;;  %v6143_v32 = vadd.f32 %v3909_v45, %v2193_v47  ;;  %vm4644_vm8 = vcmp.lt.s32.totalorder %v4608_v6, 16  ;;  %vm9515_vm10 = vmmov %vm9509_vm0  ;;  %v4797_v54 = vmul.f32 %v4679_v16, %v3994_v27 }
 0x24a   : > { %v4860_v18 = vadd.f32 %v4859_v3, %v4858_v59  ;;  %v4745_v10 = vadd.f32 %v4744_v56, %v4743_v17  ;;  %v4861_v20 = vsel %vm9515_vm10, %v4795_v40, 0.0  ;;  %vm9516_vm9 = vmmov %vm9509_vm0  ;;  %v4681_v9 = vsel %vm4645_vm1, %v3996_v61, 0.0 }
 0x24b   : > { %v4863_v29 = vsel %vm9516_vm9, %v4796_v22, 0.0  ;;  %v3995_v25 = vadd.f32 %v6143_v32, %v8361_v38  ;;  %vm9517_vm2 = vmmov %vm9509_vm0  ;;  %v4799_v51 = vmul.f32 %v4681_v9, %v3996_v61 }
 0x24c   : > { %v4747_v30 = vadd.f32 %v4746_v31, %v4745_v10  ;;  %v4862_v52 = vadd.f32 %v4861_v20, %v4860_v18  ;;  %v4748_v11 = vsel %vm9517_vm2, %v4679_v16, 0.0  ;;  %vm9518_vm13 = vmmov %vm9509_vm0 }
 0x24d   : > { %v4680_v62 = vsel %vm4644_vm8, %v3995_v25, 0.0  ;;  %vm9519_vm5 = vmmov %vm9509_vm0 }
 0x24e   : > { %v4864_v60 = vadd.f32 %v4863_v29, %v4862_v52  ;;  %v4749_v49 = vadd.f32 %v4748_v11, %v4747_v30  ;;  %v4750_v7 = vsel %vm9518_vm13, %v4680_v62, 0.0  ;;  %v4798_v1 = vmul.f32 %v4680_v62, %v3995_v25  ;;  %vm9520_vm14 = vmmov %vm9509_vm0 }
 0x24f   : > { %v4865_v34 = vsel %vm9519_vm5, %v4797_v54, 0.0  ;;  %vm9521_vm4 = vmmov %vm9509_vm0 }
 0x250   : > { %v4751_v24 = vadd.f32 %v4750_v7, %v4749_v49  ;;  %v4866_v19 = vadd.f32 %v4865_v34, %v4864_v60  ;;  %v4867_v33 = vsel %vm9520_vm14, %v4798_v1, 0.0  ;;  %v4752_v38 = vsel %vm9521_vm4, %v4681_v9, 0.0  ;;  %vm9522_vm6 = vmmov %vm9509_vm0 }
 0x251   : > { %v4869_v36 = vsel %vm9522_vm6, %v4799_v51, 0.0  ;;  %vm4761_vm0 = vcmask 24576  }
 0x252   : > { %v4753_v28 = vadd.f32 %v4752_v38, %v4751_v24  ;;  %v4868_v0 = vadd.f32 %v4867_v33, %v4866_v19 }
 0x254   : > { %v4754_v37 = vrot.slane %v4753_v28, 4  ;;  %v4870_v26 = vadd.f32 %v4869_v36, %v4868_v0 }
 0x256   : > { %v4755_v35 = vadd.f32 %v4754_v37, %v4753_v28  ;;  %v4871_v63 = vrot.slane %v4870_v26, 4 }
 0x258   : > { %v4756_v5 = vrot.slane %v4755_v35, 2  ;;  %v4872_v43 = vadd.f32 %v4871_v63, %v4870_v26 }
 0x25a   : > { %v4757_v53 = vadd.f32 %v4756_v5, %v4755_v35  ;;  %v4873_v44 = vrot.slane %v4872_v43, 2 }
 0x25c   : > { %v4758_v55 = vrot.slane %v4757_v53, 1  ;;  %v4874_v57 = vadd.f32 %v4873_v44, %v4872_v43 }
 0x25e   : > { %v4759_v21 = vadd.f32 %v4758_v55, %v4757_v53  ;;  %v4875_v27 = vrot.slane %v4874_v57, 1 }
 0x260   : > { %v4760_v47 = vadd.f32 %v4759_v21, %v4682_v4  ;;  %v4876_v41 = vadd.f32 %v4875_v27, %v4874_v57 }
 0x262   : > { %4762 = vst.msk [vmem:[#allocation2] sm:$0x1] %vm4761_vm0, %v4760_v47  ;;  %v4877_v39 = vadd.f32 %v4876_v41, %v4763_v58 }
 0x264   : > { %4878 = vst.msk [vmem:[#allocation2 + $0x1] sm:$0x1] %vm4761_vm0, %v4877_v39 }
 0x265   : > { %6498 = shalt.err (!%p6495_p12)
}
 0x266   : > { %s6499_s19 = scalar_lea.hbm %s9006_s3, 32 }
 0x267   : > { %p6500_p13 = scmp.ne.s32.totalorder %s9006_s3, %s6499_s19  ;;  %p6505_p2 = scmp.lt.u32.totalorder %s6499_s19, %s9006_s3 }
 0x269   : > { %p6501_p0 = pnand %p6500_p13, %p6473_p5 }
 0x26b   : > { %p6502_p1 = pneg %p6501_p0 }
 0x26d   : > { %p6507_p3 = pnand %p6505_p2, %p6502_p1 }
 0x26f   : > { %6510 = shalt.err (!%p6507_p3)
}
 0x270   : > { %6470 = dma.vmem_to_hbm [thread:$0]  (%p6473_p5), %s4887_s15, 32, %s9006_s3, [#allocation3]  }
 0x271   : > { %6516 = dma.done.wait (%p6473_p5), [#allocation3], 32  }
 0x272   : > { %6518 = vsyncadd (%p6473_p5), [#allocation3], 4294967264 }
 0x273 PF: > { %s14_s12 = sadd.s32 1, %s6521_s12  }
 0x274   : > { %p11_p4 = scmp.ge.s32.totalorder %s14_s12, 4  }
 0x276   :  { %13 = sbr.rel (!%p11_p4) target bundleno = 1 (0x1), region = 63 }
 0x27d   :  { %4899 = vsyncpa [#allocation3], 1 }
 0x27e   :  { %4901 = vsyncpa [#allocation3 + $0x1], 1 }

</bundles_post_ra>
